<compile_context>
chip_gen: v7x
topology: tpu7x:2x2x1
jax: 0.10.0
libtpu: 0.0.40
codegen_flags: <defaults>
</compile_context>

<pallas_src>
import jax
import jax.numpy as jnp
from jax.experimental import pallas as pl
from jax.experimental.pallas import tpu as pltpu

# ---------------- problem sizes ---------------------------------------------
S = 16            # stocks per problem instance
T = 16            # time_steps
C = 4             # channels
MKT = 8           # "market" hidden dim of NoGraphMixer
SCALE_DIM = 8     # hard-coded in StockMixer.__init__ (must equal T // 2)
T2 = T // 2
T_TOT = 2 * T + SCALE_DIM                       # 40

# ---------------- kernel layout constants -----------------------------------
NL = 128          # lanes per grid block (= one full vreg lane width)
B_BLK = NL // S   # problem instances per 128-lane block (8)
RT = C * T        # 64  rows of the t-mixer segment (channel-major, time-minor)
RS = C * T2       # 32  rows of the s-mixer segment
RX = 128          # padded rows of the x activation  (C*T = 64 -> 128)
RM = 128          # padded rows of the stacked mixer activation (96 -> 128)

MIX_KEYS = ("ln1_g", "ln1_b", "ln2_g", "ln2_b",
            "tw1", "tb1", "tw2", "tb2",
            "cw1", "cb1", "cw2", "cb2")


def _hardswish(x):
    return x * jnp.clip(x + 3.0, 0.0, 6.0) * (1.0 / 6.0)


# ======================= one-time weight folding / packing ==================
def pack_params(p):
    """Fold every StockMixer weight into lane-dense B-layout operators and pack
    them into ONE (rows, 128) slab. Runs once; returns (slab, static offsets)."""
    assert T % 2 == 0 and T // 2 == SCALE_DIM, "conv output length must equal scale_dim"
    f32 = jnp.float32
    asf = lambda a: jnp.asarray(a, f32)

    def bcast(col, rows=None):                      # (r,1)-ish -> (rows, NL)
        col = asf(col).reshape(-1, 1)
        if rows is not None and col.shape[0] < rows:
            col = jnp.pad(col, ((0, rows - col.shape[0]), (0, 0)))
        return jnp.tile(col, (1, NL))

    entries = {}

    # --- stacked mixer input operator: [x ; conv(x) ; 0] = a_op @ x_pad + bias
    E0 = jnp.zeros((T2, T), f32).at[jnp.arange(T2), 2 * jnp.arange(T2)].set(1.0)
    E1 = jnp.zeros((T2, T), f32).at[jnp.arange(T2), 2 * jnp.arange(T2) + 1].set(1.0)
    conv_op = jnp.kron(asf(p["conv_w0"]).T, E0) + jnp.kron(asf(p["conv_w1"]).T, E1)
    a_op = jnp.zeros((RM, RX), f32)
    a_op = a_op.at[0:RT, 0:RT].set(jnp.eye(RT, dtype=f32))
    a_op = a_op.at[RT:RT + RS, 0:RT].set(conv_op)
    entries["a_op"] = a_op
    conv_b_col = jnp.repeat(asf(p["conv_b"]).reshape(C, 1), T2, axis=0)
    entries["a_bias"] = bcast(jnp.concatenate([jnp.zeros((RT, 1), f32), conv_b_col], 0), RM)

    # --- per-mixer joint-LayerNorm mean operator (MXU-side reduction)
    m_seg = jnp.zeros((RM, RM), f32)
    m_seg = m_seg.at[0:RT, 0:RT].set(1.0 / RT)
    m_seg = m_seg.at[RT:RT + RS, RT:RT + RS].set(1.0 / RS)
    entries["m_seg"] = m_seg

    # --- fused (block-diagonal) Mixer2d weights
    i_c = jnp.eye(C, dtype=f32)

    def blockdiag(t_blk, s_blk):
        m = jnp.zeros((RM, RM), f32)
        m = m.at[0:RT, 0:RT].set(t_blk)
        m = m.at[RT:RT + RS, RT:RT + RS].set(s_blk)
        return m

    def seg_col(t_col, s_col):
        return bcast(jnp.concatenate([asf(t_col).reshape(-1, 1),
                                      asf(s_col).reshape(-1, 1)], 0), RM)

    entries["tw1"] = blockdiag(jnp.kron(i_c, asf(p["t_tw1"]).T),
                               jnp.kron(i_c, asf(p["s_tw1"]).T))
    entries["tw2"] = blockdiag(jnp.kron(i_c, asf(p["t_tw2"]).T),
                               jnp.kron(i_c, asf(p["s_tw2"]).T))
    entries["cw1"] = blockdiag(jnp.kron(asf(p["t_cw1"]).T, jnp.eye(T, dtype=f32)),
                               jnp.kron(asf(p["s_cw1"]).T, jnp.eye(T2, dtype=f32)))
    entries["cw2"] = blockdiag(jnp.kron(asf(p["t_cw2"]).T, jnp.eye(T, dtype=f32)),
                               jnp.kron(asf(p["s_cw2"]).T, jnp.eye(T2, dtype=f32)))
    entries["g1"] = seg_col(asf(p["t_ln1_g"]).T.reshape(-1), asf(p["s_ln1_g"]).T.reshape(-1))
    entries["b1"] = seg_col(asf(p["t_ln1_b"]).T.reshape(-1), asf(p["s_ln1_b"]).T.reshape(-1))
    entries["g2"] = seg_col(asf(p["t_ln2_g"]).T.reshape(-1), asf(p["s_ln2_g"]).T.reshape(-1))
    entries["b2"] = seg_col(asf(p["t_ln2_b"]).T.reshape(-1), asf(p["s_ln2_b"]).T.reshape(-1))
    entries["tb1"] = seg_col(jnp.tile(asf(p["t_tb1"]).reshape(T, 1), (C, 1)),
                             jnp.tile(asf(p["s_tb1"]).reshape(T2, 1), (C, 1)))
    entries["tb2"] = seg_col(jnp.tile(asf(p["t_tb2"]).reshape(T, 1), (C, 1)),
                             jnp.tile(asf(p["s_tb2"]).reshape(T2, 1), (C, 1)))
    entries["cb1"] = seg_col(jnp.repeat(asf(p["t_cb1"]).reshape(C, 1), T, axis=0),
                             jnp.repeat(asf(p["s_cb1"]).reshape(C, 1), T2, axis=0))
    entries["cb2"] = seg_col(jnp.repeat(asf(p["t_cb2"]).reshape(C, 1), T, axis=0),
                             jnp.repeat(asf(p["s_cb2"]).reshape(C, 1), T2, axis=0))

    # --- channel_fc over concat([x, mix_t, mix_s]) -> y_t (T_TOT, NL), 2 dots
    w_row = asf(p["chfc_w"]).reshape(1, C)
    chfc_x = jnp.zeros((T_TOT, RX), f32)
    chfc_x = chfc_x.at[0:T, 0:RT].set(jnp.kron(w_row, jnp.eye(T, dtype=f32)))
    chfc_mix = jnp.zeros((T_TOT, RM), f32)
    chfc_mix = chfc_mix.at[T:2 * T, 0:RT].set(jnp.kron(w_row, jnp.eye(T, dtype=f32)))
    chfc_mix = chfc_mix.at[2 * T:T_TOT, RT:RT + RS].set(
        jnp.kron(w_row, jnp.eye(T2, dtype=f32)))
    entries["chfc_x"] = chfc_x
    entries["chfc_mix"] = chfc_mix
    entries["chfc_b"] = jnp.full((1, NL), asf(p["chfc_b"]).reshape(()), f32)

    # --- NoGraphMixer (per-instance lane groups of S stocks), MXU reductions
    i_b = jnp.eye(B_BLK, dtype=f32)
    entries["mg"] = jnp.kron(i_b, jnp.full((S, S), 1.0 / S, f32))        # (128,128)
    entries["sm_g"] = jnp.tile(asf(p["sm_ln_g"]).reshape(1, S), (1, B_BLK))
    entries["sm_b"] = jnp.tile(asf(p["sm_ln_b"]).reshape(1, S), (1, B_BLK))
    w1k = jnp.kron(i_b, asf(p["sm_w1"]))                                 # (128, 64)
    entries["sm_w1"] = jnp.pad(w1k, ((0, 0), (0, NL - w1k.shape[1])))
    entries["sm_b1"] = jnp.pad(jnp.tile(asf(p["sm_b1"]).reshape(1, MKT), (1, B_BLK)),
                               ((0, 0), (0, NL - B_BLK * MKT)))
    w2k = jnp.kron(i_b, asf(p["sm_w2"]))                                 # (64, 128)
    entries["sm_w2"] = jnp.pad(w2k, ((0, NL - w2k.shape[0]), (0, 0)))
    entries["sm_b2"] = jnp.tile(asf(p["sm_b2"]).reshape(1, S), (1, B_BLK))

    # --- fused output heads: time_fc(y) + time_fc_(z)
    entries["head_y"] = asf(p["tfc_w"]).reshape(1, T_TOT)
    entries["head_z"] = asf(p["tfc2_w"]).reshape(1, T_TOT)
    entries["head_b"] = jnp.full(
        (1, NL), asf(p["tfc_b"]).reshape(()) + asf(p["tfc2_b"]).reshape(()), f32)

    # --- pack into a single lane-dense (rows, 128) slab, 8-row aligned offsets
    chunks, offsets, row = [], {}, 0
    for name, a in entries.items():
        r, c = a.shape
        pad_r = (-r) % 8
        chunks.append(jnp.pad(a, ((0, pad_r), (0, NL - c))))
        offsets[name] = (row, r, c)
        row += r + pad_r
    slab = jnp.concatenate(chunks, axis=0)
    return slab, offsets


# ======================= fused forward (single Pallas kernel) ================
def stockmixer_forward(x, slab, offsets):
    """x: (B, S, T, C) float32, slab/offsets from pack_params.  Returns (B, S, 1)."""
    b, s, t, c = x.shape
    assert s == S and t == T and c == C
    assert t // 2 == SCALE_DIM, "conv output length must equal scale_dim"
    lanes = b * s
    assert lanes % NL == 0, "batch * stocks must be a multiple of 128"
    nb = lanes // NL

    # B-layout: rows = (channel, time), lanes = (instance, stock); pad rows to 128.
    xb = jnp.transpose(x.astype(jnp.float32), (3, 2, 0, 1)).reshape(c * t, lanes)
    xb = jnp.pad(xb, ((0, RX - c * t), (0, 0)))

    slab_rows = slab.shape[0]

    def kernel(xb_ref, slab_ref, out_ref):
        def P(name):
            off, r, cc = offsets[name]
            return slab_ref[off:off + r, 0:cc]          # static, 8-aligned slice

        def mm(a, bb):
            return jnp.dot(a, bb, preferred_element_type=jnp.float32)

        xv = xb_ref[...]                                 # (RX, NL)

        # Conv1d(k=2,s=2) + identity pass-through -> stacked mixer input, 1 dot.
        a_cat = mm(P("a_op"), xv) + P("a_bias")          # (RM, NL)

        # Fused (block-diagonal) pair of Mixer2d blocks; joint-LayerNorm
        # reductions routed through the MXU via the m_seg mean operator.
        def ln(a, g, bb):
            mu = mm(P("m_seg"), a)
            d = a - mu
            var = mm(P("m_seg"), d * d)
            return d * jax.lax.rsqrt(var + 1e-5) * g + bb

        h = ln(a_cat, P("g1"), P("b1"))
        tm = mm(P("tw2"), _hardswish(mm(P("tw1"), h) + P("tb1"))) + P("tb2")
        h2 = ln(h + tm + a_cat, P("g2"), P("b2"))
        cm = mm(P("cw2"), _hardswish(mm(P("cw1"), h2) + P("cb1"))) + P("cb2")
        mix = 2.0 * h2 + cm                              # (RM, NL)

        # channel_fc over concat([x, mix_t, mix_s]) -> y_t (T_TOT, NL), 2 dots.
        y_t = mm(P("chfc_x"), xv) + mm(P("chfc_mix"), mix) + P("chfc_b")

        # NoGraphMixer: per-instance LayerNorm over the 16 stock lanes of each
        # group (reduction = right-multiply by mg) + two dense layers.
        mu = mm(y_t, P("mg"))
        d = y_t - mu
        var = mm(d * d, P("mg"))
        hn = d * jax.lax.rsqrt(var + 1e-5) * P("sm_g") + P("sm_b")
        z_t = mm(_hardswish(mm(hn, P("sm_w1")) + P("sm_b1")), P("sm_w2")) + P("sm_b2")

        # Fused output heads: time_fc(y) + time_fc_(z); lane-dense (1, NL) store.
        out_ref[...] = mm(P("head_y"), y_t) + mm(P("head_z"), z_t) + P("head_b")

    out = pl.pallas_call(
        kernel,
        out_shape=jax.ShapeDtypeStruct((1, lanes), jnp.float32),
        grid_spec=pltpu.PrefetchScalarGridSpec(
            num_scalar_prefetch=0,
            grid=(nb,),
            in_specs=[pl.BlockSpec((RX, NL), lambda i: (0, i)),
                      pl.BlockSpec((slab_rows, NL), lambda i: (0, 0))],
            out_specs=pl.BlockSpec((1, NL), lambda i: (0, i))),
        compiler_params=pltpu.CompilerParams(
            dimension_semantics=("parallel",),
            vmem_limit_bytes=32 * 1024 * 1024),
    )(xb, slab)
    return out.reshape(b, s, 1)


def make_forward(params):
    """Packs the weight slab ONCE and returns (jitted forward, slab)."""
    slab, offsets = pack_params(params)

    @jax.jit
    def forward(x, slab_in):
        return stockmixer_forward(x, slab_in, offsets)

    return forward, slab


# ======================= pure-JAX reference (same math, no Pallas) ===========
def _ln_joint(x, g, b, eps=1e-5):
    n = x.shape[0] * x.shape[1]
    mu = jnp.sum(x) / n
    d = x - mu
    var = jnp.sum(d * d) / n
    return d * jax.lax.rsqrt(var + eps) * g + b


def _mixer2d(x, p):
    h = _ln_joint(x, p["ln1_g"], p["ln1_b"])
    ht = h.T
    m = _hardswish(ht @ p["tw1"] + p["tb1"])
    m = m @ p["tw2"] + p["tb2"]
    ht = ht + m
    h = _ln_joint(ht.T + x, p["ln2_g"], p["ln2_b"])
    m = _hardswish(h @ p["cw1"] + p["cb1"])
    m = m @ p["cw2"] + p["cb2"]
    return h + (h + m)


def _reference_single(x, p):
    xe = x[0::2, :]
    xo = x[1::2, :]
    conv = xe @ p["conv_w0"] + xo @ p["conv_w1"] + p["conv_b"]
    t_p = {k: p["t_" + k] for k in MIX_KEYS}
    s_p = {k: p["s_" + k] for k in MIX_KEYS}
    mix_t = _mixer2d(x, t_p)
    mix_s = _mixer2d(conv, s_p)
    y3 = jnp.concatenate([x, mix_t, mix_s], axis=0)              # (T_TOT, C)
    y = (y3 @ p["chfc_w"])[:, 0] + p["chfc_b"][0, 0]             # (T_TOT,)
    return y


def reference_forward(x, p):
    """x: (B, S, T, C) -> (B, S, 1)."""
    y = jax.vmap(jax.vmap(lambda xi: _reference_single(xi, p)))(x)   # (B, S, T_TOT)

    def stock_mix(yb):                                                # yb: (S, T_TOT)
        yT = yb.T                                                     # (T_TOT, S)
        mu = jnp.mean(yT, -1, keepdims=True)
        d = yT - mu
        var = jnp.mean(d * d, -1, keepdims=True)
        h = d * jax.lax.rsqrt(var + 1e-5) * p["sm_ln_g"] + p["sm_ln_b"]
        z = (_hardswish(h @ p["sm_w1"] + p["sm_b1"]) @ p["sm_w2"] + p["sm_b2"]).T
        return yb @ p["tfc_w"] + p["tfc_b"] + z @ p["tfc2_w"] + p["tfc2_b"]

    return jax.vmap(stock_mix)(y)                                     # (B, S, 1)


# ======================= deterministic parameter init ========================
def init_params(key):
    keys = iter(jax.random.split(key, 64))

    def w(shape, scale=0.2):
        return (scale * jax.random.normal(next(keys), shape)).astype(jnp.float32)

    p = {}
    p["conv_w0"] = w((C, C))          # Conv1d tap 0, stored (C_in, C_out)
    p["conv_w1"] = w((C, C))          # Conv1d tap 1
    p["conv_b"] = w((1, C))
    for prefix, L in (("t_", T), ("s_", SCALE_DIM)):
        p[prefix + "ln1_g"] = jnp.ones((L, C), jnp.float32) + w((L, C), 0.05)
        p[prefix + "ln1_b"] = w((L, C), 0.05)
        p[prefix + "ln2_g"] = jnp.ones((L, C), jnp.float32) + w((L, C), 0.05)
        p[prefix + "ln2_b"] = w((L, C), 0.05)
        p[prefix + "tw1"] = w((L, L))
        p[prefix + "tb1"] = w((1, L))
        p[prefix + "tw2"] = w((L, L))
        p[prefix + "tb2"] = w((1, L))
        p[prefix + "cw1"] = w((C, C))
        p[prefix + "cb1"] = w((1, C))
        p[prefix + "cw2"] = w((C, C))
        p[prefix + "cb2"] = w((1, C))
    p["chfc_w"] = w((C, 1))
    p["chfc_b"] = w((1, 1))
    p["sm_ln_g"] = jnp.ones((1, S), jnp.float32) + w((1, S), 0.05)
    p["sm_ln_b"] = w((1, S), 0.05)
    p["sm_w1"] = w((S, MKT))
    p["sm_b1"] = w((1, MKT))
    p["sm_w2"] = w((MKT, S))
    p["sm_b2"] = w((1, S))
    p["tfc_w"] = w((T_TOT, 1))
    p["tfc_b"] = w((1, 1))
    p["tfc2_w"] = w((T_TOT, 1))
    p["tfc2_b"] = w((1, 1))
    return p


if __name__ == "__main__":
    key = jax.random.PRNGKey(0)
    k_in, k_par = jax.random.split(key)

    B = 16                                           # 16 instances x 16 stocks = 256 lanes
    x = jax.random.normal(k_in, (B, S, T, C), dtype=jnp.float32)
    params = init_params(k_par)

    fwd, slab = make_forward(params)                 # weight slab packed exactly once
    out = jax.block_until_ready(fwd(x, slab))

    with jax.default_matmul_precision("highest"):    # high-precision reference
        ref = jax.block_until_ready(jax.jit(reference_forward)(x, params))

    assert out.shape == (B, S, 1), out.shape
    err = float(jnp.max(jnp.abs(out - ref)))
    # Tolerance allows for differing MXU matmul-pass precision between the
    # folded in-kernel dots and the XLA reference; structural bugs give O(1) errors.
    if not bool(jnp.allclose(out, ref, rtol=2e-2, atol=2e-2)):
        raise AssertionError(f"Pallas kernel mismatch vs reference: max abs err = {err}")
    print("KERNEL_OK")
</pallas_src>

<mosaic_0001>
module attributes {stable_mosaic.version = 11 : i64} {
  func.func @kernel(%arg0: i32, %arg1: memref<128x128xf32, #tpu.memory_space<vmem>>, %arg2: memref<2448x128xf32, #tpu.memory_space<vmem>>, %arg3: memref<1x128xf32, #tpu.memory_space<vmem>>) attributes {dimension_semantics = [#tpu.dimension_semantics<parallel>], iteration_bounds = array<i64: 2>, scalar_prefetch = 0 : i64, scratch_operands = 0 : i64, tpu.core_type = #tpu.core_type<tc>, window_params = [{transform_indices = @transform_0, window_bounds = array<i64: 128, 128>}, {pipeline_mode = #tpu.pipeline_mode<synchronous>, transform_indices = @transform_1, window_bounds = array<i64: 2448, 128>}, {transform_indices = @transform_2, window_bounds = array<i64: 1, 128>}]} {
    %c0 = arith.constant 0 : index
    %c0_0 = arith.constant 0 : index
    %0 = vector.load %arg1[%c0, %c0_0] : memref<128x128xf32, #tpu.memory_space<vmem>>, vector<128x128xf32>
    %c0_1 = arith.constant 0 : index
    %c0_2 = arith.constant 0 : index
    %1 = vector.load %arg2[%c0_1, %c0_2] : memref<2448x128xf32, #tpu.memory_space<vmem>>, vector<128x128xf32>
    %cst = arith.constant dense<0.000000e+00> : vector<128x128xf32>
    %2 = tpu.matmul %1, %0, %cst {dimension_numbers = #tpu.dot_dimension_numbers<[1], [0], [0], [1], [0, 0, 1, 1], [], []>} : vector<128x128xf32>, vector<128x128xf32>, vector<128x128xf32> -> vector<128x128xf32>
    %c128 = arith.constant 128 : index
    %c0_3 = arith.constant 0 : index
    %3 = vector.load %arg2[%c128, %c0_3] : memref<2448x128xf32, #tpu.memory_space<vmem>>, vector<128x128xf32>
    %4 = arith.addf %2, %3 : vector<128x128xf32>
    %c896 = arith.constant 896 : index
    %c0_4 = arith.constant 0 : index
    %5 = vector.load %arg2[%c896, %c0_4] : memref<2448x128xf32, #tpu.memory_space<vmem>>, vector<128x128xf32>
    %c1024 = arith.constant 1024 : index
    %c0_5 = arith.constant 0 : index
    %6 = vector.load %arg2[%c1024, %c0_5] : memref<2448x128xf32, #tpu.memory_space<vmem>>, vector<128x128xf32>
    %c256 = arith.constant 256 : index
    %c0_6 = arith.constant 0 : index
    %7 = vector.load %arg2[%c256, %c0_6] : memref<2448x128xf32, #tpu.memory_space<vmem>>, vector<128x128xf32>
    %cst_7 = arith.constant dense<0.000000e+00> : vector<128x128xf32>
    %8 = tpu.matmul %7, %4, %cst_7 {dimension_numbers = #tpu.dot_dimension_numbers<[1], [0], [0], [1], [0, 0, 1, 1], [], []>} : vector<128x128xf32>, vector<128x128xf32>, vector<128x128xf32> -> vector<128x128xf32>
    %9 = arith.subf %4, %8 : vector<128x128xf32>
    %c256_8 = arith.constant 256 : index
    %c0_9 = arith.constant 0 : index
    %10 = vector.load %arg2[%c256_8, %c0_9] : memref<2448x128xf32, #tpu.memory_space<vmem>>, vector<128x128xf32>
    %11 = arith.mulf %9, %9 : vector<128x128xf32>
    %cst_10 = arith.constant dense<0.000000e+00> : vector<128x128xf32>
    %12 = tpu.matmul %10, %11, %cst_10 {dimension_numbers = #tpu.dot_dimension_numbers<[1], [0], [0], [1], [0, 0, 1, 1], [], []>} : vector<128x128xf32>, vector<128x128xf32>, vector<128x128xf32> -> vector<128x128xf32>
    %cst_11 = arith.constant 9.99999974E-6 : f32
    %13 = vector.broadcast %cst_11 : f32 to vector<128x128xf32>
    %14 = arith.addf %12, %13 : vector<128x128xf32>
    %15 = math.rsqrt %14 : vector<128x128xf32>
    %16 = arith.mulf %9, %15 : vector<128x128xf32>
    %17 = arith.mulf %16, %5 : vector<128x128xf32>
    %18 = arith.addf %17, %6 : vector<128x128xf32>
    %c512 = arith.constant 512 : index
    %c0_12 = arith.constant 0 : index
    %19 = vector.load %arg2[%c512, %c0_12] : memref<2448x128xf32, #tpu.memory_space<vmem>>, vector<128x128xf32>
    %c384 = arith.constant 384 : index
    %c0_13 = arith.constant 0 : index
    %20 = vector.load %arg2[%c384, %c0_13] : memref<2448x128xf32, #tpu.memory_space<vmem>>, vector<128x128xf32>
    %cst_14 = arith.constant dense<0.000000e+00> : vector<128x128xf32>
    %21 = tpu.matmul %20, %18, %cst_14 {dimension_numbers = #tpu.dot_dimension_numbers<[1], [0], [0], [1], [0, 0, 1, 1], [], []>} : vector<128x128xf32>, vector<128x128xf32>, vector<128x128xf32> -> vector<128x128xf32>
    %c1408 = arith.constant 1408 : index
    %c0_15 = arith.constant 0 : index
    %22 = vector.load %arg2[%c1408, %c0_15] : memref<2448x128xf32, #tpu.memory_space<vmem>>, vector<128x128xf32>
    %23 = arith.addf %21, %22 : vector<128x128xf32>
    %cst_16 = arith.constant 3.000000e+00 : f32
    %24 = vector.broadcast %cst_16 : f32 to vector<128x128xf32>
    %25 = arith.addf %23, %24 : vector<128x128xf32>
    %cst_17 = arith.constant 0.000000e+00 : f32
    %cst_18 = arith.constant 6.000000e+00 : f32
    %26 = vector.broadcast %cst_17 : f32 to vector<128x128xf32>
    %27 = arith.maximumf %26, %25 : vector<128x128xf32>
    %28 = vector.broadcast %cst_18 : f32 to vector<128x128xf32>
    %29 = arith.minimumf %28, %27 : vector<128x128xf32>
    %30 = arith.mulf %23, %29 : vector<128x128xf32>
    %cst_19 = arith.constant 0.166666672 : f32
    %31 = vector.broadcast %cst_19 : f32 to vector<128x128xf32>
    %32 = arith.mulf %30, %31 : vector<128x128xf32>
    %cst_20 = arith.constant dense<0.000000e+00> : vector<128x128xf32>
    %33 = tpu.matmul %19, %32, %cst_20 {dimension_numbers = #tpu.dot_dimension_numbers<[1], [0], [0], [1], [0, 0, 1, 1], [], []>} : vector<128x128xf32>, vector<128x128xf32>, vector<128x128xf32> -> vector<128x128xf32>
    %c1536 = arith.constant 1536 : index
    %c0_21 = arith.constant 0 : index
    %34 = vector.load %arg2[%c1536, %c0_21] : memref<2448x128xf32, #tpu.memory_space<vmem>>, vector<128x128xf32>
    %35 = arith.addf %33, %34 : vector<128x128xf32>
    %36 = arith.addf %18, %35 : vector<128x128xf32>
    %37 = arith.addf %36, %4 : vector<128x128xf32>
    %c1152 = arith.constant 1152 : index
    %c0_22 = arith.constant 0 : index
    %38 = vector.load %arg2[%c1152, %c0_22] : memref<2448x128xf32, #tpu.memory_space<vmem>>, vector<128x128xf32>
    %c1280 = arith.constant 1280 : index
    %c0_23 = arith.constant 0 : index
    %39 = vector.load %arg2[%c1280, %c0_23] : memref<2448x128xf32, #tpu.memory_space<vmem>>, vector<128x128xf32>
    %c256_24 = arith.constant 256 : index
    %c0_25 = arith.constant 0 : index
    %40 = vector.load %arg2[%c256_24, %c0_25] : memref<2448x128xf32, #tpu.memory_space<vmem>>, vector<128x128xf32>
    %cst_26 = arith.constant dense<0.000000e+00> : vector<128x128xf32>
    %41 = tpu.matmul %40, %37, %cst_26 {dimension_numbers = #tpu.dot_dimension_numbers<[1], [0], [0], [1], [0, 0, 1, 1], [], []>} : vector<128x128xf32>, vector<128x128xf32>, vector<128x128xf32> -> vector<128x128xf32>
    %42 = arith.subf %37, %41 : vector<128x128xf32>
    %c256_27 = arith.constant 256 : index
    %c0_28 = arith.constant 0 : index
    %43 = vector.load %arg2[%c256_27, %c0_28] : memref<2448x128xf32, #tpu.memory_space<vmem>>, vector<128x128xf32>
    %44 = arith.mulf %42, %42 : vector<128x128xf32>
    %cst_29 = arith.constant dense<0.000000e+00> : vector<128x128xf32>
    %45 = tpu.matmul %43, %44, %cst_29 {dimension_numbers = #tpu.dot_dimension_numbers<[1], [0], [0], [1], [0, 0, 1, 1], [], []>} : vector<128x128xf32>, vector<128x128xf32>, vector<128x128xf32> -> vector<128x128xf32>
    %cst_30 = arith.constant 9.99999974E-6 : f32
    %46 = vector.broadcast %cst_30 : f32 to vector<128x128xf32>
    %47 = arith.addf %45, %46 : vector<128x128xf32>
    %48 = math.rsqrt %47 : vector<128x128xf32>
    %49 = arith.mulf %42, %48 : vector<128x128xf32>
    %50 = arith.mulf %49, %38 : vector<128x128xf32>
    %51 = arith.addf %50, %39 : vector<128x128xf32>
    %c768 = arith.constant 768 : index
    %c0_31 = arith.constant 0 : index
    %52 = vector.load %arg2[%c768, %c0_31] : memref<2448x128xf32, #tpu.memory_space<vmem>>, vector<128x128xf32>
    %c640 = arith.constant 640 : index
    %c0_32 = arith.constant 0 : index
    %53 = vector.load %arg2[%c640, %c0_32] : memref<2448x128xf32, #tpu.memory_space<vmem>>, vector<128x128xf32>
    %cst_33 = arith.constant dense<0.000000e+00> : vector<128x128xf32>
    %54 = tpu.matmul %53, %51, %cst_33 {dimension_numbers = #tpu.dot_dimension_numbers<[1], [0], [0], [1], [0, 0, 1, 1], [], []>} : vector<128x128xf32>, vector<128x128xf32>, vector<128x128xf32> -> vector<128x128xf32>
    %c1664 = arith.constant 1664 : index
    %c0_34 = arith.constant 0 : index
    %55 = vector.load %arg2[%c1664, %c0_34] : memref<2448x128xf32, #tpu.memory_space<vmem>>, vector<128x128xf32>
    %56 = arith.addf %54, %55 : vector<128x128xf32>
    %cst_35 = arith.constant 3.000000e+00 : f32
    %57 = vector.broadcast %cst_35 : f32 to vector<128x128xf32>
    %58 = arith.addf %56, %57 : vector<128x128xf32>
    %cst_36 = arith.constant 0.000000e+00 : f32
    %cst_37 = arith.constant 6.000000e+00 : f32
    %59 = vector.broadcast %cst_36 : f32 to vector<128x128xf32>
    %60 = arith.maximumf %59, %58 : vector<128x128xf32>
    %61 = vector.broadcast %cst_37 : f32 to vector<128x128xf32>
    %62 = arith.minimumf %61, %60 : vector<128x128xf32>
    %63 = arith.mulf %56, %62 : vector<128x128xf32>
    %cst_38 = arith.constant 0.166666672 : f32
    %64 = vector.broadcast %cst_38 : f32 to vector<128x128xf32>
    %65 = arith.mulf %63, %64 : vector<128x128xf32>
    %cst_39 = arith.constant dense<0.000000e+00> : vector<128x128xf32>
    %66 = tpu.matmul %52, %65, %cst_39 {dimension_numbers = #tpu.dot_dimension_numbers<[1], [0], [0], [1], [0, 0, 1, 1], [], []>} : vector<128x128xf32>, vector<128x128xf32>, vector<128x128xf32> -> vector<128x128xf32>
    %c1792 = arith.constant 1792 : index
    %c0_40 = arith.constant 0 : index
    %67 = vector.load %arg2[%c1792, %c0_40] : memref<2448x128xf32, #tpu.memory_space<vmem>>, vector<128x128xf32>
    %68 = arith.addf %66, %67 : vector<128x128xf32>
    %cst_41 = arith.constant 2.000000e+00 : f32
    %69 = vector.broadcast %cst_41 : f32 to vector<128x128xf32>
    %70 = arith.mulf %69, %51 : vector<128x128xf32>
    %71 = arith.addf %70, %68 : vector<128x128xf32>
    %c1920 = arith.constant 1920 : index
    %c0_42 = arith.constant 0 : index
    %72 = vector.load %arg2[%c1920, %c0_42] : memref<2448x128xf32, #tpu.memory_space<vmem>>, vector<40x128xf32>
    %cst_43 = arith.constant dense<0.000000e+00> : vector<40x128xf32>
    %73 = tpu.matmul %72, %0, %cst_43 {dimension_numbers = #tpu.dot_dimension_numbers<[1], [0], [0], [1], [0, 0, 1, 1], [], []>} : vector<40x128xf32>, vector<128x128xf32>, vector<40x128xf32> -> vector<40x128xf32>
    %c1960 = arith.constant 1960 : index
    %c0_44 = arith.constant 0 : index
    %74 = vector.load %arg2[%c1960, %c0_44] : memref<2448x128xf32, #tpu.memory_space<vmem>>, vector<40x128xf32>
    %cst_45 = arith.constant dense<0.000000e+00> : vector<40x128xf32>
    %75 = tpu.matmul %74, %71, %cst_45 {dimension_numbers = #tpu.dot_dimension_numbers<[1], [0], [0], [1], [0, 0, 1, 1], [], []>} : vector<40x128xf32>, vector<128x128xf32>, vector<40x128xf32> -> vector<40x128xf32>
    %76 = arith.addf %73, %75 : vector<40x128xf32>
    %c2000 = arith.constant 2000 : index
    %c0_46 = arith.constant 0 : index
    %77 = vector.load %arg2[%c2000, %c0_46] : memref<2448x128xf32, #tpu.memory_space<vmem>>, vector<1x128xf32>
    %78 = vector.broadcast %77 : vector<1x128xf32> to vector<40x128xf32>
    %79 = arith.addf %76, %78 : vector<40x128xf32>
    %c2008 = arith.constant 2008 : index
    %c0_47 = arith.constant 0 : index
    %80 = vector.load %arg2[%c2008, %c0_47] : memref<2448x128xf32, #tpu.memory_space<vmem>>, vector<128x128xf32>
    %cst_48 = arith.constant dense<0.000000e+00> : vector<40x128xf32>
    %81 = tpu.matmul %79, %80, %cst_48 {dimension_numbers = #tpu.dot_dimension_numbers<[1], [0], [0], [1], [0, 0, 1, 1], [], []>} : vector<40x128xf32>, vector<128x128xf32>, vector<40x128xf32> -> vector<40x128xf32>
    %82 = arith.subf %79, %81 : vector<40x128xf32>
    %83 = arith.mulf %82, %82 : vector<40x128xf32>
    %c2008_49 = arith.constant 2008 : index
    %c0_50 = arith.constant 0 : index
    %84 = vector.load %arg2[%c2008_49, %c0_50] : memref<2448x128xf32, #tpu.memory_space<vmem>>, vector<128x128xf32>
    %cst_51 = arith.constant dense<0.000000e+00> : vector<40x128xf32>
    %85 = tpu.matmul %83, %84, %cst_51 {dimension_numbers = #tpu.dot_dimension_numbers<[1], [0], [0], [1], [0, 0, 1, 1], [], []>} : vector<40x128xf32>, vector<128x128xf32>, vector<40x128xf32> -> vector<40x128xf32>
    %cst_52 = arith.constant 9.99999974E-6 : f32
    %86 = vector.broadcast %cst_52 : f32 to vector<40x128xf32>
    %87 = arith.addf %85, %86 : vector<40x128xf32>
    %88 = math.rsqrt %87 : vector<40x128xf32>
    %89 = arith.mulf %82, %88 : vector<40x128xf32>
    %c2136 = arith.constant 2136 : index
    %c0_53 = arith.constant 0 : index
    %90 = vector.load %arg2[%c2136, %c0_53] : memref<2448x128xf32, #tpu.memory_space<vmem>>, vector<1x128xf32>
    %91 = vector.broadcast %90 : vector<1x128xf32> to vector<40x128xf32>
    %92 = arith.mulf %89, %91 : vector<40x128xf32>
    %c2144 = arith.constant 2144 : index
    %c0_54 = arith.constant 0 : index
    %93 = vector.load %arg2[%c2144, %c0_54] : memref<2448x128xf32, #tpu.memory_space<vmem>>, vector<1x128xf32>
    %94 = vector.broadcast %93 : vector<1x128xf32> to vector<40x128xf32>
    %95 = arith.addf %92, %94 : vector<40x128xf32>
    %c2152 = arith.constant 2152 : index
    %c0_55 = arith.constant 0 : index
    %96 = vector.load %arg2[%c2152, %c0_55] : memref<2448x128xf32, #tpu.memory_space<vmem>>, vector<128x128xf32>
    %cst_56 = arith.constant dense<0.000000e+00> : vector<40x128xf32>
    %97 = tpu.matmul %95, %96, %cst_56 {dimension_numbers = #tpu.dot_dimension_numbers<[1], [0], [0], [1], [0, 0, 1, 1], [], []>} : vector<40x128xf32>, vector<128x128xf32>, vector<40x128xf32> -> vector<40x128xf32>
    %c2280 = arith.constant 2280 : index
    %c0_57 = arith.constant 0 : index
    %98 = vector.load %arg2[%c2280, %c0_57] : memref<2448x128xf32, #tpu.memory_space<vmem>>, vector<1x128xf32>
    %99 = vector.broadcast %98 : vector<1x128xf32> to vector<40x128xf32>
    %100 = arith.addf %97, %99 : vector<40x128xf32>
    %cst_58 = arith.constant 3.000000e+00 : f32
    %101 = vector.broadcast %cst_58 : f32 to vector<40x128xf32>
    %102 = arith.addf %100, %101 : vector<40x128xf32>
    %cst_59 = arith.constant 0.000000e+00 : f32
    %cst_60 = arith.constant 6.000000e+00 : f32
    %103 = vector.broadcast %cst_59 : f32 to vector<40x128xf32>
    %104 = arith.maximumf %103, %102 : vector<40x128xf32>
    %105 = vector.broadcast %cst_60 : f32 to vector<40x128xf32>
    %106 = arith.minimumf %105, %104 : vector<40x128xf32>
    %107 = arith.mulf %100, %106 : vector<40x128xf32>
    %cst_61 = arith.constant 0.166666672 : f32
    %108 = vector.broadcast %cst_61 : f32 to vector<40x128xf32>
    %109 = arith.mulf %107, %108 : vector<40x128xf32>
    %c2288 = arith.constant 2288 : index
    %c0_62 = arith.constant 0 : index
    %110 = vector.load %arg2[%c2288, %c0_62] : memref<2448x128xf32, #tpu.memory_space<vmem>>, vector<128x128xf32>
    %cst_63 = arith.constant dense<0.000000e+00> : vector<40x128xf32>
    %111 = tpu.matmul %109, %110, %cst_63 {dimension_numbers = #tpu.dot_dimension_numbers<[1], [0], [0], [1], [0, 0, 1, 1], [], []>} : vector<40x128xf32>, vector<128x128xf32>, vector<40x128xf32> -> vector<40x128xf32>
    %c2416 = arith.constant 2416 : index
    %c0_64 = arith.constant 0 : index
    %112 = vector.load %arg2[%c2416, %c0_64] : memref<2448x128xf32, #tpu.memory_space<vmem>>, vector<1x128xf32>
    %113 = vector.broadcast %112 : vector<1x128xf32> to vector<40x128xf32>
    %114 = arith.addf %111, %113 : vector<40x128xf32>
    %c2424 = arith.constant 2424 : index
    %c0_65 = arith.constant 0 : index
    %115 = vector.load %arg2[%c2424, %c0_65] : memref<2448x128xf32, #tpu.memory_space<vmem>>, vector<1x40xf32>
    %cst_66 = arith.constant dense<0.000000e+00> : vector<1x128xf32>
    %116 = tpu.matmul %115, %79, %cst_66 {dimension_numbers = #tpu.dot_dimension_numbers<[1], [0], [0], [1], [0, 0, 1, 1], [], []>} : vector<1x40xf32>, vector<40x128xf32>, vector<1x128xf32> -> vector<1x128xf32>
    %c2432 = arith.constant 2432 : index
    %c0_67 = arith.constant 0 : index
    %117 = vector.load %arg2[%c2432, %c0_67] : memref<2448x128xf32, #tpu.memory_space<vmem>>, vector<1x40xf32>
    %cst_68 = arith.constant dense<0.000000e+00> : vector<1x128xf32>
    %118 = tpu.matmul %117, %114, %cst_68 {dimension_numbers = #tpu.dot_dimension_numbers<[1], [0], [0], [1], [0, 0, 1, 1], [], []>} : vector<1x40xf32>, vector<40x128xf32>, vector<1x128xf32> -> vector<1x128xf32>
    %119 = arith.addf %116, %118 : vector<1x128xf32>
    %c2440 = arith.constant 2440 : index
    %c0_69 = arith.constant 0 : index
    %120 = vector.load %arg2[%c2440, %c0_69] : memref<2448x128xf32, #tpu.memory_space<vmem>>, vector<1x128xf32>
    %121 = arith.addf %119, %120 : vector<1x128xf32>
    %c0_70 = arith.constant 0 : index
    %c0_71 = arith.constant 0 : index
    %122 = vector.load %arg3[%c0_70, %c0_71] : memref<1x128xf32, #tpu.memory_space<vmem>>, vector<1x128xf32>
    tpu.vector_store %arg3[%c0_70, %c0_71], %121 {strides = array<i32>} : memref<1x128xf32, #tpu.memory_space<vmem>>, vector<1x128xf32>,
    return
  }
  func.func @transform_0(%arg0: i32) -> (i32, i32) {
    %c0_i32 = arith.constant 0 : i32
    %c0_i32_0 = arith.constant 0 : i32
    return %c0_i32, %arg0 : i32, i32
  }
  func.func @transform_1(%arg0: i32) -> (i32, i32) {
    %c0_i32 = arith.constant 0 : i32
    %c0_i32_0 = arith.constant 0 : i32
    %c0_i32_1 = arith.constant 0 : i32
    return %c0_i32, %c0_i32_0 : i32, i32
  }
  func.func @transform_2(%arg0: i32) -> (i32, i32) {
    %c0_i32 = arith.constant 0 : i32
    %c0_i32_0 = arith.constant 0 : i32
    return %c0_i32, %arg0 : i32, i32
  }
}

</mosaic_0001>

<bundles_post_ra>
// kernel: forward.1
= control target key start
LH: loop header
LB: loop body
LE: loop exit
PB: predicated region body
PF: predicated region fallthrough
CT: control target
= control target key end

     0   :  { %7 = vsyncpa [#allocation4], 0  ;;  %s5034_s9 = smov 0   ;;  %s5036_s10 = smov 0   ;;  %s5958_s0 = inlined_call_operand.vmem [shape: f32[128,256], index: 0, kind: input, shape index: {}]   ;;  %s5959_s1 = inlined_call_operand.hbm [shape: f32[2448,128], index: 1, kind: input, shape index: {}]   ;;  %s5960_s2 = inlined_call_operand.vmem [shape: f32[1,256], index: 2, kind: output, shape index: {}]  }
   0x1   :  { %s5038_s11 = smov 0  }
   0x2 LB: > { %s5050_s12 = sadd.s32 4294967295, %s5011_s11   ;;  %s5053_s13 = sadd.s32 1, %s5011_s11   ;;  %s5011_s11 = sphi %s5038_s11, %s5996_s11   ;;  %s5007_s10 = sphi %s5036_s10, %s5995_s10   ;;  %s5003_s9 = sphi %s5034_s9, %s5994_s9  }
   0x3   : > { %s17_s14 = ssub.s32 %s5011_s11, %s5053_s13  ;;  %s20_s15 = sadd.s32 1, %s5007_s10 }
   0x4   : > { %p18_p0 = scmp.eq.s32.totalorder %s17_s14, 0  ;;  %p27_p1 = scmp.ne.s32.totalorder %s5007_s10, %s5003_s9 }
   0x5   : > { %p28_p2 = scmp.eq.s32.totalorder %s5011_s11, 0  ;;  %p3128_p3 = scmp.ge.s32.totalorder %s5011_s11, 1 }
   0x6   : > { %s5063_s16 = scalar_select %p18_p0, %s5007_s10, %s20_s15  }
   0x7   : > { %p5065_p4 = por %p28_p2, %p27_p1  ;;  %p91_p5 = scmp.lt.s32.totalorder %s5011_s11, 3 }
   0x8   : > { %p5961_p6 = scmp.eq.s32.totalorder %s5050_s12, 0  ;;  %s5013_s19 = smov [#allocation3]  }
   0x9   : > { %s5971_s17 = scalar_select %p5065_p4, 1, 0 }
   0xa   : > { %p5071_p7 = pnand %p3128_p3, %p91_p5  ;;  %s103_s20 = sshll.u32 %s5013_s19, 4  ;;  %s104_s20 = int_to_ptr.vmem [resolvable:$true] %s103_s20 }
   0xb   : > { %s4957_s24 = scalar_lea.hbm %s5959_s1, 39168 }
   0xc   : > { %s5972_s18 = scalar_select %p5071_p7, 1, 0 }
   0xd   : > { %p4831_p8 = pneg %p5071_p7  ;;  %p4958_p10 = scmp.ne.s32.totalorder %s5959_s1, %s4957_s24 }
   0xe   : > { %p4964_p0 = scmp.lt.u32.totalorder %s4957_s24, %s5959_s1 }
   0xf   : > { %p5079_p9 = pnand %p5961_p6, %p4831_p8 }
  0x11   : > { %p4959_p11 = pneg %p5079_p9 }
  0x13   : > { %p4960_p12 = pnand %p4959_p11, %p4958_p10 }
  0x15   : > { %p4961_p13 = pneg %p4960_p12 }
  0x17   : > { %p4966_p1 = pnand %p4964_p0, %p4961_p13 }
  0x19   : > { %4969 = shalt.err (!%p4966_p1)
}
  0x1a   : > { %s4970_s29 = scalar_lea.vmem %s104_s20, 39168  ;;  %p4978_p8 = scmp.lt.s32.totalorder %s104_s20, %s104_s20 }
  0x1b   : > { %p4971_p2 = scmp.ne.s32.totalorder %s104_s20, %s4970_s29  ;;  %p4979_p6 = scmp.lt.s32.totalorder %s4970_s29, %s4970_s29 }
  0x1d   : > { %p4973_p3 = pnand %p4971_p2, %p4959_p11  ;;  %p4980_p7 = por %p4979_p6, %p4978_p8 }
  0x1f   : > { %p4974_p5 = pneg %p4973_p3 }
  0x21   : > { %p4981_p4 = pnand %p4980_p7, %p4974_p5 }
  0x23   : > { %4984 = shalt.err (!%p4981_p4)
}
  0x24   : > { %s5014_s30 = smov 128   ;;  %s5015_s3 = smov 8  }
  0x25   : > { %4834 = dma.hbm_to_vmem [thread:$0]  (!%p5079_p9), %s5959_s1, 39168, %s104_s20, [#allocation4], %s5014_s30, %s5014_s30, %s5015_s3  }
  0x26   : > { %p3130_p10 = scmp.ge.s32.totalorder %s5011_s11, 2 }
  0x27   : > { %p5974_p12 = scmp.ne.s32.totalorder (!%p3130_p10), %s5971_s17, 0 }
  0x28   : > { %113 = sbr.rel (%p3130_p10) target bundleno = 59 (0x3b), region = 20 }
  0x2f   : > { %116 = sbr.rel (!%p5974_p12) target bundleno = 59 (0x3b), region = 24  ;;  %s118_s6 = sand.u32 (%p5974_p12), 1, %s5007_s10  }
  0x30   : > { %s3132_s7 = sshll.u32 (%p5974_p12), %s5011_s11, 3  ;;  %s3131_s8 = sshll.u32 (%p5974_p12), %s118_s6, 7 }
  0x31   : > { %s5107_s19 = scalar_lea.vmem (%p5974_p12), %s5958_s0, %s3132_s7  ;;  %s120_s17 = scalar_lea.vmem (%p5974_p12), [#allocation2], %s3131_s8 }
  0x32   : > { %v180_v0 = vld [vmem:[%s5107_s19] sm:$0xff] (%p5974_p12)  ;;  %v182_v1 = vld [vmem:[%s5107_s19 + $0x10] sm:$0xff] (%p5974_p12) }
  0x33   : > { %v184_v2 = vld [vmem:[%s5107_s19 + $0x20] sm:$0xff] (%p5974_p12)  ;;  %181 = vst [vmem:[%s120_s17] sm:$0xff] (%p5974_p12), %v180_v0  ;;  %183 = vst [vmem:[%s120_s17 + $0x8] sm:$0xff] (%p5974_p12), %v182_v1  ;;  %v186_v3 = vld [vmem:[%s5107_s19 + $0x30] sm:$0xff] (%p5974_p12) }
  0x34   : > { %185 = vst [vmem:[%s120_s17 + $0x10] sm:$0xff] (%p5974_p12), %v184_v2  ;;  %v188_v4 = vld [vmem:[%s5107_s19 + $0x40] sm:$0xff] (%p5974_p12)  ;;  %v190_v5 = vld [vmem:[%s5107_s19 + $0x50] sm:$0xff] (%p5974_p12)  ;;  %187 = vst [vmem:[%s120_s17 + $0x18] sm:$0xff] (%p5974_p12), %v186_v3 }
  0x35   : > { %189 = vst [vmem:[%s120_s17 + $0x20] sm:$0xff] (%p5974_p12), %v188_v4  ;;  %191 = vst [vmem:[%s120_s17 + $0x28] sm:$0xff] (%p5974_p12), %v190_v5  ;;  %v192_v6 = vld [vmem:[%s5107_s19 + $0x60] sm:$0xff] (%p5974_p12)  ;;  %v194_v7 = vld [vmem:[%s5107_s19 + $0x70] sm:$0xff] (%p5974_p12) }
  0x36   : > { %v196_v8 = vld [vmem:[%s5107_s19 + $0x80] sm:$0xff]  ;;  %193 = vst [vmem:[%s120_s17 + $0x30] sm:$0xff] %v192_v6  ;;  %195 = vst [vmem:[%s120_s17 + $0x38] sm:$0xff] %v194_v7  ;;  %v198_v9 = vld [vmem:[%s5107_s19 + $0x90] sm:$0xff] }
  0x37   : > { %197 = vst [vmem:[%s120_s17 + $0x40] sm:$0xff] %v196_v8  ;;  %v200_v10 = vld [vmem:[%s5107_s19 + $0xa0] sm:$0xff]  ;;  %v202_v11 = vld [vmem:[%s5107_s19 + $0xb0] sm:$0xff]  ;;  %199 = vst [vmem:[%s120_s17 + $0x48] sm:$0xff] %v198_v9 }
  0x38   : > { %201 = vst [vmem:[%s120_s17 + $0x50] sm:$0xff] %v200_v10  ;;  %203 = vst [vmem:[%s120_s17 + $0x58] sm:$0xff] %v202_v11  ;;  %v204_v12 = vld [vmem:[%s5107_s19 + $0xc0] sm:$0xff]  ;;  %v206_v13 = vld [vmem:[%s5107_s19 + $0xd0] sm:$0xff] }
  0x39   : > { %v208_v14 = vld [vmem:[%s5107_s19 + $0xe0] sm:$0xff]  ;;  %205 = vst [vmem:[%s120_s17 + $0x60] sm:$0xff] %v204_v12  ;;  %207 = vst [vmem:[%s120_s17 + $0x68] sm:$0xff] %v206_v13  ;;  %v210_v15 = vld [vmem:[%s5107_s19 + $0xf0] sm:$0xff] }
  0x3a   : > { %209 = vst [vmem:[%s120_s17 + $0x70] sm:$0xff] %v208_v14  ;;  %211 = vst [vmem:[%s120_s17 + $0x78] sm:$0xff] %v210_v15 }
  0x3b PF: > { %p5975_p4 = scmp.ne.s32.totalorder %s5972_s18, 0 }
  0x3d   : > { %220 = sbr.rel (%p5975_p4) target bundleno = 3758 (0xeae), region = 62 }
  0x44   : > { %s223_s11 = sand.u32 1, %s5003_s9   ;;  %p5976_p6 = scmp.eq.s32.totalorder %s5050_s12, 0 }
  0x45   : > { %s3134_s20 = sshll.u32 %s223_s11, 7 }
  0x46   : > { %s5128_s21 = scalar_lea.vmem [#allocation2], %s3134_s20 }
  0x47   : > { %4998 = dma.done.wait (%p5976_p6), [#allocation4], 39168   ;;  %p5977_p7 = pmov %p5976_p6 }
  0x48   : > { %v249_v16 = vld [vmem:[%s5128_s21] sm:$0xff]  ;;  %v250_v17 = vld [vmem:[%s5128_s21 + $0x8] sm:$0xff]  ;;  %v251_v18 = vld [vmem:[%s5128_s21 + $0x10] sm:$0xff]  ;;  %vm5017_vm0 = vmmov 0   ;;  %vm2911_vm1 = vcmask 326656   ;;  %p246_p9 = scmp.lt.s32.totalorder %s5050_s12, 1 }
  0x49   : > { %5000 = vsyncadd (%p5977_p7), [#allocation4], 4294928128  ;;  %v5137_v19 = vpack.c.bf16 %v250_v17, %v249_v16  ;;  %v252_v20 = vld [vmem:[%s5128_s21 + $0x18] sm:$0xff]  ;;  %v253_v22 = vld [vmem:[%s5128_s21 + $0x20] sm:$0xff] }
  0x4a   : > { %v5140_v21 = vpack.c.bf16 %v252_v20, %v251_v18  ;;  %v254_v23 = vld [vmem:[%s5128_s21 + $0x28] sm:$0xff]  ;;  %v265_v25 = vld [vmem:[#allocation3] sm:$0xff]  ;;  %v255_v26 = vld [vmem:[%s5128_s21 + $0x30] sm:$0xff]  ;;  %s5998_s12 = smov (!%p246_p9, %s5050_s12), 1 }
  0x4b   : > { %5978 = vst [vmem:[#allocation6_spill] sm:$0xff] %v5137_v19  ;;  %4384 = vmatprep.subr.bf16.mxu0 %v5137_v19  ;;  %v5147_v24 = vpack.c.bf16 %v254_v23, %v253_v22  ;;  %v256_v27 = vld [vmem:[%s5128_s21 + $0x38] sm:$0xff]  ;;  %3603 = vmatprep.mubr.f32.mxu0 %v265_v25  ;;  %v257_v29 = vld [vmem:[%s5128_s21 + $0x40] sm:$0xff]  ;;  %v258_v30 = vld [vmem:[%s5128_s21 + $0x48] sm:$0xff]  ;;  %s248_s22 = scalar_lea.vmem %s5960_s2, %s5998_s12 }
  0x4c   : > { %5979 = vst [vmem:[#allocation7_spill] sm:$0xff] %v5140_v21  ;;  %4386 = vmatpush3.bf16.msra.mxu0 %v5137_v19  ;;  %v5153_v28 = vpack.c.bf16 %v256_v27, %v255_v26  ;;  %v5159_v31 = vpack.c.bf16 %v258_v30, %v257_v29  ;;  %v259_v32 = vld [vmem:[%s5128_s21 + $0x50] sm:$0xff]  ;;  %v260_v33 = vld [vmem:[%s5128_s21 + $0x58] sm:$0xff]  ;;  %v261_v35 = vld [vmem:[%s5128_s21 + $0x60] sm:$0xff] }
  0x4d   : > { %4388 = vmatprep.subr.bf16.mxu0 %v5140_v21  ;;  %5980 = vst [vmem:[#allocation8_spill] sm:$0xff] %v5147_v24  ;;  %v5165_v34 = vpack.c.bf16 %v260_v33, %v259_v32  ;;  %v262_v36 = vld [vmem:[%s5128_s21 + $0x68] sm:$0xff]  ;;  %v263_v38 = vld [vmem:[%s5128_s21 + $0x70] sm:$0xff]  ;;  %v264_v39 = vld [vmem:[%s5128_s21 + $0x78] sm:$0xff] }
  0x4e   : > { %5981 = vst [vmem:[#allocation9_spill] sm:$0xff] %v5153_v28  ;;  %5982 = vst [vmem:[#allocation10_spill] sm:$0xff] %v5159_v31  ;;  %v5171_v37 = vpack.c.bf16 %v262_v36, %v261_v35  ;;  %v5177_v40 = vpack.c.bf16 %v264_v39, %v263_v38  ;;  %v266_v41 = vld [vmem:[#allocation3 + $0x8] sm:$0xff]  ;;  %v267_v42 = vld [vmem:[#allocation3 + $0x10] sm:$0xff] }
  0x4f   : > { %5983 = vst [vmem:[#allocation11_spill] sm:$0xff] %v5165_v34  ;;  %v268_v43 = vld [vmem:[#allocation3 + $0x18] sm:$0xff]  ;;  %v269_v44 = vld [vmem:[#allocation3 + $0x20] sm:$0xff]  ;;  %v270_v45 = vld [vmem:[#allocation3 + $0x28] sm:$0xff] }
  0x50   : > { %4390 = vmatpush3.bf16.msra.mxu0 %v5140_v21  ;;  %5984 = vst [vmem:[#allocation12_spill] sm:$0xff] %v5171_v37  ;;  %5985 = vst [vmem:[#allocation13_spill] sm:$0xff] %v5177_v40  ;;  %v271_v46 = vld [vmem:[#allocation3 + $0x30] sm:$0xff]  ;;  %v272_v47 = vld [vmem:[#allocation3 + $0x38] sm:$0xff] }
  0x51   : > { %4392 = vmatprep.subr.bf16.mxu0 %v5147_v24  ;;  %v273_v48 = vld [vmem:[#allocation3 + $0x40] sm:$0xff]  ;;  %v274_v49 = vld [vmem:[#allocation3 + $0x48] sm:$0xff]  ;;  %v275_v50 = vld [vmem:[#allocation3 + $0x50] sm:$0xff] }
  0x52   : > { %v276_v51 = vld [vmem:[#allocation3 + $0x58] sm:$0xff]  ;;  %v277_v52 = vld [vmem:[#allocation3 + $0x60] sm:$0xff]  ;;  %v278_v53 = vld [vmem:[#allocation3 + $0x68] sm:$0xff] }
  0x53   : > { %v279_v54 = vld [vmem:[#allocation3 + $0x70] sm:$0xff]  ;;  %v280_v55 = vld [vmem:[#allocation3 + $0x78] sm:$0xff]  ;;  %v5182_v56 = vld [vmem:[#allocation3 + $0x100] sm:$0xff] }
  0x54   : > { %4394 = vmatpush3.bf16.msra.mxu0 %v5147_v24  ;;  %3659 = vmatprep.mubr.f32.mxu1 %v5182_v56  ;;  %v282_v57 = vld [vmem:[#allocation3 + $0x88] sm:$0xff]  ;;  %v281_v58 = vld [vmem:[#allocation3 + $0x80] sm:$0xff]  ;;  %v284_v63 = vld [vmem:[#allocation3 + $0x98] sm:$0xff] }
  0x55   : > { %4396 = vmatprep.subr.bf16.mxu0 %v5153_v28  ;;  %v283_v0 = vld [vmem:[#allocation3 + $0x90] sm:$0xff]  ;;  %v286_v6 = vld [vmem:[#allocation3 + $0xa8] sm:$0xff]  ;;  %v285_v7 = vld [vmem:[#allocation3 + $0xa0] sm:$0xff] }
  0x56   : > { %v288_v13 = vld [vmem:[#allocation3 + $0xb8] sm:$0xff]  ;;  %v287_v14 = vld [vmem:[#allocation3 + $0xb0] sm:$0xff]  ;;  %v290_v22 = vld [vmem:[#allocation3 + $0xc8] sm:$0xff] }
  0x57   : > { %v289_v23 = vld [vmem:[#allocation3 + $0xc0] sm:$0xff]  ;;  %v292_v32 = vld [vmem:[#allocation3 + $0xd8] sm:$0xff]  ;;  %v291_v33 = vld [vmem:[#allocation3 + $0xd0] sm:$0xff] }
  0x58   : > { %4398 = vmatpush3.bf16.msra.mxu0 %v5153_v28 }
  0x59   : > { %4400 = vmatprep.subr.bf16.mxu0 %v5159_v31 }
  0x5c   : > { %4402 = vmatpush3.bf16.msra.mxu0 %v5159_v31 }
  0x5d   : > { %4404 = vmatprep.subr.bf16.mxu0 %v5165_v34 }
  0x60   : > { %4406 = vmatpush3.bf16.msra.mxu0 %v5165_v34  ;;  %v915_v34 = vld [vmem:[#allocation3 + $0x5b8] sm:$0xff] }
  0x61   : > { %4408 = vmatprep.subr.bf16.mxu0 %v5171_v37 }
  0x64   : > { %4410 = vmatpush3.bf16.msra.mxu0 %v5171_v37 }
  0x65   : > { %4412 = vmatprep.subr.bf16.mxu0 %v5177_v40 }
  0x68   : > { %4414 = vmatpush3.bf16.msra.mxu0 %v5177_v40 }
  0x6b   : > { %3604 = vmatmul.mubr.f32.vlgmr.msra.gmra.mrb[0].mxu0 %v266_v41 }
  0x6c   : > { %3606 = vmatprep.mubr.f32.mxu0 %v267_v42  ;;  %v294_v42 = vld [vmem:[#allocation3 + $0xe8] sm:$0xff] }
  0x6f   : > { %3607 = vmatmul.mubr.f32.gmra.mrb[2].mxu0 %v268_v43  ;;  %v293_v43 = vld [vmem:[#allocation3 + $0xe0] sm:$0xff] }
  0x70   : > { %3609 = vmatprep.mubr.f32.mxu0 %v269_v44 }
  0x73   : > { %3610 = vmatmul.mubr.f32.gmra.mrb[4].mxu0 %v270_v45 }
  0x74   : > { %3612 = vmatprep.mubr.f32.mxu0 %v271_v46 }
  0x77   : > { %3613 = vmatmul.mubr.f32.gmra.mrb[6].mxu0 %v272_v47 }
  0x78   : > { %3615 = vmatprep.mubr.f32.mxu0 %v273_v48 }
  0x7b   : > { %3616 = vmatmul.mubr.f32.gmra.mrb[8].mxu0 %v274_v49  ;;  %v296_v49 = vld [vmem:[#allocation3 + $0xf8] sm:$0xff] }
  0x7c   : > { %3618 = vmatprep.mubr.f32.mxu0 %v275_v50  ;;  %v295_v50 = vld [vmem:[#allocation3 + $0xf0] sm:$0xff] }
  0x7f   : > { %3619 = vmatmul.mubr.f32.gmra.mrb[10].mxu0 %v276_v51 }
  0x80   : > { %3621 = vmatprep.mubr.f32.mxu0 %v277_v52 }
  0x83   : > { %3622 = vmatmul.mubr.f32.gmra.mrb[12].mxu0 %v278_v53 }
  0x84   : > { %3624 = vmatprep.mubr.f32.mxu0 %v279_v54 }
  0x87   : > { %3625 = vmatmul.mubr.f32.gmra.mrb[14].mxu0 %v280_v55 }
  0x88   : > { %3715 = vmatprep.mubr.f32.mxu0 %v5182_v56 }
 0x13e   : > { %v3605_v59 = vpop.f32.mrb[0].mxu0 }
 0x13f   : > { %v5186_v60 = vadd.f32 %v3605_v59, %v282_v57  ;;  %v363_v61 = vpop.f32.mrb[1].mxu0  ;;  %v5236_v59 = vld [vmem:[#allocation3 + $0x110] sm:$0xff] }
 0x140   : > { %v5188_v62 = vadd.f32 %v363_v61, %v281_v58  ;;  %v5234_v58 = vld [vmem:[#allocation3 + $0x108] sm:$0xff]  ;;  %v5240_v61 = vld [vmem:[#allocation3 + $0x118] sm:$0xff] }
 0x142   : > { %v3608_v1 = vpop.f32.mrb[2].mxu0  ;;  %v4415_v2 = vpack.c.bf16 %v5186_v60, %v5188_v62 }
 0x143   : > { %v5192_v3 = vadd.f32 %v3608_v1, %v284_v63  ;;  %v373_v4 = vpop.f32.mrb[3].mxu0  ;;  %v5242_v63 = vld [vmem:[#allocation3 + $0x120] sm:$0xff]  ;;  %v5248_v1 = vld [vmem:[#allocation3 + $0x130] sm:$0xff] }
 0x144   : > { %v5194_v5 = vadd.f32 %v373_v4, %v283_v0  ;;  %4416 = vmatprep.subr.bf16.mxu1 %v4415_v2  ;;  %v5246_v0 = vld [vmem:[#allocation3 + $0x128] sm:$0xff]  ;;  %v5254_v4 = vld [vmem:[#allocation3 + $0x140] sm:$0xff] }
 0x145   : > { %4418 = vmatpush3.bf16.msra.mxu1 %v4415_v2  ;;  %v5252_v2 = vld [vmem:[#allocation3 + $0x138] sm:$0xff] }
 0x146   : > { %v3611_v8 = vpop.f32.mrb[4].mxu0  ;;  %v4419_v9 = vpack.c.bf16 %v5192_v3, %v5194_v5 }
 0x147   : > { %v5198_v10 = vadd.f32 %v3611_v8, %v286_v6  ;;  %v383_v11 = vpop.f32.mrb[5].mxu0  ;;  %v5258_v6 = vld [vmem:[#allocation3 + $0x148] sm:$0xff]  ;;  %v5264_v8 = vld [vmem:[#allocation3 + $0x158] sm:$0xff] }
 0x148   : > { %v5200_v12 = vadd.f32 %v383_v11, %v285_v7  ;;  %4420 = vmatprep.subr.bf16.mxu1 %v4419_v9  ;;  %v5260_v7 = vld [vmem:[#allocation3 + $0x150] sm:$0xff]  ;;  %v5270_v11 = vld [vmem:[#allocation3 + $0x168] sm:$0xff] }
 0x149   : > { %4422 = vmatpush3.bf16.msra.mxu1 %v4419_v9  ;;  %v5266_v9 = vld [vmem:[#allocation3 + $0x160] sm:$0xff] }
 0x14a   : > { %v3614_v15 = vpop.f32.mrb[6].mxu0  ;;  %v4423_v16 = vpack.c.bf16 %v5198_v10, %v5200_v12 }
 0x14b   : > { %v5204_v17 = vadd.f32 %v3614_v15, %v288_v13  ;;  %v393_v18 = vpop.f32.mrb[7].mxu0  ;;  %v5272_v13 = vld [vmem:[#allocation3 + $0x170] sm:$0xff] }
 0x14c   : > { %v5206_v20 = vadd.f32 %v393_v18, %v287_v14  ;;  %4424 = vmatprep.subr.bf16.mxu1 %v4423_v16  ;;  %v5276_v14 = vld [vmem:[#allocation3 + $0x178] sm:$0xff] }
 0x14d   : > { %4426 = vmatpush3.bf16.msra.mxu1 %v4423_v16 }
 0x14e   : > { %v3617_v25 = vpop.f32.mrb[8].mxu0  ;;  %v4427_v26 = vpack.c.bf16 %v5204_v17, %v5206_v20 }
 0x14f   : > { %v5210_v27 = vadd.f32 %v3617_v25, %v290_v22  ;;  %v403_v29 = vpop.f32.mrb[9].mxu0 }
 0x150   : > { %v5212_v30 = vadd.f32 %v403_v29, %v289_v23  ;;  %4428 = vmatprep.subr.bf16.mxu1 %v4427_v26 }
 0x151   : > { %4430 = vmatpush3.bf16.msra.mxu1 %v4427_v26 }
 0x152   : > { %v3620_v35 = vpop.f32.mrb[10].mxu0  ;;  %v4431_v36 = vpack.c.bf16 %v5210_v27, %v5212_v30 }
 0x153   : > { %v5216_v38 = vadd.f32 %v3620_v35, %v292_v32  ;;  %v413_v39 = vpop.f32.mrb[11].mxu0 }
 0x154   : > { %v5218_v41 = vadd.f32 %v413_v39, %v291_v33  ;;  %4432 = vmatprep.subr.bf16.mxu1 %v4431_v36 }
 0x155   : > { %4434 = vmatpush3.bf16.msra.mxu1 %v4431_v36 }
 0x156   : > { %v3623_v44 = vpop.f32.mrb[12].mxu0  ;;  %v4435_v45 = vpack.c.bf16 %v5216_v38, %v5218_v41 }
 0x157   : > { %v5222_v46 = vadd.f32 %v3623_v44, %v294_v42  ;;  %v423_v47 = vpop.f32.mrb[13].mxu0 }
 0x158   : > { %v5224_v48 = vadd.f32 %v423_v47, %v293_v43  ;;  %4436 = vmatprep.subr.bf16.mxu1 %v4435_v45 }
 0x159   : > { %4438 = vmatpush3.bf16.msra.mxu1 %v4435_v45 }
 0x15a   : > { %v3626_v51 = vpop.f32.mrb[14].mxu0  ;;  %v4439_v52 = vpack.c.bf16 %v5222_v46, %v5224_v48 }
 0x15b   : > { %v5228_v53 = vadd.f32 %v3626_v51, %v296_v49  ;;  %v433_v54 = vpop.f32.mrb[15].mxu0 }
 0x15c   : > { %v5230_v55 = vadd.f32 %v433_v54, %v295_v50  ;;  %4440 = vmatprep.subr.bf16.mxu1 %v4439_v52 }
 0x15d   : > { %4442 = vmatpush3.bf16.msra.mxu1 %v4439_v52 }
 0x15e   : > { %v4443_v57 = vpack.c.bf16 %v5228_v53, %v5230_v55 }
 0x160   : > { %4444 = vmatprep.subr.bf16.mxu1 %v4443_v57 }
 0x161   : > { %4446 = vmatpush3.bf16.msra.mxu1 %v4443_v57 }
 0x164   : > { %3660 = vmatmul.mubr.f32.vlgmr.msra.gmra.mrb[0].mxu1 %v5234_v58 }
 0x165   : > { %3662 = vmatprep.mubr.f32.mxu1 %v5236_v59 }
 0x168   : > { %3663 = vmatmul.mubr.f32.gmra.mrb[2].mxu1 %v5240_v61 }
 0x169   : > { %3665 = vmatprep.mubr.f32.mxu1 %v5242_v63 }
 0x16c   : > { %3666 = vmatmul.mubr.f32.gmra.mrb[4].mxu1 %v5246_v0 }
 0x16d   : > { %3668 = vmatprep.mubr.f32.mxu1 %v5248_v1 }
 0x170   : > { %3669 = vmatmul.mubr.f32.gmra.mrb[6].mxu1 %v5252_v2 }
 0x171   : > { %3671 = vmatprep.mubr.f32.mxu1 %v5254_v4 }
 0x174   : > { %3672 = vmatmul.mubr.f32.gmra.mrb[8].mxu1 %v5258_v6 }
 0x175   : > { %3674 = vmatprep.mubr.f32.mxu1 %v5260_v7 }
 0x178   : > { %3675 = vmatmul.mubr.f32.gmra.mrb[10].mxu1 %v5264_v8 }
 0x179   : > { %3677 = vmatprep.mubr.f32.mxu1 %v5266_v9 }
 0x17c   : > { %3678 = vmatmul.mubr.f32.gmra.mrb[12].mxu1 %v5270_v11 }
 0x17d   : > { %3680 = vmatprep.mubr.f32.mxu1 %v5272_v13 }
 0x180   : > { %3681 = vmatmul.mubr.f32.gmra.mrb[14].mxu1 %v5276_v14 }
 0x237   : > { %v3661_v15 = vpop.f32.mrb[0].mxu1 }
 0x238   : > { %v5280_v16 = vsub.f32 %v5186_v60, %v3661_v15  ;;  %v556_v18 = vpop.f32.mrb[1].mxu1 }
 0x239   : > { %v5283_v22 = vsub.f32 %v5188_v62, %v556_v18 }
 0x23a   : > { %v652_v23 = vmul.f32 %v5280_v16, %v5280_v16 }
 0x23b   : > { %v651_v25 = vmul.f32 %v5283_v22, %v5283_v22  ;;  %v3664_v26 = vpop.f32.mrb[2].mxu1 }
 0x23c   : > { %v5290_v29 = vsub.f32 %v5192_v3, %v3664_v26  ;;  %v566_v32 = vpop.f32.mrb[3].mxu1 }
 0x23d   : > { %v5293_v33 = vsub.f32 %v5194_v5, %v566_v32  ;;  %v4447_v35 = vpack.c.bf16 %v652_v23, %v651_v25 }
 0x23e   : > { %v654_v36 = vmul.f32 %v5290_v29, %v5290_v29 }
 0x23f   : > { %v653_v39 = vmul.f32 %v5293_v33, %v5293_v33  ;;  %v3667_v42 = vpop.f32.mrb[4].mxu1  ;;  %4448 = vmatprep.subr.bf16.mxu0 %v4447_v35 }
 0x240   : > { %v5300_v43 = vsub.f32 %v5198_v10, %v3667_v42  ;;  %v576_v44 = vpop.f32.mrb[5].mxu1  ;;  %4450 = vmatpush3.bf16.msra.mxu0 %v4447_v35 }
 0x241   : > { %v5303_v45 = vsub.f32 %v5200_v12, %v576_v44  ;;  %v4451_v47 = vpack.c.bf16 %v654_v36, %v653_v39 }
 0x242   : > { %v656_v49 = vmul.f32 %v5300_v43, %v5300_v43 }
 0x243   : > { %v655_v50 = vmul.f32 %v5303_v45, %v5303_v45  ;;  %v3670_v51 = vpop.f32.mrb[6].mxu1  ;;  %4452 = vmatprep.subr.bf16.mxu0 %v4451_v47 }
 0x244   : > { %v5310_v52 = vsub.f32 %v5204_v17, %v3670_v51  ;;  %v586_v54 = vpop.f32.mrb[7].mxu1  ;;  %4454 = vmatpush3.bf16.msra.mxu0 %v4451_v47 }
 0x245   : > { %v5313_v57 = vsub.f32 %v5206_v20, %v586_v54  ;;  %v4455_v15 = vpack.c.bf16 %v656_v49, %v655_v50 }
 0x246   : > { %v658_v18 = vmul.f32 %v5310_v52, %v5310_v52 }
 0x247   : > { %v657_v23 = vmul.f32 %v5313_v57, %v5313_v57  ;;  %v3673_v25 = vpop.f32.mrb[8].mxu1  ;;  %4456 = vmatprep.subr.bf16.mxu0 %v4455_v15 }
 0x248   : > { %v5320_v26 = vsub.f32 %v5210_v27, %v3673_v25  ;;  %v596_v32 = vpop.f32.mrb[9].mxu1  ;;  %4458 = vmatpush3.bf16.msra.mxu0 %v4455_v15 }
 0x249   : > { %v5323_v35 = vsub.f32 %v5212_v30, %v596_v32  ;;  %v4459_v36 = vpack.c.bf16 %v658_v18, %v657_v23 }
 0x24a   : > { %v660_v39 = vmul.f32 %v5320_v26, %v5320_v26 }
 0x24b   : > { %v659_v42 = vmul.f32 %v5323_v35, %v5323_v35  ;;  %v3676_v44 = vpop.f32.mrb[10].mxu1  ;;  %4460 = vmatprep.subr.bf16.mxu0 %v4459_v36 }
 0x24c   : > { %v5330_v47 = vsub.f32 %v5216_v38, %v3676_v44  ;;  %v606_v49 = vpop.f32.mrb[11].mxu1  ;;  %4462 = vmatpush3.bf16.msra.mxu0 %v4459_v36 }
 0x24d   : > { %v5333_v50 = vsub.f32 %v5218_v41, %v606_v49  ;;  %v4463_v51 = vpack.c.bf16 %v660_v39, %v659_v42 }
 0x24e   : > { %v662_v54 = vmul.f32 %v5330_v47, %v5330_v47 }
 0x24f   : > { %v661_v15 = vmul.f32 %v5333_v50, %v5333_v50  ;;  %v3679_v18 = vpop.f32.mrb[12].mxu1  ;;  %4464 = vmatprep.subr.bf16.mxu0 %v4463_v51 }
 0x250   : > { %v5340_v23 = vsub.f32 %v5222_v46, %v3679_v18  ;;  %v616_v25 = vpop.f32.mrb[13].mxu1  ;;  %4466 = vmatpush3.bf16.msra.mxu0 %v4463_v51 }
 0x251   : > { %v5343_v32 = vsub.f32 %v5224_v48, %v616_v25  ;;  %v4467_v36 = vpack.c.bf16 %v662_v54, %v661_v15 }
 0x252   : > { %v664_v39 = vmul.f32 %v5340_v23, %v5340_v23 }
 0x253   : > { %v663_v42 = vmul.f32 %v5343_v32, %v5343_v32  ;;  %v3682_v44 = vpop.f32.mrb[14].mxu1  ;;  %4468 = vmatprep.subr.bf16.mxu0 %v4467_v36 }
 0x254   : > { %v5350_v49 = vsub.f32 %v5228_v53, %v3682_v44  ;;  %v626_v40 = vpop.f32.mrb[15].mxu1  ;;  %4470 = vmatpush3.bf16.msra.mxu0 %v4467_v36 }
 0x255   : > { %v5353_v18 = vsub.f32 %v5230_v55, %v626_v40  ;;  %v4471_v51 = vpack.c.bf16 %v664_v39, %v663_v42  ;;  %v892_v40 = vld [vmem:[#allocation3 + $0x180] sm:$0xff]  ;;  %v443_v39 = vld [vmem:[#allocation3 + $0x388] sm:$0xff] }
 0x256   : > { %v666_v54 = vmul.f32 %v5350_v49, %v5350_v49  ;;  %3771 = vmatprep.mubr.f32.mxu1 %v892_v40 }
 0x257   : > { %v665_v15 = vmul.f32 %v5353_v18, %v5353_v18  ;;  %4472 = vmatprep.subr.bf16.mxu0 %v4471_v51 }
 0x258   : > { %4474 = vmatpush3.bf16.msra.mxu0 %v4471_v51  ;;  %v442_v51 = vld [vmem:[#allocation3 + $0x380] sm:$0xff] }
 0x259   : > { %v4475_v25 = vpack.c.bf16 %v666_v54, %v665_v15  ;;  %v459_v15 = vld [vmem:[#allocation3 + $0x408] sm:$0xff] }
 0x25b   : > { %4476 = vmatprep.subr.bf16.mxu0 %v4475_v25 }
 0x25c   : > { %4478 = vmatpush3.bf16.msra.mxu0 %v4475_v25 }
 0x25f   : > { %3716 = vmatmul.mubr.f32.vlgmr.msra.gmra.mrb[16].mxu0 %v5234_v58 }
 0x260   : > { %3718 = vmatprep.mubr.f32.mxu0 %v5236_v59 }
 0x263   : > { %3719 = vmatmul.mubr.f32.gmra.mrb[18].mxu0 %v5240_v61 }
 0x264   : > { %3721 = vmatprep.mubr.f32.mxu0 %v5242_v63 }
 0x267   : > { %3722 = vmatmul.mubr.f32.gmra.mrb[20].mxu0 %v5246_v0 }
 0x268   : > { %3724 = vmatprep.mubr.f32.mxu0 %v5248_v1 }
 0x26b   : > { %3725 = vmatmul.mubr.f32.gmra.mrb[22].mxu0 %v5252_v2 }
 0x26c   : > { %3727 = vmatprep.mubr.f32.mxu0 %v5254_v4 }
 0x26f   : > { %3728 = vmatmul.mubr.f32.gmra.mrb[24].mxu0 %v5258_v6 }
 0x270   : > { %3730 = vmatprep.mubr.f32.mxu0 %v5260_v7 }
 0x273   : > { %3731 = vmatmul.mubr.f32.gmra.mrb[26].mxu0 %v5264_v8 }
 0x274   : > { %3733 = vmatprep.mubr.f32.mxu0 %v5266_v9 }
 0x277   : > { %3734 = vmatmul.mubr.f32.gmra.mrb[28].mxu0 %v5270_v11 }
 0x278   : > { %3736 = vmatprep.mubr.f32.mxu0 %v5272_v13 }
 0x27b   : > { %3737 = vmatmul.mubr.f32.gmra.mrb[30].mxu0 %v5276_v14 }
 0x332   : > { %v3717_v58 = vpop.f32.mrb[16].mxu0 }
 0x333   : > { %v739_v59 = vadd.f32 1e-05, %v3717_v58  ;;  %v733_v61 = vpop.f32.mrb[17].mxu0  ;;  %v458_v58 = vld [vmem:[#allocation3 + $0x400] sm:$0xff] }
 0x334   : > { %v734_v63 = vadd.f32 1e-05, %v733_v61 }
 0x335   : > { %4867 = vrsqrt.f32 %v739_v59 }
 0x336   : > { %4869 = vrsqrt.f32 %v734_v63  ;;  %v3720_v0 = vpop.f32.mrb[18].mxu0 }
 0x337   : > { %v749_v1 = vadd.f32 1e-05, %v3720_v0  ;;  %v743_v2 = vpop.f32.mrb[19].mxu0 }
 0x338   : > { %v744_v4 = vadd.f32 1e-05, %v743_v2  ;;  %v445_v2 = vld [vmem:[#allocation3 + $0x398] sm:$0xff] }
 0x339   : > { %4871 = vrsqrt.f32 %v749_v1 }
 0x33a   : > { %4873 = vrsqrt.f32 %v744_v4  ;;  %v3723_v6 = vpop.f32.mrb[20].mxu0 }
 0x33b   : > { %v759_v7 = vadd.f32 1e-05, %v3723_v6  ;;  %v753_v8 = vpop.f32.mrb[21].mxu0 }
 0x33c   : > { %v754_v9 = vadd.f32 1e-05, %v753_v8  ;;  %v444_v8 = vld [vmem:[#allocation3 + $0x390] sm:$0xff] }
 0x33d   : > { %4875 = vrsqrt.f32 %v759_v7 }
 0x33e   : > { %4877 = vrsqrt.f32 %v754_v9  ;;  %v3726_v11 = vpop.f32.mrb[22].mxu0 }
 0x33f   : > { %v4868_v13 = vpop.eup %4867  ;;  %v769_v14 = vadd.f32 1e-05, %v3726_v11  ;;  %v763_v36 = vpop.f32.mrb[23].mxu0 }
 0x340   : > { %v4870_v42 = vpop.eup %4869  ;;  %v764_v44 = vadd.f32 1e-05, %v763_v36  ;;  %v829_v54 = vmul.f32 %v4868_v13, %v5280_v16 }
 0x341   : > { %4879 = vrsqrt.f32 %v769_v14  ;;  %v828_v25 = vmul.f32 %v4870_v42, %v5283_v22  ;;  %v461_v22 = vld [vmem:[#allocation3 + $0x418] sm:$0xff]  ;;  %v460_v14 = vld [vmem:[#allocation3 + $0x410] sm:$0xff] }
 0x342   : > { %4881 = vrsqrt.f32 %v764_v44  ;;  %v3729_v40 = vpop.f32.mrb[24].mxu0  ;;  %v845_v59 = vmul.f32 %v829_v54, %v443_v39 }
 0x343   : > { %v4872_v61 = vpop.eup %4871  ;;  %v779_v63 = vadd.f32 1e-05, %v3729_v40  ;;  %v773_v0 = vpop.f32.mrb[25].mxu0  ;;  %v844_v1 = vmul.f32 %v828_v25, %v442_v51 }
 0x344   : > { %v4874_v4 = vpop.eup %4873  ;;  %v774_v6 = vadd.f32 1e-05, %v773_v0  ;;  %v5376_v7 = vadd.f32 %v845_v59, %v459_v15  ;;  %v831_v16 = vmul.f32 %v4872_v61, %v5290_v29  ;;  %v447_v15 = vld [vmem:[#allocation3 + $0x3a8] sm:$0xff] }
 0x345   : > { %4883 = vrsqrt.f32 %v779_v63  ;;  %v5379_v9 = vadd.f32 %v844_v1, %v458_v58  ;;  %v830_v11 = vmul.f32 %v4874_v4, %v5293_v33  ;;  %v446_v58 = vld [vmem:[#allocation3 + $0x3a0] sm:$0xff]  ;;  %v463_v61 = vld [vmem:[#allocation3 + $0x428] sm:$0xff] }
 0x346   : > { %4885 = vrsqrt.f32 %v774_v6  ;;  %v3732_v13 = vpop.f32.mrb[26].mxu0  ;;  %v847_v36 = vmul.f32 %v831_v16, %v445_v2  ;;  %v462_v1 = vld [vmem:[#allocation3 + $0x420] sm:$0xff] }
 0x347   : > { %v4876_v39 = vpop.eup %4875  ;;  %v789_v42 = vadd.f32 1e-05, %v3732_v13  ;;  %v783_v44 = vpop.f32.mrb[27].mxu0  ;;  %v4479_v51 = vpack.c.bf16 %v5376_v7, %v5379_v9  ;;  %v846_v54 = vmul.f32 %v830_v11, %v444_v8 }
 0x348   : > { %v4878_v25 = vpop.eup %4877  ;;  %v784_v29 = vadd.f32 1e-05, %v783_v44  ;;  %v5384_v40 = vadd.f32 %v847_v36, %v461_v22  ;;  %v833_v59 = vmul.f32 %v4876_v39, %v5300_v43  ;;  %v449_v43 = vld [vmem:[#allocation3 + $0x3b8] sm:$0xff]  ;;  %v448_v36 = vld [vmem:[#allocation3 + $0x3b0] sm:$0xff] }
 0x349   : > { %4887 = vrsqrt.f32 %v789_v42  ;;  %4480 = vmatprep.subr.bf16.mxu1 %v4479_v51  ;;  %v5387_v33 = vadd.f32 %v846_v54, %v460_v14  ;;  %v832_v63 = vmul.f32 %v4878_v25, %v5303_v45  ;;  %v465_v42 = vld [vmem:[#allocation3 + $0x438] sm:$0xff]  ;;  %v464_v54 = vld [vmem:[#allocation3 + $0x430] sm:$0xff] }
 0x34a   : > { %4889 = vrsqrt.f32 %v784_v29  ;;  %v3735_v0 = vpop.f32.mrb[28].mxu0  ;;  %4482 = vmatpush3.bf16.msra.mxu1 %v4479_v51  ;;  %v849_v2 = vmul.f32 %v833_v59, %v447_v15 }
 0x34b   : > { %v4880_v4 = vpop.eup %4879  ;;  %v799_v6 = vadd.f32 1e-05, %v3735_v0  ;;  %v793_v8 = vpop.f32.mrb[29].mxu0  ;;  %v4483_v16 = vpack.c.bf16 %v5384_v40, %v5387_v33  ;;  %v848_v22 = vmul.f32 %v832_v63, %v446_v58 }
 0x34c   : > { %v4882_v11 = vpop.eup %4881  ;;  %v794_v13 = vadd.f32 1e-05, %v793_v8  ;;  %v5392_v14 = vadd.f32 %v849_v2, %v463_v61  ;;  %v835_v45 = vmul.f32 %v4880_v4, %v5310_v52  ;;  %v451_v52 = vld [vmem:[#allocation3 + $0x3c8] sm:$0xff]  ;;  %v450_v2 = vld [vmem:[#allocation3 + $0x3c0] sm:$0xff] }
 0x34d   : > { %4891 = vrsqrt.f32 %v799_v6  ;;  %4484 = vmatprep.subr.bf16.mxu1 %v4483_v16  ;;  %v5395_v39 = vadd.f32 %v848_v22, %v462_v1  ;;  %v834_v44 = vmul.f32 %v4882_v11, %v5313_v57  ;;  %v467_v6 = vld [vmem:[#allocation3 + $0x448] sm:$0xff] }
 0x34e   : > { %4893 = vrsqrt.f32 %v794_v13  ;;  %v3738_v51 = vpop.f32.mrb[30].mxu0  ;;  %4486 = vmatpush3.bf16.msra.mxu1 %v4483_v16  ;;  %v851_v15 = vmul.f32 %v835_v45, %v449_v43  ;;  %v466_v16 = vld [vmem:[#allocation3 + $0x440] sm:$0xff] }
 0x34f   : > { %v4884_v25 = vpop.eup %4883  ;;  %v809_v29 = vadd.f32 1e-05, %v3738_v51  ;;  %v803_v58 = vpop.f32.mrb[31].mxu0  ;;  %v4487_v59 = vpack.c.bf16 %v5392_v14, %v5395_v39  ;;  %v850_v61 = vmul.f32 %v834_v44, %v448_v36  ;;  %v453_v36 = vld [vmem:[#allocation3 + $0x3d8] sm:$0xff] }
 0x350   : > { %v4886_v63 = vpop.eup %4885  ;;  %v804_v0 = vadd.f32 1e-05, %v803_v58  ;;  %v5400_v1 = vadd.f32 %v851_v15, %v465_v42  ;;  %v837_v57 = vmul.f32 %v4884_v25, %v5320_v26  ;;  %v452_v26 = vld [vmem:[#allocation3 + $0x3d0] sm:$0xff] }
 0x351   : > { %4895 = vrsqrt.f32 %v809_v29  ;;  %4488 = vmatprep.subr.bf16.mxu1 %v4487_v59  ;;  %v5403_v4 = vadd.f32 %v850_v61, %v464_v54  ;;  %v836_v8 = vmul.f32 %v4886_v63, %v5323_v35  ;;  %v469_v35 = vld [vmem:[#allocation3 + $0x458] sm:$0xff]  ;;  %v468_v15 = vld [vmem:[#allocation3 + $0x450] sm:$0xff]  ;;  %v455_v61 = vld [vmem:[#allocation3 + $0x3e8] sm:$0xff] }
 0x352   : > { %4897 = vrsqrt.f32 %v804_v0  ;;  %4490 = vmatpush3.bf16.msra.mxu1 %v4487_v59  ;;  %v853_v22 = vmul.f32 %v837_v57, %v451_v52  ;;  %v454_v0 = vld [vmem:[#allocation3 + $0x3e0] sm:$0xff]  ;;  %v471_v57 = vld [vmem:[#allocation3 + $0x468] sm:$0xff] }
 0x353   : > { %v4888_v43 = vpop.eup %4887  ;;  %v4491_v11 = vpack.c.bf16 %v5400_v1, %v5403_v4  ;;  %v852_v13 = vmul.f32 %v836_v8, %v450_v2 }
 0x354   : > { %v4890_v45 = vpop.eup %4889  ;;  %v5408_v42 = vadd.f32 %v853_v22, %v467_v6  ;;  %v839_v44 = vmul.f32 %v4888_v43, %v5330_v47  ;;  %v470_v6 = vld [vmem:[#allocation3 + $0x460] sm:$0xff] }
 0x355   : > { %4492 = vmatprep.subr.bf16.mxu1 %v4491_v11  ;;  %v5411_v51 = vadd.f32 %v852_v13, %v466_v16  ;;  %v838_v54 = vmul.f32 %v4890_v45, %v5333_v50  ;;  %v456_v45 = vld [vmem:[#allocation3 + $0x3f0] sm:$0xff] }
 0x356   : > { %4494 = vmatpush3.bf16.msra.mxu1 %v4491_v11  ;;  %v855_v25 = vmul.f32 %v839_v44, %v453_v36  ;;  %v457_v11 = vld [vmem:[#allocation3 + $0x3f8] sm:$0xff] }
 0x357   : > { %v4892_v29 = vpop.eup %4891  ;;  %v4495_v58 = vpack.c.bf16 %v5408_v42, %v5411_v51  ;;  %v854_v59 = vmul.f32 %v838_v54, %v452_v26  ;;  %v473_v44 = vld [vmem:[#allocation3 + $0x478] sm:$0xff] }
 0x358   : > { %v4894_v52 = vpop.eup %4893  ;;  %v5416_v63 = vadd.f32 %v855_v25, %v469_v35  ;;  %v841_v47 = vmul.f32 %v4892_v29, %v5340_v23  ;;  %v472_v35 = vld [vmem:[#allocation3 + $0x470] sm:$0xff] }
 0x359   : > { %4496 = vmatprep.subr.bf16.mxu1 %v4495_v58  ;;  %v5419_v2 = vadd.f32 %v854_v59, %v468_v15  ;;  %v840_v50 = vmul.f32 %v4894_v52, %v5343_v32  ;;  %v893_v59 = vld [vmem:[#allocation3 + $0x188] sm:$0xff]  ;;  %v896_v52 = vld [vmem:[#allocation3 + $0x1a0] sm:$0xff] }
 0x35a   : > { %4498 = vmatpush3.bf16.msra.mxu1 %v4495_v58  ;;  %v857_v8 = vmul.f32 %v841_v47, %v455_v61  ;;  %v895_v61 = vld [vmem:[#allocation3 + $0x198] sm:$0xff]  ;;  %v898_v47 = vld [vmem:[#allocation3 + $0x1b0] sm:$0xff] }
 0x35b   : > { %v4896_v16 = vpop.eup %4895  ;;  %v4499_v22 = vpack.c.bf16 %v5416_v63, %v5419_v2  ;;  %v856_v43 = vmul.f32 %v840_v50, %v454_v0  ;;  %v897_v0 = vld [vmem:[#allocation3 + $0x1a8] sm:$0xff]  ;;  %v900_v50 = vld [vmem:[#allocation3 + $0x1c0] sm:$0xff] }
 0x35c   : > { %v4898_v13 = vpop.eup %4897  ;;  %v5424_v36 = vadd.f32 %v857_v8, %v471_v57  ;;  %v843_v23 = vmul.f32 %v4896_v16, %v5350_v49  ;;  %v899_v57 = vld [vmem:[#allocation3 + $0x1b8] sm:$0xff]  ;;  %v902_v8 = vld [vmem:[#allocation3 + $0x1d0] sm:$0xff] }
 0x35d   : > { %4500 = vmatprep.subr.bf16.mxu1 %v4499_v22  ;;  %v5427_v26 = vadd.f32 %v856_v43, %v470_v6  ;;  %v842_v32 = vmul.f32 %v4898_v13, %v5353_v18  ;;  %v894_v18 = vld [vmem:[#allocation3 + $0x190] sm:$0xff]  ;;  %v901_v6 = vld [vmem:[#allocation3 + $0x1c8] sm:$0xff]  ;;  %v903_v16 = vld [vmem:[#allocation3 + $0x1d8] sm:$0xff] }
 0x35e   : > { %4502 = vmatpush3.bf16.msra.mxu1 %v4499_v22  ;;  %v859_v54 = vmul.f32 %v843_v23, %v457_v11  ;;  %v904_v22 = vld [vmem:[#allocation3 + $0x1e0] sm:$0xff]  ;;  %v905_v43 = vld [vmem:[#allocation3 + $0x1e8] sm:$0xff]  ;;  %v906_v11 = vld [vmem:[#allocation3 + $0x1f0] sm:$0xff] }
 0x35f   : > { %v4503_v15 = vpack.c.bf16 %v5424_v36, %v5427_v26  ;;  %v858_v25 = vmul.f32 %v842_v32, %v456_v45  ;;  %v907_v13 = vld [vmem:[#allocation3 + $0x1f8] sm:$0xff]  ;;  %v876_v45 = vld [vmem:[#allocation3 + $0x200] sm:$0xff]  ;;  %v909_v23 = vld [vmem:[#allocation3 + $0x588] sm:$0xff] }
 0x360   : > { %v5432_v29 = vadd.f32 %v859_v54, %v473_v44  ;;  %3827 = vmatprep.mubr.f32.mxu0 %v876_v45  ;;  %v908_v44 = vld [vmem:[#allocation3 + $0x580] sm:$0xff] }
 0x361   : > { %4504 = vmatprep.subr.bf16.mxu1 %v4503_v15  ;;  %v5434_v58 = vadd.f32 %v858_v25, %v472_v35  ;;  %v911_v25 = vld [vmem:[#allocation3 + $0x598] sm:$0xff] }
 0x362   : > { %4506 = vmatpush3.bf16.msra.mxu1 %v4503_v15 }
 0x363   : > { %v4507_v49 = vpack.c.bf16 %v5432_v29, %v5434_v58 }
 0x365   : > { %4508 = vmatprep.subr.bf16.mxu1 %v4507_v49 }
 0x366   : > { %4510 = vmatpush3.bf16.msra.mxu1 %v4507_v49 }
 0x369   : > { %3772 = vmatmul.mubr.f32.vlgmr.msra.gmra.mrb[16].mxu1 %v893_v59  ;;  %v910_v59 = vld [vmem:[#allocation3 + $0x590] sm:$0xff] }
 0x36a   : > { %3774 = vmatprep.mubr.f32.mxu1 %v894_v18 }
 0x36d   : > { %3775 = vmatmul.mubr.f32.gmra.mrb[18].mxu1 %v895_v61 }
 0x36e   : > { %3777 = vmatprep.mubr.f32.mxu1 %v896_v52 }
 0x371   : > { %3778 = vmatmul.mubr.f32.gmra.mrb[20].mxu1 %v897_v0 }
 0x372   : > { %3780 = vmatprep.mubr.f32.mxu1 %v898_v47 }
 0x375   : > { %3781 = vmatmul.mubr.f32.gmra.mrb[22].mxu1 %v899_v57 }
 0x376   : > { %3783 = vmatprep.mubr.f32.mxu1 %v900_v50 }
 0x379   : > { %3784 = vmatmul.mubr.f32.gmra.mrb[24].mxu1 %v901_v6  ;;  %v913_v6 = vld [vmem:[#allocation3 + $0x5a8] sm:$0xff] }
 0x37a   : > { %3786 = vmatprep.mubr.f32.mxu1 %v902_v8 }
 0x37d   : > { %3787 = vmatmul.mubr.f32.gmra.mrb[26].mxu1 %v903_v16  ;;  %v912_v16 = vld [vmem:[#allocation3 + $0x5a0] sm:$0xff] }
 0x37e   : > { %3789 = vmatprep.mubr.f32.mxu1 %v904_v22 }
 0x381   : > { %3790 = vmatmul.mubr.f32.gmra.mrb[28].mxu1 %v905_v43 }
 0x382   : > { %3792 = vmatprep.mubr.f32.mxu1 %v906_v11 }
 0x385   : > { %3793 = vmatmul.mubr.f32.gmra.mrb[30].mxu1 %v907_v13 }
 0x386   : > { %3883 = vmatprep.mubr.f32.mxu1 %v5182_v56 }
 0x43c   : > { %v3773_v32 = vpop.f32.mrb[16].mxu1 }
 0x43d   : > { %v996_v35 = vadd.f32 %v3773_v32, %v909_v23  ;;  %v990_v54 = vpop.f32.mrb[17].mxu1 }
 0x43e   : > { %v991_v15 = vadd.f32 %v990_v54, %v908_v44 }
 0x43f   : > { %v1070_v49 = vadd.f32 3.0, %v996_v35 }
 0x440   : > { %v1069_v18 = vadd.f32 3.0, %v991_v15  ;;  %v3776_v61 = vpop.f32.mrb[18].mxu1 }
 0x441   : > { %v1086_v52 = vmax.f32 %v1070_v49, 0.0  ;;  %v1006_v0 = vadd.f32 %v3776_v61, %v911_v25  ;;  %v1000_v47 = vpop.f32.mrb[19].mxu1 }
 0x442   : > { %v1085_v57 = vmax.f32 %v1069_v18, 0.0  ;;  %v1001_v50 = vadd.f32 %v1000_v47, %v910_v59  ;;  %v914_v18 = vld [vmem:[#allocation3 + $0x5b0] sm:$0xff] }
 0x443   : > { %v1102_v56 = vmin.f32 %v1086_v52, 6.0  ;;  %v1072_v8 = vadd.f32 3.0, %v1006_v0 }
 0x444   : > { %v1101_v22 = vmin.f32 %v1085_v57, 6.0  ;;  %v1071_v43 = vadd.f32 3.0, %v1001_v50  ;;  %v3779_v11 = vpop.f32.mrb[20].mxu1 }
 0x445   : > { %v1118_v13 = vmul.f32 %v1102_v56, %v996_v35  ;;  %v1088_v45 = vmax.f32 %v1072_v8, 0.0  ;;  %v1016_v23 = vadd.f32 %v3779_v11, %v913_v6  ;;  %v1010_v44 = vpop.f32.mrb[21].mxu1  ;;  %v917_v8 = vld [vmem:[#allocation3 + $0x5c8] sm:$0xff]  ;;  %v916_v11 = vld [vmem:[#allocation3 + $0x5c0] sm:$0xff] }
 0x446   : > { %v1117_v32 = vmul.f32 %v1101_v22, %v991_v15  ;;  %v1087_v54 = vmax.f32 %v1071_v43, 0.0  ;;  %v1011_v37 = vadd.f32 %v1010_v44, %v912_v16 }
 0x447   : > { %v1134_v49 = vmul.f32 0.16666667, %v1118_v13  ;;  %v1104_v25 = vmin.f32 %v1088_v45, 6.0  ;;  %v1074_v61 = vadd.f32 3.0, %v1016_v23 }
 0x448   : > { %v1133_v59 = vmul.f32 0.16666667, %v1117_v32  ;;  %v1103_v47 = vmin.f32 %v1087_v54, 6.0  ;;  %v1073_v52 = vadd.f32 3.0, %v1011_v37  ;;  %v3782_v31 = vpop.f32.mrb[22].mxu1 }
 0x449   : > { %v1120_v28 = vmul.f32 %v1104_v25, %v1006_v0  ;;  %v1090_v57 = vmax.f32 %v1074_v61, 0.0  ;;  %v1026_v24 = vadd.f32 %v3782_v31, %v915_v34  ;;  %v1020_v21 = vpop.f32.mrb[23].mxu1 }
 0x44a   : > { %v1119_v35 = vmul.f32 %v1103_v47, %v1001_v50  ;;  %v1089_v56 = vmax.f32 %v1073_v52, 0.0  ;;  %v1021_v6 = vadd.f32 %v1020_v21, %v914_v18  ;;  %v4511_v15 = vpack.c.bf16 %v1134_v49, %v1133_v59  ;;  %v919_v21 = vld [vmem:[#allocation3 + $0x5d8] sm:$0xff]  ;;  %v918_v59 = vld [vmem:[#allocation3 + $0x5d0] sm:$0xff] }
 0x44b   : > { %v1136_v22 = vmul.f32 0.16666667, %v1120_v28  ;;  %v1106_v16 = vmin.f32 %v1090_v57, 6.0  ;;  %v1076_v43 = vadd.f32 3.0, %v1026_v24 }
 0x44c   : > { %v1135_v13 = vmul.f32 0.16666667, %v1119_v35  ;;  %v1105_v45 = vmin.f32 %v1089_v56, 6.0  ;;  %v1075_v44 = vadd.f32 3.0, %v1021_v6  ;;  %v3785_v32 = vpop.f32.mrb[24].mxu1  ;;  %4512 = vmatprep.subr.bf16.mxu0 %v4511_v15 }
 0x44d   : > { %v1122_v54 = vmul.f32 %v1106_v16, %v1016_v23  ;;  %v1092_v19 = vmax.f32 %v1076_v43, 0.0  ;;  %v1036_v0 = vadd.f32 %v3785_v32, %v917_v8  ;;  %v1030_v25 = vpop.f32.mrb[25].mxu1  ;;  %4514 = vmatpush3.bf16.msra.mxu0 %v4511_v15 }
 0x44e   : > { %v1121_v31 = vmul.f32 %v1105_v45, %v1011_v37  ;;  %v1091_v34 = vmax.f32 %v1075_v44, 0.0  ;;  %v1031_v50 = vadd.f32 %v1030_v25, %v916_v11  ;;  %v4515_v61 = vpack.c.bf16 %v1136_v22, %v1135_v13  ;;  %v921_v11 = vld [vmem:[#allocation3 + $0x5e8] sm:$0xff]  ;;  %v920_v44 = vld [vmem:[#allocation3 + $0x5e0] sm:$0xff] }
 0x44f   : > { %v1138_v49 = vmul.f32 0.16666667, %v1122_v54  ;;  %v1108_v28 = vmin.f32 %v1092_v19, 6.0  ;;  %v1078_v18 = vadd.f32 3.0, %v1036_v0 }
 0x450   : > { %v1137_v47 = vmul.f32 0.16666667, %v1121_v31  ;;  %v1107_v52 = vmin.f32 %v1091_v34, 6.0  ;;  %v1077_v57 = vadd.f32 3.0, %v1031_v50  ;;  %v3788_v35 = vpop.f32.mrb[26].mxu1  ;;  %4516 = vmatprep.subr.bf16.mxu0 %v4515_v61 }
 0x451   : > { %v1124_v56 = vmul.f32 %v1108_v28, %v1026_v24  ;;  %v1094_v23 = vmax.f32 %v1078_v18, 0.0  ;;  %v1046_v16 = vadd.f32 %v3788_v35, %v919_v21  ;;  %v1040_v8 = vpop.f32.mrb[27].mxu1  ;;  %4518 = vmatpush3.bf16.msra.mxu0 %v4515_v61  ;;  %v922_v35 = vld [vmem:[#allocation3 + $0x5f0] sm:$0xff] }
 0x452   : > { %v1123_v15 = vmul.f32 %v1107_v52, %v1021_v6  ;;  %v1093_v37 = vmax.f32 %v1077_v57, 0.0  ;;  %v1041_v43 = vadd.f32 %v1040_v8, %v918_v59  ;;  %v4519_v45 = vpack.c.bf16 %v1138_v49, %v1137_v47  ;;  %v923_v59 = vld [vmem:[#allocation3 + $0x5f8] sm:$0xff] }
 0x453   : > { %v1140_v22 = vmul.f32 0.16666667, %v1124_v56  ;;  %v1110_v13 = vmin.f32 %v1094_v23, 6.0  ;;  %v1080_v19 = vadd.f32 3.0, %v1046_v16 }
 0x454   : > { %v1139_v32 = vmul.f32 0.16666667, %v1123_v15  ;;  %v1109_v54 = vmin.f32 %v1093_v37, 6.0  ;;  %v1079_v25 = vadd.f32 3.0, %v1041_v43  ;;  %v3791_v31 = vpop.f32.mrb[28].mxu1  ;;  %4520 = vmatprep.subr.bf16.mxu0 %v4519_v45 }
 0x455   : > { %v1126_v34 = vmul.f32 %v1110_v13, %v1036_v0  ;;  %v1096_v24 = vmax.f32 %v1080_v19, 0.0  ;;  %v1056_v28 = vadd.f32 %v3791_v31, %v921_v11  ;;  %v1050_v21 = vpop.f32.mrb[29].mxu1  ;;  %4522 = vmatpush3.bf16.msra.mxu0 %v4519_v45 }
 0x456   : > { %v1125_v61 = vmul.f32 %v1109_v54, %v1031_v50  ;;  %v1095_v6 = vmax.f32 %v1079_v25, 0.0  ;;  %v1051_v18 = vadd.f32 %v1050_v21, %v920_v44  ;;  %v4523_v52 = vpack.c.bf16 %v1140_v22, %v1139_v32 }
 0x457   : > { %v1142_v49 = vmul.f32 0.16666667, %v1126_v34  ;;  %v1112_v47 = vmin.f32 %v1096_v24, 6.0  ;;  %v1082_v57 = vadd.f32 3.0, %v1056_v28 }
 0x458   : > { %v1141_v56 = vmul.f32 0.16666667, %v1125_v61  ;;  %v1111_v23 = vmin.f32 %v1095_v6, 6.0  ;;  %v1081_v8 = vadd.f32 3.0, %v1051_v18  ;;  %v3794_v15 = vpop.f32.mrb[30].mxu1  ;;  %4524 = vmatprep.subr.bf16.mxu0 %v4523_v52 }
 0x459   : > { %v1128_v37 = vmul.f32 %v1112_v47, %v1046_v16  ;;  %v1098_v0 = vmax.f32 %v1082_v57, 0.0  ;;  %v1066_v13 = vadd.f32 %v3794_v15, %v923_v59  ;;  %v1060_v11 = vpop.f32.mrb[31].mxu1  ;;  %4526 = vmatpush3.bf16.msra.mxu0 %v4523_v52  ;;  %v879_v15 = vld [vmem:[#allocation3 + $0x218] sm:$0xff] }
 0x45a   : > { %v1127_v45 = vmul.f32 %v1111_v23, %v1041_v43  ;;  %v1097_v50 = vmax.f32 %v1081_v8, 0.0  ;;  %v1061_v19 = vadd.f32 %v1060_v11, %v922_v35  ;;  %v4527_v44 = vpack.c.bf16 %v1142_v49, %v1141_v56  ;;  %v883_v11 = vld [vmem:[#allocation3 + $0x238] sm:$0xff] }
 0x45b   : > { %v1144_v54 = vmul.f32 0.16666667, %v1128_v37  ;;  %v1114_v22 = vmin.f32 %v1098_v0, 6.0  ;;  %v1084_v32 = vadd.f32 3.0, %v1066_v13  ;;  %v880_v37 = vld [vmem:[#allocation3 + $0x220] sm:$0xff]  ;;  %v881_v0 = vld [vmem:[#allocation3 + $0x228] sm:$0xff] }
 0x45c   : > { %v1143_v25 = vmul.f32 0.16666667, %v1127_v45  ;;  %v1113_v31 = vmin.f32 %v1097_v50, 6.0  ;;  %v1083_v34 = vadd.f32 3.0, %v1061_v19  ;;  %4528 = vmatprep.subr.bf16.mxu0 %v4527_v44  ;;  %v884_v45 = vld [vmem:[#allocation3 + $0x240] sm:$0xff]  ;;  %v885_v50 = vld [vmem:[#allocation3 + $0x248] sm:$0xff] }
 0x45d   : > { %v1130_v24 = vmul.f32 %v1114_v22, %v1056_v28  ;;  %v1100_v21 = vmax.f32 %v1084_v32, 0.0  ;;  %4530 = vmatpush3.bf16.msra.mxu0 %v4527_v44  ;;  %v877_v28 = vld [vmem:[#allocation3 + $0x208] sm:$0xff]  ;;  %v887_v44 = vld [vmem:[#allocation3 + $0x258] sm:$0xff]  ;;  %v890_v32 = vld [vmem:[#allocation3 + $0x270] sm:$0xff] }
 0x45e   : > { %v1129_v61 = vmul.f32 %v1113_v31, %v1051_v18  ;;  %v1099_v16 = vmax.f32 %v1083_v34, 0.0  ;;  %v4531_v6 = vpack.c.bf16 %v1144_v54, %v1143_v25  ;;  %v878_v18 = vld [vmem:[#allocation3 + $0x210] sm:$0xff]  ;;  %v888_v54 = vld [vmem:[#allocation3 + $0x260] sm:$0xff]  ;;  %v889_v22 = vld [vmem:[#allocation3 + $0x268] sm:$0xff] }
 0x45f   : > { %v1146_v59 = vmul.f32 0.16666667, %v1130_v24  ;;  %v1116_v47 = vmin.f32 %v1100_v21, 6.0  ;;  %v891_v25 = vld [vmem:[#allocation3 + $0x278] sm:$0xff]  ;;  %v4941_v31 = vld [vmem:[#allocation3 + $0x100] sm:$0xff]  ;;  %v1150_v34 = vld [vmem:[#allocation3 + $0x608] sm:$0xff] }
 0x460   : > { %v1145_v52 = vmul.f32 0.16666667, %v1129_v61  ;;  %v1115_v43 = vmin.f32 %v1099_v16, 6.0  ;;  %4532 = vmatprep.subr.bf16.mxu0 %v4531_v6  ;;  %v1149_v24 = vld [vmem:[#allocation3 + $0x600] sm:$0xff] }
 0x461   : > { %v1132_v57 = vmul.f32 %v1116_v47, %v1066_v13  ;;  %4534 = vmatpush3.bf16.msra.mxu0 %v4531_v6  ;;  %v882_v13 = vld [vmem:[#allocation3 + $0x230] sm:$0xff] }
 0x462   : > { %v1131_v49 = vmul.f32 %v1115_v43, %v1061_v19  ;;  %v4535_v35 = vpack.c.bf16 %v1146_v59, %v1145_v52  ;;  %v886_v19 = vld [vmem:[#allocation3 + $0x250] sm:$0xff]  ;;  %v1152_v59 = vld [vmem:[#allocation3 + $0x618] sm:$0xff] }
 0x463   : > { %v1148_v56 = vmul.f32 0.16666667, %v1132_v57  ;;  %v1151_v52 = vld [vmem:[#allocation3 + $0x610] sm:$0xff] }
 0x464   : > { %v1147_v23 = vmul.f32 0.16666667, %v1131_v49  ;;  %4536 = vmatprep.subr.bf16.mxu0 %v4535_v35 }
 0x465   : > { %4538 = vmatpush3.bf16.msra.mxu0 %v4535_v35 }
 0x466   : > { %v4539_v8 = vpack.c.bf16 %v1148_v56, %v1147_v23 }
 0x468   : > { %4540 = vmatprep.subr.bf16.mxu0 %v4539_v8 }
 0x469   : > { %4542 = vmatpush3.bf16.msra.mxu0 %v4539_v8 }
 0x46c   : > { %3828 = vmatmul.mubr.f32.vlgmr.msra.gmra.mrb[32].mxu0 %v877_v28  ;;  %v1154_v28 = vld [vmem:[#allocation3 + $0x628] sm:$0xff] }
 0x46d   : > { %3830 = vmatprep.mubr.f32.mxu0 %v878_v18 }
 0x470   : > { %3831 = vmatmul.mubr.f32.gmra.mrb[34].mxu0 %v879_v15  ;;  %v1153_v15 = vld [vmem:[#allocation3 + $0x620] sm:$0xff] }
 0x471   : > { %3833 = vmatprep.mubr.f32.mxu0 %v880_v37 }
 0x474   : > { %3834 = vmatmul.mubr.f32.gmra.mrb[36].mxu0 %v881_v0 }
 0x475   : > { %3836 = vmatprep.mubr.f32.mxu0 %v882_v13 }
 0x478   : > { %3837 = vmatmul.mubr.f32.gmra.mrb[38].mxu0 %v883_v11 }
 0x479   : > { %3839 = vmatprep.mubr.f32.mxu0 %v884_v45  ;;  %v1156_v45 = vld [vmem:[#allocation3 + $0x638] sm:$0xff] }
 0x47c   : > { %3840 = vmatmul.mubr.f32.gmra.mrb[40].mxu0 %v885_v50  ;;  %v1155_v50 = vld [vmem:[#allocation3 + $0x630] sm:$0xff] }
 0x47d   : > { %3842 = vmatprep.mubr.f32.mxu0 %v886_v19 }
 0x480   : > { %3843 = vmatmul.mubr.f32.gmra.mrb[42].mxu0 %v887_v44 }
 0x481   : > { %3845 = vmatprep.mubr.f32.mxu0 %v888_v54 }
 0x484   : > { %3846 = vmatmul.mubr.f32.gmra.mrb[44].mxu0 %v889_v22 }
 0x485   : > { %3848 = vmatprep.mubr.f32.mxu0 %v890_v32 }
 0x488   : > { %3849 = vmatmul.mubr.f32.gmra.mrb[46].mxu0 %v891_v25  ;;  %v1158_v25 = vld [vmem:[#allocation3 + $0x648] sm:$0xff] }
 0x489   : > { %3939 = vmatprep.mubr.f32.mxu0 %v4941_v31  ;;  %v1157_v31 = vld [vmem:[#allocation3 + $0x640] sm:$0xff] }
 0x53f   : > { %v3829_v21 = vpop.f32.mrb[32].mxu0 }
 0x540   : > { %v1237_v61 = vadd.f32 %v3829_v21, %v1150_v34  ;;  %v1231_v16 = vpop.f32.mrb[33].mxu0 }
 0x541   : > { %v1232_v6 = vadd.f32 %v1231_v16, %v1149_v24 }
 0x542   : > { %v1311_v47 = vadd.f32 %v1237_v61, %v5376_v7 }
 0x543   : > { %v1310_v43 = vadd.f32 %v1232_v6, %v5379_v9  ;;  %v3832_v57 = vpop.f32.mrb[34].mxu0  ;;  %v1160_v6 = vld [vmem:[#allocation3 + $0x658] sm:$0xff] }
 0x544   : > { %v5442_v49 = vadd.f32 %v1311_v47, %v5186_v60  ;;  %v1247_v35 = vadd.f32 %v3832_v57, %v1152_v59  ;;  %v1241_v56 = vpop.f32.mrb[35].mxu0  ;;  %v1159_v59 = vld [vmem:[#allocation3 + $0x650] sm:$0xff] }
 0x545   : > { %v5445_v23 = vadd.f32 %v1310_v43, %v5188_v62  ;;  %v1242_v8 = vadd.f32 %v1241_v56, %v1151_v52  ;;  %v1162_v56 = vld [vmem:[#allocation3 + $0x668] sm:$0xff] }
 0x546   : > { %v1313_v18 = vadd.f32 %v1247_v35, %v5384_v40 }
 0x547   : > { %v1312_v37 = vadd.f32 %v1242_v8, %v5387_v33  ;;  %v3835_v7 = vpop.f32.mrb[36].mxu0  ;;  %v4543_v9 = vpack.c.bf16 %v5442_v49, %v5445_v23  ;;  %v1161_v8 = vld [vmem:[#allocation3 + $0x660] sm:$0xff] }
 0x548   : > { %v5452_v0 = vadd.f32 %v1313_v18, %v5192_v3  ;;  %v1257_v60 = vadd.f32 %v3835_v7, %v1154_v28  ;;  %v1251_v13 = vpop.f32.mrb[37].mxu0 }
 0x549   : > { %v5455_v11 = vadd.f32 %v1312_v37, %v5194_v5  ;;  %v1252_v62 = vadd.f32 %v1251_v13, %v1153_v15  ;;  %4544 = vmatprep.subr.bf16.mxu1 %v4543_v9 }
 0x54a   : > { %v1315_v40 = vadd.f32 %v1257_v60, %v5392_v14  ;;  %4546 = vmatpush3.bf16.msra.mxu1 %v4543_v9  ;;  %v1164_v9 = vld [vmem:[#allocation3 + $0x678] sm:$0xff]  ;;  %v1163_v60 = vld [vmem:[#allocation3 + $0x670] sm:$0xff] }
 0x54b   : > { %v1314_v33 = vadd.f32 %v1252_v62, %v5395_v39  ;;  %v3838_v19 = vpop.f32.mrb[38].mxu0  ;;  %v4547_v44 = vpack.c.bf16 %v5452_v0, %v5455_v11 }
 0x54c   : > { %v5462_v3 = vadd.f32 %v1315_v40, %v5198_v10  ;;  %v1267_v54 = vadd.f32 %v3838_v19, %v1156_v45  ;;  %v1261_v22 = vpop.f32.mrb[39].mxu0 }
 0x54d   : > { %v5465_v5 = vadd.f32 %v1314_v33, %v5200_v12  ;;  %v1262_v32 = vadd.f32 %v1261_v22, %v1155_v50  ;;  %4548 = vmatprep.subr.bf16.mxu1 %v4547_v44  ;;  %v5537_v22 = vld [vmem:[#allocation3 + $0x138] sm:$0xff] }
 0x54e   : > { %v1317_v14 = vadd.f32 %v1267_v54, %v5400_v1  ;;  %4550 = vmatpush3.bf16.msra.mxu1 %v4547_v44  ;;  %v5531_v44 = vld [vmem:[#allocation3 + $0x128] sm:$0xff]  ;;  %v5534_v54 = vld [vmem:[#allocation3 + $0x130] sm:$0xff] }
 0x54f   : > { %v1316_v39 = vadd.f32 %v1262_v32, %v5403_v4  ;;  %v3841_v34 = vpop.f32.mrb[40].mxu0  ;;  %v4551_v24 = vpack.c.bf16 %v5462_v3, %v5465_v5  ;;  %v5540_v32 = vld [vmem:[#allocation3 + $0x140] sm:$0xff] }
 0x550   : > { %v5472_v10 = vadd.f32 %v1317_v14, %v5204_v17  ;;  %v1277_v21 = vadd.f32 %v3841_v34, %v1158_v25  ;;  %v1271_v61 = vpop.f32.mrb[41].mxu0  ;;  %v5543_v25 = vld [vmem:[#allocation3 + $0x148] sm:$0xff]  ;;  %v5546_v14 = vld [vmem:[#allocation3 + $0x150] sm:$0xff] }
 0x551   : > { %v5475_v12 = vadd.f32 %v1316_v39, %v5206_v20  ;;  %v1272_v16 = vadd.f32 %v1271_v61, %v1157_v31  ;;  %4552 = vmatprep.subr.bf16.mxu1 %v4551_v24  ;;  %v5549_v31 = vld [vmem:[#allocation3 + $0x158] sm:$0xff]  ;;  %v5552_v39 = vld [vmem:[#allocation3 + $0x160] sm:$0xff]  ;;  %v5555_v34 = vld [vmem:[#allocation3 + $0x168] sm:$0xff] }
 0x552   : > { %v1319_v1 = vadd.f32 %v1277_v21, %v5408_v42  ;;  %4554 = vmatpush3.bf16.msra.mxu1 %v4551_v24  ;;  %v5558_v24 = vld [vmem:[#allocation3 + $0x170] sm:$0xff]  ;;  %v5561_v21 = vld [vmem:[#allocation3 + $0x178] sm:$0xff] }
 0x553   : > { %v1318_v4 = vadd.f32 %v1272_v16, %v5411_v51  ;;  %v3844_v47 = vpop.f32.mrb[42].mxu0  ;;  %v4555_v52 = vpack.c.bf16 %v5472_v10, %v5475_v12 }
 0x554   : > { %v5482_v17 = vadd.f32 %v1319_v1, %v5210_v27  ;;  %v1287_v43 = vadd.f32 %v3844_v47, %v1160_v6  ;;  %v1281_v57 = vpop.f32.mrb[43].mxu0 }
 0x555   : > { %v5485_v20 = vadd.f32 %v1318_v4, %v5212_v30  ;;  %v1282_v35 = vadd.f32 %v1281_v57, %v1159_v59  ;;  %4556 = vmatprep.subr.bf16.mxu1 %v4555_v52 }
 0x556   : > { %v1321_v42 = vadd.f32 %v1287_v43, %v5416_v63  ;;  %4558 = vmatpush3.bf16.msra.mxu1 %v4555_v52 }
 0x557   : > { %v1320_v51 = vadd.f32 %v1282_v35, %v5419_v2  ;;  %v3847_v28 = vpop.f32.mrb[44].mxu0  ;;  %v4559_v18 = vpack.c.bf16 %v5482_v17, %v5485_v20 }
 0x558   : > { %v5492_v27 = vadd.f32 %v1321_v42, %v5216_v38  ;;  %v1297_v15 = vadd.f32 %v3847_v28, %v1162_v56  ;;  %v1291_v37 = vpop.f32.mrb[45].mxu0 }
 0x559   : > { %v5495_v30 = vadd.f32 %v1320_v51, %v5218_v41  ;;  %v1292_v7 = vadd.f32 %v1291_v37, %v1161_v8  ;;  %4560 = vmatprep.subr.bf16.mxu1 %v4559_v18 }
 0x55a   : > { %v1323_v63 = vadd.f32 %v1297_v15, %v5424_v36  ;;  %4562 = vmatpush3.bf16.msra.mxu1 %v4559_v18 }
 0x55b   : > { %v1322_v2 = vadd.f32 %v1292_v7, %v5427_v26  ;;  %v3850_v13 = vpop.f32.mrb[46].mxu0  ;;  %v4563_v62 = vpack.c.bf16 %v5492_v27, %v5495_v30 }
 0x55c   : > { %v5502_v38 = vadd.f32 %v1323_v63, %v5222_v46  ;;  %v1307_v45 = vadd.f32 %v3850_v13, %v1164_v9  ;;  %v1301_v40 = vpop.f32.mrb[47].mxu0 }
 0x55d   : > { %v5505_v41 = vadd.f32 %v1322_v2, %v5224_v48  ;;  %v1302_v50 = vadd.f32 %v1301_v40, %v1163_v60  ;;  %4564 = vmatprep.subr.bf16.mxu1 %v4563_v62 }
 0x55e   : > { %v1325_v36 = vadd.f32 %v1307_v45, %v5432_v29  ;;  %4566 = vmatpush3.bf16.msra.mxu1 %v4563_v62  ;;  %v5519_v29 = vld [vmem:[#allocation3 + $0x108] sm:$0xff] }
 0x55f   : > { %v1324_v33 = vadd.f32 %v1302_v50, %v5434_v58  ;;  %v4567_v26 = vpack.c.bf16 %v5502_v38, %v5505_v41  ;;  %v5522_v58 = vld [vmem:[#allocation3 + $0x110] sm:$0xff] }
 0x560   : > { %v5512_v19 = vadd.f32 %v1325_v36, %v5228_v53  ;;  %v5525_v53 = vld [vmem:[#allocation3 + $0x118] sm:$0xff] }
 0x561   : > { %v5515_v46 = vadd.f32 %v1324_v33, %v5230_v55  ;;  %4568 = vmatprep.subr.bf16.mxu1 %v4567_v26  ;;  %v5528_v55 = vld [vmem:[#allocation3 + $0x120] sm:$0xff] }
 0x562   : > { %4570 = vmatpush3.bf16.msra.mxu1 %v4567_v26 }
 0x563   : > { %v4571_v48 = vpack.c.bf16 %v5512_v19, %v5515_v46 }
 0x565   : > { %4572 = vmatprep.subr.bf16.mxu1 %v4571_v48 }
 0x566   : > { %4574 = vmatpush3.bf16.msra.mxu1 %v4571_v48 }
 0x569   : > { %3884 = vmatmul.mubr.f32.vlgmr.msra.gmra.mrb[32].mxu1 %v5519_v29 }
 0x56a   : > { %3886 = vmatprep.mubr.f32.mxu1 %v5522_v58 }
 0x56d   : > { %3887 = vmatmul.mubr.f32.gmra.mrb[34].mxu1 %v5525_v53 }
 0x56e   : > { %3889 = vmatprep.mubr.f32.mxu1 %v5528_v55 }
 0x571   : > { %3890 = vmatmul.mubr.f32.gmra.mrb[36].mxu1 %v5531_v44 }
 0x572   : > { %3892 = vmatprep.mubr.f32.mxu1 %v5534_v54 }
 0x575   : > { %3893 = vmatmul.mubr.f32.gmra.mrb[38].mxu1 %v5537_v22 }
 0x576   : > { %3895 = vmatprep.mubr.f32.mxu1 %v5540_v32 }
 0x579   : > { %3896 = vmatmul.mubr.f32.gmra.mrb[40].mxu1 %v5543_v25 }
 0x57a   : > { %3898 = vmatprep.mubr.f32.mxu1 %v5546_v14 }
 0x57d   : > { %3899 = vmatmul.mubr.f32.gmra.mrb[42].mxu1 %v5549_v31 }
 0x57e   : > { %3901 = vmatprep.mubr.f32.mxu1 %v5552_v39 }
 0x581   : > { %3902 = vmatmul.mubr.f32.gmra.mrb[44].mxu1 %v5555_v34 }
 0x582   : > { %3904 = vmatprep.mubr.f32.mxu1 %v5558_v24 }
 0x585   : > { %3905 = vmatmul.mubr.f32.gmra.mrb[46].mxu1 %v5561_v21 }
 0x63c   : > { %v3885_v61 = vpop.f32.mrb[32].mxu1 }
 0x63d   : > { %v5565_v16 = vsub.f32 %v5442_v49, %v3885_v61  ;;  %v1440_v6 = vpop.f32.mrb[33].mxu1 }
 0x63e   : > { %v5568_v1 = vsub.f32 %v5445_v23, %v1440_v6 }
 0x63f   : > { %v1536_v59 = vmul.f32 %v5565_v16, %v5565_v16 }
 0x640   : > { %v1535_v4 = vmul.f32 %v5568_v1, %v5568_v1  ;;  %v3888_v47 = vpop.f32.mrb[34].mxu1 }
 0x641   : > { %v5575_v52 = vsub.f32 %v5452_v0, %v3888_v47  ;;  %v1450_v43 = vpop.f32.mrb[35].mxu1 }
 0x642   : > { %v5578_v57 = vsub.f32 %v5455_v11, %v1450_v43  ;;  %v4575_v49 = vpack.c.bf16 %v1536_v59, %v1535_v4 }
 0x643   : > { %v1538_v35 = vmul.f32 %v5575_v52, %v5575_v52 }
 0x644   : > { %v1537_v23 = vmul.f32 %v5578_v57, %v5578_v57  ;;  %v3891_v56 = vpop.f32.mrb[36].mxu1  ;;  %4576 = vmatprep.subr.bf16.mxu0 %v4575_v49 }
 0x645   : > { %v5585_v42 = vsub.f32 %v5462_v3, %v3891_v56  ;;  %v1460_v8 = vpop.f32.mrb[37].mxu1  ;;  %4578 = vmatpush3.bf16.msra.mxu0 %v4575_v49  ;;  %v1343_v56 = vld [vmem:[#allocation3 + $0x488] sm:$0xff] }
 0x646   : > { %v5588_v0 = vsub.f32 %v5465_v5, %v1460_v8  ;;  %v4579_v51 = vpack.c.bf16 %v1538_v35, %v1537_v23 }
 0x647   : > { %v1540_v11 = vmul.f32 %v5585_v42, %v5585_v42 }
 0x648   : > { %v1539_v28 = vmul.f32 %v5588_v0, %v5588_v0  ;;  %v3894_v18 = vpop.f32.mrb[38].mxu1  ;;  %4580 = vmatprep.subr.bf16.mxu0 %v4579_v51 }
 0x649   : > { %v5595_v15 = vsub.f32 %v5472_v10, %v3894_v18  ;;  %v1470_v37 = vpop.f32.mrb[39].mxu1  ;;  %4582 = vmatpush3.bf16.msra.mxu0 %v4579_v51  ;;  %v1359_v18 = vld [vmem:[#allocation3 + $0x508] sm:$0xff] }
 0x64a   : > { %v5598_v3 = vsub.f32 %v5475_v12, %v1470_v37  ;;  %v4583_v7 = vpack.c.bf16 %v1540_v11, %v1539_v28  ;;  %v1342_v11 = vld [vmem:[#allocation3 + $0x480] sm:$0xff] }
 0x64b   : > { %v1542_v5 = vmul.f32 %v5595_v15, %v5595_v15 }
 0x64c   : > { %v1541_v9 = vmul.f32 %v5598_v3, %v5598_v3  ;;  %v3897_v63 = vpop.f32.mrb[40].mxu1  ;;  %4584 = vmatprep.subr.bf16.mxu0 %v4583_v7 }
 0x64d   : > { %v5605_v60 = vsub.f32 %v5482_v17, %v3897_v63  ;;  %v1480_v2 = vpop.f32.mrb[41].mxu1  ;;  %4586 = vmatpush3.bf16.msra.mxu0 %v4583_v7 }
 0x64e   : > { %v5608_v10 = vsub.f32 %v5485_v20, %v1480_v2  ;;  %v4587_v13 = vpack.c.bf16 %v1542_v5, %v1541_v9  ;;  %v1358_v5 = vld [vmem:[#allocation3 + $0x500] sm:$0xff] }
 0x64f   : > { %v1544_v12 = vmul.f32 %v5605_v60, %v5605_v60 }
 0x650   : > { %v1543_v62 = vmul.f32 %v5608_v10, %v5608_v10  ;;  %v3900_v45 = vpop.f32.mrb[42].mxu1  ;;  %4588 = vmatprep.subr.bf16.mxu0 %v4587_v13 }
 0x651   : > { %v5615_v40 = vsub.f32 %v5492_v27, %v3900_v45  ;;  %v1490_v50 = vpop.f32.mrb[43].mxu1  ;;  %4590 = vmatpush3.bf16.msra.mxu0 %v4587_v13 }
 0x652   : > { %v5618_v17 = vsub.f32 %v5495_v30, %v1490_v50  ;;  %v4591_v36 = vpack.c.bf16 %v1544_v12, %v1543_v62  ;;  %v1345_v62 = vld [vmem:[#allocation3 + $0x498] sm:$0xff] }
 0x653   : > { %v1546_v20 = vmul.f32 %v5615_v40, %v5615_v40 }
 0x654   : > { %v1545_v33 = vmul.f32 %v5618_v17, %v5618_v17  ;;  %v3903_v26 = vpop.f32.mrb[44].mxu1  ;;  %4592 = vmatprep.subr.bf16.mxu0 %v4591_v36 }
 0x655   : > { %v5625_v48 = vsub.f32 %v5502_v38, %v3903_v26  ;;  %v1500_v61 = vpop.f32.mrb[45].mxu1  ;;  %4594 = vmatpush3.bf16.msra.mxu0 %v4591_v36 }
 0x656   : > { %v5628_v27 = vsub.f32 %v5505_v41, %v1500_v61  ;;  %v4595_v6 = vpack.c.bf16 %v1546_v20, %v1545_v33  ;;  %v1344_v20 = vld [vmem:[#allocation3 + $0x490] sm:$0xff] }
 0x657   : > { %v1548_v30 = vmul.f32 %v5625_v48, %v5625_v48 }
 0x658   : > { %v1547_v59 = vmul.f32 %v5628_v27, %v5628_v27  ;;  %v3906_v4 = vpop.f32.mrb[46].mxu1  ;;  %4596 = vmatprep.subr.bf16.mxu0 %v4595_v6 }
 0x659   : > { %v5635_v47 = vsub.f32 %v5512_v19, %v3906_v4  ;;  %v1510_v43 = vpop.f32.mrb[47].mxu1  ;;  %4598 = vmatpush3.bf16.msra.mxu0 %v4595_v6  ;;  %v1776_v19 = vld [vmem:[#allocation3 + $0x280] sm:$0xff]  ;;  %v1360_v6 = vld [vmem:[#allocation3 + $0x510] sm:$0xff] }
 0x65a   : > { %v5638_v38 = vsub.f32 %v5515_v46, %v1510_v43  ;;  %v4599_v49 = vpack.c.bf16 %v1548_v30, %v1547_v59  ;;  %3995 = vmatprep.mubr.f32.mxu1 %v1776_v19 }
 0x65b   : > { %v1550_v41 = vmul.f32 %v5635_v47, %v5635_v47 }
 0x65c   : > { %v1549_v35 = vmul.f32 %v5638_v38, %v5638_v38  ;;  %4600 = vmatprep.subr.bf16.mxu0 %v4599_v49 }
 0x65d   : > { %4602 = vmatpush3.bf16.msra.mxu0 %v4599_v49 }
 0x65e   : > { %v4603_v23 = vpack.c.bf16 %v1550_v41, %v1549_v35  ;;  %v1347_v35 = vld [vmem:[#allocation3 + $0x4a8] sm:$0xff] }
 0x660   : > { %4604 = vmatprep.subr.bf16.mxu0 %v4603_v23 }
 0x661   : > { %4606 = vmatpush3.bf16.msra.mxu0 %v4603_v23 }
 0x664   : > { %3940 = vmatmul.mubr.f32.vlgmr.msra.gmra.mrb[48].mxu0 %v5519_v29 }
 0x665   : > { %3942 = vmatprep.mubr.f32.mxu0 %v5522_v58 }
 0x668   : > { %3943 = vmatmul.mubr.f32.gmra.mrb[50].mxu0 %v5525_v53 }
 0x669   : > { %3945 = vmatprep.mubr.f32.mxu0 %v5528_v55 }
 0x66c   : > { %3946 = vmatmul.mubr.f32.gmra.mrb[52].mxu0 %v5531_v44 }
 0x66d   : > { %3948 = vmatprep.mubr.f32.mxu0 %v5534_v54 }
 0x670   : > { %3949 = vmatmul.mubr.f32.gmra.mrb[54].mxu0 %v5537_v22 }
 0x671   : > { %3951 = vmatprep.mubr.f32.mxu0 %v5540_v32 }
 0x674   : > { %3952 = vmatmul.mubr.f32.gmra.mrb[56].mxu0 %v5543_v25 }
 0x675   : > { %3954 = vmatprep.mubr.f32.mxu0 %v5546_v14 }
 0x678   : > { %3955 = vmatmul.mubr.f32.gmra.mrb[58].mxu0 %v5549_v31 }
 0x679   : > { %3957 = vmatprep.mubr.f32.mxu0 %v5552_v39 }
 0x67c   : > { %3958 = vmatmul.mubr.f32.gmra.mrb[60].mxu0 %v5555_v34 }
 0x67d   : > { %3960 = vmatprep.mubr.f32.mxu0 %v5558_v24 }
 0x680   : > { %3961 = vmatmul.mubr.f32.gmra.mrb[62].mxu0 %v5561_v21 }
 0x737   : > { %v3941_v46 = vpop.f32.mrb[48].mxu0 }
 0x738   : > { %v1623_v29 = vadd.f32 1e-05, %v3941_v46  ;;  %v1617_v58 = vpop.f32.mrb[49].mxu0  ;;  %v1346_v46 = vld [vmem:[#allocation3 + $0x4a0] sm:$0xff] }
 0x739   : > { %v1618_v53 = vadd.f32 1e-05, %v1617_v58  ;;  %v1363_v58 = vld [vmem:[#allocation3 + $0x528] sm:$0xff] }
 0x73a   : > { %4899 = vrsqrt.f32 %v1623_v29 }
 0x73b   : > { %4901 = vrsqrt.f32 %v1618_v53  ;;  %v3944_v55 = vpop.f32.mrb[50].mxu0 }
 0x73c   : > { %v1633_v44 = vadd.f32 1e-05, %v3944_v55  ;;  %v1627_v54 = vpop.f32.mrb[51].mxu0 }
 0x73d   : > { %v1628_v22 = vadd.f32 1e-05, %v1627_v54 }
 0x73e   : > { %4903 = vrsqrt.f32 %v1633_v44  ;;  %v1362_v44 = vld [vmem:[#allocation3 + $0x520] sm:$0xff] }
 0x73f   : > { %4905 = vrsqrt.f32 %v1628_v22  ;;  %v3947_v32 = vpop.f32.mrb[52].mxu0 }
 0x740   : > { %v1643_v25 = vadd.f32 1e-05, %v3947_v32  ;;  %v1637_v14 = vpop.f32.mrb[53].mxu0 }
 0x741   : > { %v1638_v31 = vadd.f32 1e-05, %v1637_v14 }
 0x742   : > { %4907 = vrsqrt.f32 %v1643_v25 }
 0x743   : > { %4909 = vrsqrt.f32 %v1638_v31  ;;  %v3950_v39 = vpop.f32.mrb[54].mxu0 }
 0x744   : > { %v4900_v34 = vpop.eup %4899  ;;  %v1653_v24 = vadd.f32 1e-05, %v3950_v39  ;;  %v1647_v21 = vpop.f32.mrb[55].mxu0 }
 0x745   : > { %v4902_v8 = vpop.eup %4901  ;;  %v1648_v51 = vadd.f32 1e-05, %v1647_v21  ;;  %v1713_v28 = vmul.f32 %v4900_v34, %v5565_v16  ;;  %v1348_v21 = vld [vmem:[#allocation3 + $0x4b0] sm:$0xff] }
 0x746   : > { %4911 = vrsqrt.f32 %v1653_v24  ;;  %v1712_v37 = vmul.f32 %v4902_v8, %v5568_v1  ;;  %v1361_v1 = vld [vmem:[#allocation3 + $0x518] sm:$0xff] }
 0x747   : > { %4913 = vrsqrt.f32 %v1648_v51  ;;  %v3953_v7 = vpop.f32.mrb[56].mxu0  ;;  %v1729_v9 = vmul.f32 %v1713_v28, %v1343_v56  ;;  %v1365_v8 = vld [vmem:[#allocation3 + $0x538] sm:$0xff]  ;;  %v1364_v28 = vld [vmem:[#allocation3 + $0x530] sm:$0xff] }
 0x748   : > { %v4904_v63 = vpop.eup %4903  ;;  %v1663_v2 = vadd.f32 1e-05, %v3953_v7  ;;  %v1657_v13 = vpop.f32.mrb[57].mxu0  ;;  %v1728_v12 = vmul.f32 %v1712_v37, %v1342_v11 }
 0x749   : > { %v4906_v45 = vpop.eup %4905  ;;  %v1658_v50 = vadd.f32 1e-05, %v1657_v13  ;;  %v5661_v36 = vadd.f32 %v1729_v9, %v1359_v18  ;;  %v1715_v16 = vmul.f32 %v4904_v63, %v5575_v52 }
 0x74a   : > { %4915 = vrsqrt.f32 %v1663_v2  ;;  %v5664_v33 = vadd.f32 %v1728_v12, %v1358_v5  ;;  %v1714_v26 = vmul.f32 %v4906_v45, %v5578_v57 }
 0x74b   : > { %4917 = vrsqrt.f32 %v1658_v50  ;;  %v3956_v61 = vpop.f32.mrb[58].mxu0  ;;  %v1731_v30 = vmul.f32 %v1715_v16, %v1345_v62  ;;  %v1350_v62 = vld [vmem:[#allocation3 + $0x4c0] sm:$0xff]  ;;  %v1367_v50 = vld [vmem:[#allocation3 + $0x548] sm:$0xff] }
 0x74c   : > { %v4908_v59 = vpop.eup %4907  ;;  %v1673_v4 = vadd.f32 1e-05, %v3956_v61  ;;  %v1667_v43 = vpop.f32.mrb[59].mxu0  ;;  %v4607_v49 = vpack.c.bf16 %v5661_v36, %v5664_v33  ;;  %v1730_v41 = vmul.f32 %v1714_v26, %v1344_v20  ;;  %v1366_v16 = vld [vmem:[#allocation3 + $0x540] sm:$0xff] }
 0x74d   : > { %v4910_v23 = vpop.eup %4909  ;;  %v1668_v52 = vadd.f32 1e-05, %v1667_v43  ;;  %v5669_v19 = vadd.f32 %v1731_v30, %v1361_v1  ;;  %v1717_v29 = vmul.f32 %v4908_v59, %v5585_v42  ;;  %v1349_v42 = vld [vmem:[#allocation3 + $0x4b8] sm:$0xff] }
 0x74e   : > { %4919 = vrsqrt.f32 %v1673_v4  ;;  %4608 = vmatprep.subr.bf16.mxu1 %v4607_v49  ;;  %v5672_v57 = vadd.f32 %v1730_v41, %v1360_v6  ;;  %v1716_v53 = vmul.f32 %v4910_v23, %v5588_v0  ;;  %v1353_v30 = vld [vmem:[#allocation3 + $0x4d8] sm:$0xff] }
 0x74f   : > { %4921 = vrsqrt.f32 %v1668_v52  ;;  %v3959_v55 = vpop.f32.mrb[60].mxu0  ;;  %4610 = vmatpush3.bf16.msra.mxu1 %v4607_v49  ;;  %v1733_v54 = vmul.f32 %v1717_v29, %v1347_v35  ;;  %v1368_v35 = vld [vmem:[#allocation3 + $0x550] sm:$0xff] }
 0x750   : > { %v4912_v22 = vpop.eup %4911  ;;  %v1683_v32 = vadd.f32 1e-05, %v3959_v55  ;;  %v1677_v25 = vpop.f32.mrb[61].mxu0  ;;  %v4611_v14 = vpack.c.bf16 %v5669_v19, %v5672_v57  ;;  %v1732_v31 = vmul.f32 %v1716_v53, %v1346_v46 }
 0x751   : > { %v4914_v39 = vpop.eup %4913  ;;  %v1678_v34 = vadd.f32 1e-05, %v1677_v25  ;;  %v5677_v24 = vadd.f32 %v1733_v54, %v1363_v58  ;;  %v1719_v0 = vmul.f32 %v4912_v22, %v5595_v15  ;;  %v1351_v15 = vld [vmem:[#allocation3 + $0x4c8] sm:$0xff] }
 0x752   : > { %4923 = vrsqrt.f32 %v1683_v32  ;;  %4612 = vmatprep.subr.bf16.mxu1 %v4611_v14  ;;  %v5680_v56 = vadd.f32 %v1732_v31, %v1362_v44  ;;  %v1718_v51 = vmul.f32 %v4914_v39, %v5598_v3  ;;  %v1355_v58 = vld [vmem:[#allocation3 + $0x4e8] sm:$0xff]  ;;  %v1354_v44 = vld [vmem:[#allocation3 + $0x4e0] sm:$0xff]  ;;  %v1357_v39 = vld [vmem:[#allocation3 + $0x4f8] sm:$0xff] }
 0x753   : > { %4925 = vrsqrt.f32 %v1678_v34  ;;  %v3962_v11 = vpop.f32.mrb[62].mxu0  ;;  %4614 = vmatpush3.bf16.msra.mxu1 %v4611_v14  ;;  %v1735_v18 = vmul.f32 %v1719_v0, %v1349_v42  ;;  %v1371_v22 = vld [vmem:[#allocation3 + $0x568] sm:$0xff]  ;;  %v1370_v32 = vld [vmem:[#allocation3 + $0x560] sm:$0xff]  ;;  %v1356_v0 = vld [vmem:[#allocation3 + $0x4f0] sm:$0xff] }
 0x754   : > { %v4916_v37 = vpop.eup %4915  ;;  %v1693_v7 = vadd.f32 1e-05, %v3962_v11  ;;  %v1687_v5 = vpop.f32.mrb[63].mxu0  ;;  %v4615_v9 = vpack.c.bf16 %v5677_v24, %v5680_v56  ;;  %v1734_v63 = vmul.f32 %v1718_v51, %v1348_v21  ;;  %v1373_v51 = vld [vmem:[#allocation3 + $0x578] sm:$0xff]  ;;  %v1372_v11 = vld [vmem:[#allocation3 + $0x570] sm:$0xff] }
 0x755   : > { %v4918_v2 = vpop.eup %4917  ;;  %v1688_v13 = vadd.f32 1e-05, %v1687_v5  ;;  %v5685_v12 = vadd.f32 %v1735_v18, %v1365_v8  ;;  %v1721_v3 = vmul.f32 %v4916_v37, %v5605_v60  ;;  %v1352_v60 = vld [vmem:[#allocation3 + $0x4d0] sm:$0xff] }
 0x756   : > { %4927 = vrsqrt.f32 %v1693_v7  ;;  %4616 = vmatprep.subr.bf16.mxu1 %v4615_v9  ;;  %v5688_v45 = vadd.f32 %v1734_v63, %v1364_v28  ;;  %v1720_v20 = vmul.f32 %v4918_v2, %v5608_v10  ;;  %v1369_v10 = vld [vmem:[#allocation3 + $0x558] sm:$0xff]  ;;  %v1781_v2 = vld [vmem:[#allocation3 + $0x2a8] sm:$0xff] }
 0x757   : > { %4929 = vrsqrt.f32 %v1688_v13  ;;  %4618 = vmatpush3.bf16.msra.mxu1 %v4615_v9  ;;  %v1737_v1 = vmul.f32 %v1721_v3, %v1351_v15  ;;  %v1777_v9 = vld [vmem:[#allocation3 + $0x288] sm:$0xff]  ;;  %v1779_v63 = vld [vmem:[#allocation3 + $0x298] sm:$0xff]  ;;  %v1780_v15 = vld [vmem:[#allocation3 + $0x2a0] sm:$0xff] }
 0x758   : > { %v4920_v26 = vpop.eup %4919  ;;  %v4619_v61 = vpack.c.bf16 %v5685_v12, %v5688_v45  ;;  %v1736_v6 = vmul.f32 %v1720_v20, %v1350_v62  ;;  %v1782_v13 = vld [vmem:[#allocation3 + $0x2b0] sm:$0xff]  ;;  %v1783_v62 = vld [vmem:[#allocation3 + $0x2b8] sm:$0xff]  ;;  %v1784_v3 = vld [vmem:[#allocation3 + $0x2c0] sm:$0xff] }
 0x759   : > { %v4922_v59 = vpop.eup %4921  ;;  %v5693_v4 = vadd.f32 %v1737_v1, %v1367_v50  ;;  %v1723_v43 = vmul.f32 %v4920_v26, %v5615_v40  ;;  %v1785_v50 = vld [vmem:[#allocation3 + $0x2c8] sm:$0xff]  ;;  %v1786_v20 = vld [vmem:[#allocation3 + $0x2d0] sm:$0xff]  ;;  %v1788_v1 = vld [vmem:[#allocation3 + $0x2e0] sm:$0xff] }
 0x75a   : > { %4620 = vmatprep.subr.bf16.mxu1 %v4619_v61  ;;  %v5696_v49 = vadd.f32 %v1736_v6, %v1366_v16  ;;  %v1722_v41 = vmul.f32 %v4922_v59, %v5618_v17  ;;  %v1787_v16 = vld [vmem:[#allocation3 + $0x2d8] sm:$0xff]  ;;  %v1789_v26 = vld [vmem:[#allocation3 + $0x2e8] sm:$0xff] }
 0x75b   : > { %4622 = vmatpush3.bf16.msra.mxu1 %v4619_v61  ;;  %v1739_v23 = vmul.f32 %v1723_v43, %v1353_v30  ;;  %v1790_v61 = vld [vmem:[#allocation3 + $0x2f0] sm:$0xff]  ;;  %v1791_v6 = vld [vmem:[#allocation3 + $0x2f8] sm:$0xff]  ;;  %v1760_v30 = vld [vmem:[#allocation3 + $0x300] sm:$0xff] }
 0x75c   : > { %v4924_v52 = vpop.eup %4923  ;;  %v4623_v46 = vpack.c.bf16 %v5693_v4, %v5696_v49  ;;  %v1738_v29 = vmul.f32 %v1722_v41, %v1352_v60  ;;  %4051 = vmatprep.mubr.f32.mxu0 %v1760_v30  ;;  %v1793_v59 = vld [vmem:[#allocation3 + $0x688] sm:$0xff]  ;;  %v1792_v60 = vld [vmem:[#allocation3 + $0x680] sm:$0xff] }
 0x75d   : > { %v4926_v53 = vpop.eup %4925  ;;  %v5701_v55 = vadd.f32 %v1739_v23, %v1369_v10  ;;  %v1725_v40 = vmul.f32 %v4924_v52, %v5625_v48  ;;  %v1795_v23 = vld [vmem:[#allocation3 + $0x698] sm:$0xff] }
 0x75e   : > { %4624 = vmatprep.subr.bf16.mxu1 %v4623_v46  ;;  %v5704_v54 = vadd.f32 %v1738_v29, %v1368_v35  ;;  %v1724_v17 = vmul.f32 %v4926_v53, %v5628_v27 }
 0x75f   : > { %4626 = vmatpush3.bf16.msra.mxu1 %v4623_v46  ;;  %v1741_v25 = vmul.f32 %v1725_v40, %v1355_v58  ;;  %v1794_v46 = vld [vmem:[#allocation3 + $0x690] sm:$0xff] }
 0x760   : > { %v4928_v14 = vpop.eup %4927  ;;  %v4627_v31 = vpack.c.bf16 %v5701_v55, %v5704_v54  ;;  %v1740_v42 = vmul.f32 %v1724_v17, %v1354_v44 }
 0x761   : > { %v4930_v34 = vpop.eup %4929  ;;  %v5709_v21 = vadd.f32 %v1741_v25, %v1371_v22  ;;  %v1727_v48 = vmul.f32 %v4928_v14, %v5635_v47 }
 0x762   : > { %4628 = vmatprep.subr.bf16.mxu1 %v4627_v31  ;;  %v5712_v8 = vadd.f32 %v1740_v42, %v1370_v32  ;;  %v1726_v27 = vmul.f32 %v4930_v34, %v5638_v38  ;;  %v1778_v38 = vld [vmem:[#allocation3 + $0x290] sm:$0xff]  ;;  %v1797_v32 = vld [vmem:[#allocation3 + $0x6a8] sm:$0xff] }
 0x763   : > { %4630 = vmatpush3.bf16.msra.mxu1 %v4627_v31  ;;  %v1743_v28 = vmul.f32 %v1727_v48, %v1357_v39  ;;  %v1796_v31 = vld [vmem:[#allocation3 + $0x6a0] sm:$0xff] }
 0x764   : > { %v4631_v18 = vpack.c.bf16 %v5709_v21, %v5712_v8  ;;  %v1742_v37 = vmul.f32 %v1726_v27, %v1356_v0 }
 0x765   : > { %v5717_v7 = vadd.f32 %v1743_v28, %v1373_v51 }
 0x766   : > { %4632 = vmatprep.subr.bf16.mxu1 %v4631_v18  ;;  %v5719_v5 = vadd.f32 %v1742_v37, %v1372_v11  ;;  %v1799_v37 = vld [vmem:[#allocation3 + $0x6b8] sm:$0xff] }
 0x767   : > { %4634 = vmatpush3.bf16.msra.mxu1 %v4631_v18 }
 0x768   : > { %v4635_v47 = vpack.c.bf16 %v5717_v7, %v5719_v5 }
 0x76a   : > { %4636 = vmatprep.subr.bf16.mxu1 %v4635_v47 }
 0x76b   : > { %4638 = vmatpush3.bf16.msra.mxu1 %v4635_v47 }
 0x76e   : > { %3996 = vmatmul.mubr.f32.vlgmr.msra.gmra.mrb[48].mxu1 %v1777_v9 }
 0x76f   : > { %3998 = vmatprep.mubr.f32.mxu1 %v1778_v38 }
 0x772   : > { %3999 = vmatmul.mubr.f32.gmra.mrb[50].mxu1 %v1779_v63  ;;  %v1798_v63 = vld [vmem:[#allocation3 + $0x6b0] sm:$0xff] }
 0x773   : > { %4001 = vmatprep.mubr.f32.mxu1 %v1780_v15 }
 0x776   : > { %4002 = vmatmul.mubr.f32.gmra.mrb[52].mxu1 %v1781_v2 }
 0x777   : > { %4004 = vmatprep.mubr.f32.mxu1 %v1782_v13 }
 0x77a   : > { %4005 = vmatmul.mubr.f32.gmra.mrb[54].mxu1 %v1783_v62 }
 0x77b   : > { %4007 = vmatprep.mubr.f32.mxu1 %v1784_v3 }
 0x77e   : > { %4008 = vmatmul.mubr.f32.gmra.mrb[56].mxu1 %v1785_v50 }
 0x77f   : > { %4010 = vmatprep.mubr.f32.mxu1 %v1786_v20 }
 0x782   : > { %4011 = vmatmul.mubr.f32.gmra.mrb[58].mxu1 %v1787_v16 }
 0x783   : > { %4013 = vmatprep.mubr.f32.mxu1 %v1788_v1 }
 0x786   : > { %4014 = vmatmul.mubr.f32.gmra.mrb[60].mxu1 %v1789_v26 }
 0x787   : > { %4016 = vmatprep.mubr.f32.mxu1 %v1790_v61 }
 0x78a   : > { %4017 = vmatmul.mubr.f32.gmra.mrb[62].mxu1 %v1791_v6  ;;  %v1801_v6 = vld [vmem:[#allocation3 + $0x6c8] sm:$0xff] }
 0x841   : > { %v3997_v43 = vpop.f32.mrb[48].mxu1 }
 0x842   : > { %v1880_v10 = vadd.f32 %v3997_v43, %v1793_v59  ;;  %v1874_v41 = vpop.f32.mrb[49].mxu1 }
 0x843   : > { %v1875_v35 = vadd.f32 %v1874_v41, %v1792_v60 }
 0x844   : > { %v1954_v52 = vadd.f32 3.0, %v1880_v10 }
 0x845   : > { %v1953_v29 = vadd.f32 3.0, %v1875_v35  ;;  %v4000_v58 = vpop.f32.mrb[50].mxu1 }
 0x846   : > { %v1970_v53 = vmax.f32 %v1954_v52, 0.0  ;;  %v1890_v44 = vadd.f32 %v4000_v58, %v1795_v23  ;;  %v1884_v40 = vpop.f32.mrb[51].mxu1 }
 0x847   : > { %v1969_v22 = vmax.f32 %v1953_v29, 0.0  ;;  %v1885_v17 = vadd.f32 %v1884_v40, %v1794_v46 }
 0x848   : > { %v1986_v25 = vmin.f32 %v1970_v53, 6.0  ;;  %v1956_v14 = vadd.f32 3.0, %v1890_v44 }
 0x849   : > { %v1985_v42 = vmin.f32 %v1969_v22, 6.0  ;;  %v1955_v39 = vadd.f32 3.0, %v1885_v17  ;;  %v4003_v34 = vpop.f32.mrb[52].mxu1 }
 0x84a   : > { %v2002_v0 = vmul.f32 %v1986_v25, %v1880_v10  ;;  %v1972_v48 = vmax.f32 %v1956_v14, 0.0  ;;  %v1900_v51 = vadd.f32 %v4003_v34, %v1797_v32  ;;  %v1894_v27 = vpop.f32.mrb[53].mxu1  ;;  %v1800_v10 = vld [vmem:[#allocation3 + $0x6c0] sm:$0xff] }
 0x84b   : > { %v2001_v11 = vmul.f32 %v1985_v42, %v1875_v35  ;;  %v1971_v28 = vmax.f32 %v1955_v39, 0.0  ;;  %v1895_v18 = vadd.f32 %v1894_v27, %v1796_v31  ;;  %v1802_v42 = vld [vmem:[#allocation3 + $0x6d0] sm:$0xff] }
 0x84c   : > { %v2018_v47 = vmul.f32 0.16666667, %v2002_v0  ;;  %v1988_v9 = vmin.f32 %v1972_v48, 6.0  ;;  %v1958_v38 = vadd.f32 3.0, %v1900_v51 }
 0x84d   : > { %v2017_v15 = vmul.f32 0.16666667, %v2001_v11  ;;  %v1987_v2 = vmin.f32 %v1971_v28, 6.0  ;;  %v1957_v13 = vadd.f32 3.0, %v1895_v18  ;;  %v4006_v62 = vpop.f32.mrb[54].mxu1 }
 0x84e   : > { %v2004_v3 = vmul.f32 %v1988_v9, %v1890_v44  ;;  %v1974_v50 = vmax.f32 %v1958_v38, 0.0  ;;  %v1910_v20 = vadd.f32 %v4006_v62, %v1799_v37  ;;  %v1904_v16 = vpop.f32.mrb[55].mxu1  ;;  %v1805_v9 = vld [vmem:[#allocation3 + $0x6e8] sm:$0xff] }
 0x84f   : > { %v2003_v1 = vmul.f32 %v1987_v2, %v1885_v17  ;;  %v1973_v26 = vmax.f32 %v1957_v13, 0.0  ;;  %v1905_v61 = vadd.f32 %v1904_v16, %v1798_v63  ;;  %v4639_v30 = vpack.c.bf16 %v2018_v47, %v2017_v15  ;;  %v1803_v17 = vld [vmem:[#allocation3 + $0x6d8] sm:$0xff]  ;;  %v1804_v13 = vld [vmem:[#allocation3 + $0x6e0] sm:$0xff] }
 0x850   : > { %v2020_v59 = vmul.f32 0.16666667, %v2004_v3  ;;  %v1990_v60 = vmin.f32 %v1974_v50, 6.0  ;;  %v1960_v43 = vadd.f32 3.0, %v1910_v20 }
 0x851   : > { %v2019_v41 = vmul.f32 0.16666667, %v2003_v1  ;;  %v1989_v35 = vmin.f32 %v1973_v26, 6.0  ;;  %v1959_v23 = vadd.f32 3.0, %v1905_v61  ;;  %v4009_v52 = vpop.f32.mrb[56].mxu1  ;;  %4640 = vmatprep.subr.bf16.mxu0 %v4639_v30 }
 0x852   : > { %v2006_v46 = vmul.f32 %v1990_v60, %v1900_v51  ;;  %v1976_v29 = vmax.f32 %v1960_v43, 0.0  ;;  %v1920_v58 = vadd.f32 %v4009_v52, %v1801_v6  ;;  %v1914_v53 = vpop.f32.mrb[57].mxu1  ;;  %4642 = vmatpush3.bf16.msra.mxu0 %v4639_v30  ;;  %v1807_v60 = vld [vmem:[#allocation3 + $0x6f8] sm:$0xff] }
 0x853   : > { %v2005_v44 = vmul.f32 %v1989_v35, %v1895_v18  ;;  %v1975_v40 = vmax.f32 %v1959_v23, 0.0  ;;  %v1915_v22 = vadd.f32 %v1914_v53, %v1800_v10  ;;  %v4643_v32 = vpack.c.bf16 %v2020_v59, %v2019_v41  ;;  %v1806_v23 = vld [vmem:[#allocation3 + $0x6f0] sm:$0xff] }
 0x854   : > { %v2022_v25 = vmul.f32 0.16666667, %v2006_v46  ;;  %v1992_v14 = vmin.f32 %v1976_v29, 6.0  ;;  %v1962_v31 = vadd.f32 3.0, %v1920_v58 }
 0x855   : > { %v2021_v39 = vmul.f32 0.16666667, %v2005_v44  ;;  %v1991_v34 = vmin.f32 %v1975_v40, 6.0  ;;  %v1961_v0 = vadd.f32 3.0, %v1915_v22  ;;  %v4012_v48 = vpop.f32.mrb[58].mxu1  ;;  %4644 = vmatprep.subr.bf16.mxu0 %v4643_v32 }
 0x856   : > { %v2008_v27 = vmul.f32 %v1992_v14, %v1910_v20  ;;  %v1978_v51 = vmax.f32 %v1962_v31, 0.0  ;;  %v1930_v11 = vadd.f32 %v4012_v48, %v1803_v17  ;;  %v1924_v28 = vpop.f32.mrb[59].mxu1  ;;  %4646 = vmatpush3.bf16.msra.mxu0 %v4643_v32 }
 0x857   : > { %v2007_v37 = vmul.f32 %v1991_v34, %v1905_v61  ;;  %v1977_v18 = vmax.f32 %v1961_v0, 0.0  ;;  %v1925_v47 = vadd.f32 %v1924_v28, %v1802_v42  ;;  %v4647_v38 = vpack.c.bf16 %v2022_v25, %v2021_v39 }
 0x858   : > { %v2024_v63 = vmul.f32 0.16666667, %v2008_v27  ;;  %v1994_v15 = vmin.f32 %v1978_v51, 6.0  ;;  %v1964_v2 = vadd.f32 3.0, %v1930_v11 }
 0x859   : > { %v2023_v62 = vmul.f32 0.16666667, %v2007_v37  ;;  %v1993_v3 = vmin.f32 %v1977_v18, 6.0  ;;  %v1963_v50 = vadd.f32 3.0, %v1925_v47  ;;  %v4015_v16 = vpop.f32.mrb[60].mxu1  ;;  %4648 = vmatprep.subr.bf16.mxu0 %v4647_v38 }
 0x85a   : > { %v2010_v1 = vmul.f32 %v1994_v15, %v1920_v58  ;;  %v1980_v20 = vmax.f32 %v1964_v2, 0.0  ;;  %v1940_v26 = vadd.f32 %v4015_v16, %v1805_v9  ;;  %v1934_v6 = vpop.f32.mrb[61].mxu1  ;;  %4650 = vmatpush3.bf16.msra.mxu0 %v4647_v38  ;;  %v1762_v16 = vld [vmem:[#allocation3 + $0x310] sm:$0xff] }
 0x85b   : > { %v2009_v30 = vmul.f32 %v1993_v3, %v1915_v22  ;;  %v1979_v61 = vmax.f32 %v1963_v50, 0.0  ;;  %v1935_v59 = vadd.f32 %v1934_v6, %v1804_v13  ;;  %v4651_v43 = vpack.c.bf16 %v2024_v63, %v2023_v62  ;;  %v1761_v50 = vld [vmem:[#allocation3 + $0x308] sm:$0xff]  ;;  %v1766_v6 = vld [vmem:[#allocation3 + $0x330] sm:$0xff] }
 0x85c   : > { %v2026_v10 = vmul.f32 0.16666667, %v2010_v1  ;;  %v1996_v41 = vmin.f32 %v1980_v20, 6.0  ;;  %v1966_v35 = vadd.f32 3.0, %v1940_v26  ;;  %v1763_v1 = vld [vmem:[#allocation3 + $0x318] sm:$0xff]  ;;  %v1764_v20 = vld [vmem:[#allocation3 + $0x320] sm:$0xff] }
 0x85d   : > { %v2025_v52 = vmul.f32 0.16666667, %v2009_v30  ;;  %v1995_v46 = vmin.f32 %v1979_v61, 6.0  ;;  %v1965_v29 = vadd.f32 3.0, %v1935_v59  ;;  %v4018_v53 = vpop.f32.mrb[62].mxu1  ;;  %4652 = vmatprep.subr.bf16.mxu0 %v4651_v43  ;;  %v1767_v30 = vld [vmem:[#allocation3 + $0x338] sm:$0xff] }
 0x85e   : > { %v2012_v44 = vmul.f32 %v1996_v41, %v1930_v11  ;;  %v1982_v58 = vmax.f32 %v1966_v35, 0.0  ;;  %v1950_v40 = vadd.f32 %v4018_v53, %v1807_v60  ;;  %v1944_v17 = vpop.f32.mrb[63].mxu1  ;;  %4654 = vmatpush3.bf16.msra.mxu0 %v4651_v43  ;;  %v1768_v61 = vld [vmem:[#allocation3 + $0x340] sm:$0xff]  ;;  %v1770_v60 = vld [vmem:[#allocation3 + $0x350] sm:$0xff]  ;;  %v1771_v43 = vld [vmem:[#allocation3 + $0x358] sm:$0xff] }
 0x85f   : > { %v2011_v32 = vmul.f32 %v1995_v46, %v1925_v47  ;;  %v1981_v22 = vmax.f32 %v1965_v29, 0.0  ;;  %v1945_v25 = vadd.f32 %v1944_v17, %v1806_v23  ;;  %v4655_v14 = vpack.c.bf16 %v2026_v10, %v2025_v52  ;;  %v1772_v10 = vld [vmem:[#allocation3 + $0x360] sm:$0xff]  ;;  %v1773_v41 = vld [vmem:[#allocation3 + $0x368] sm:$0xff]  ;;  %v1774_v35 = vld [vmem:[#allocation3 + $0x370] sm:$0xff] }
 0x860   : > { %v2028_v31 = vmul.f32 0.16666667, %v2012_v44  ;;  %v1998_v42 = vmin.f32 %v1982_v58, 6.0  ;;  %v1968_v39 = vadd.f32 3.0, %v1950_v40  ;;  %v1775_v23 = vld [vmem:[#allocation3 + $0x378] sm:$0xff]  ;;  %v5016_v52 = vmov 0.0|0.0  }
 0x861   : > { %v2027_v34 = vmul.f32 0.16666667, %v2011_v32  ;;  %v1997_v0 = vmin.f32 %v1981_v22, 6.0  ;;  %v1967_v48 = vadd.f32 3.0, %v1945_v25  ;;  %4656 = vmatprep.subr.bf16.mxu0 %v4655_v14  ;;  %4671 = vmatprep.subr.bf16.mxu1 %v5016_v52  ;;  %v5986_v46 = vld [vmem:[#allocation6_spill] sm:$0xff]  ;;  %v5987_v29 = vld [vmem:[#allocation7_spill] sm:$0xff] }
 0x862   : > { %v2014_v27 = vmul.f32 %v1998_v42, %v1940_v26  ;;  %v1984_v51 = vmax.f32 %v1968_v39, 0.0  ;;  %4658 = vmatpush3.bf16.msra.mxu0 %v4655_v14  ;;  %v1765_v26 = vld [vmem:[#allocation3 + $0x328] sm:$0xff]  ;;  %v5988_v53 = vld [vmem:[#allocation8_spill] sm:$0xff]  ;;  %v5990_v58 = vld [vmem:[#allocation10_spill] sm:$0xff] }
 0x863   : > { %v2013_v28 = vmul.f32 %v1997_v0, %v1935_v59  ;;  %v1983_v11 = vmax.f32 %v1967_v48, 0.0  ;;  %v4659_v37 = vpack.c.bf16 %v2028_v31, %v2027_v34  ;;  %v1769_v59 = vld [vmem:[#allocation3 + $0x348] sm:$0xff]  ;;  %v5992_v17 = vld [vmem:[#allocation12_spill] sm:$0xff]  ;;  %v2228_v31 = vld [vmem:[#allocation3 + $0x790] sm:$0xff] }
 0x864   : > { %v2030_v18 = vmul.f32 0.16666667, %v2014_v27  ;;  %v2000_v9 = vmin.f32 %v1984_v51, 6.0  ;;  %v5989_v44 = vld [vmem:[#allocation9_spill] sm:$0xff]  ;;  %v2226_v22 = vld [vmem:[#allocation3 + $0x780] sm:$0xff]  ;;  %v2229_v42 = vld [vmem:[#allocation3 + $0x798] sm:$0xff] }
 0x865   : > { %v2029_v38 = vmul.f32 0.16666667, %v2013_v28  ;;  %v1999_v47 = vmin.f32 %v1983_v11, 6.0  ;;  %4660 = vmatprep.subr.bf16.mxu0 %v4659_v37  ;;  %v5993_v32 = vld [vmem:[#allocation13_spill] sm:$0xff]  ;;  %v2230_v39 = vld [vmem:[#allocation3 + $0x7a0] sm:$0xff]  ;;  %v2426_v34 = vld [vmem:[#allocation3 + $0x7d8] sm:$0xff] }
 0x866   : > { %v2016_v63 = vmul.f32 %v2000_v9, %v1950_v40  ;;  %4662 = vmatpush3.bf16.msra.mxu0 %v4659_v37  ;;  %v5991_v40 = vld [vmem:[#allocation11_spill] sm:$0xff]  ;;  %v2227_v14 = vld [vmem:[#allocation3 + $0x788] sm:$0xff]  ;;  %v2427_v0 = vld [vmem:[#allocation3 + $0x7e0] sm:$0xff] }
 0x867   : > { %v2015_v15 = vmul.f32 %v1999_v47, %v1945_v25  ;;  %v4663_v2 = vpack.c.bf16 %v2030_v18, %v2029_v38  ;;  %v5018_v25 = vmov 0.0   ;;  %v5753_v48 = vpack.c.bf16 %v2427_v0, %v2426_v34  ;;  %v2428_v27 = vld [vmem:[#allocation3 + $0x7e8] sm:$0xff]  ;;  %v2429_v51 = vld [vmem:[#allocation3 + $0x7f0] sm:$0xff]  ;;  %v2430_v11 = vld [vmem:[#allocation3 + $0x7f8] sm:$0xff] }
 0x868   : > { %v2032_v13 = vmul.f32 0.16666667, %v2016_v63  ;;  %4107 = vmatprep.mubr.msk.f32.mxu1 %vm5017_vm0, %v5018_v25  ;;  %v5759_v28 = vpack.c.bf16 %v2429_v51, %v2428_v27  ;;  %v2431_v37 = vld [vmem:[#allocation3 + $0x800] sm:$0xff]  ;;  %v2432_v9 = vld [vmem:[#allocation3 + $0x808] sm:$0xff]  ;;  %v2433_v38 = vld [vmem:[#allocation3 + $0x810] sm:$0xff] }
 0x869   : > { %v2031_v62 = vmul.f32 0.16666667, %v2015_v15  ;;  %4664 = vmatprep.subr.bf16.mxu0 %v4663_v2  ;;  %v5763_v18 = vpack.c.bf16 %v2431_v37, %v2430_v11  ;;  %v5767_v47 = vpack.c.bf16 %v2433_v38, %v2432_v9  ;;  %v2434_v63 = vld [vmem:[#allocation3 + $0x818] sm:$0xff]  ;;  %v2435_v15 = vld [vmem:[#allocation3 + $0x820] sm:$0xff]  ;;  %v2039_v11 = vld [vmem:[#allocation3 + $0x730] sm:$0xff]  ;;  %v2201_v38 = vmul.f32 2.0, %v5685_v12 }
 0x86a   : > { %4666 = vmatpush3.bf16.msra.mxu0 %v4663_v2  ;;  %v5771_v2 = vpack.c.bf16 %v2435_v15, %v2434_v63  ;;  %v2040_v27 = vld [vmem:[#allocation3 + $0x738] sm:$0xff] }
 0x86b   : > { %v4667_v3 = vpack.c.bf16 %v2032_v13, %v2031_v62  ;;  %v2436_v13 = vld [vmem:[#allocation3 + $0x828] sm:$0xff]  ;;  %v2437_v62 = vld [vmem:[#allocation3 + $0x830] sm:$0xff] }
 0x86d   : > { %4668 = vmatprep.subr.bf16.mxu0 %v4667_v3 }
 0x86e   : > { %4670 = vmatpush3.bf16.msra.mxu0 %v4667_v3  ;;  %v5775_v3 = vpack.c.bf16 %v2437_v62, %v2436_v13  ;;  %v2200_v13 = vmul.f32 2.0, %v5688_v45  ;;  %v2042_v62 = vld [vmem:[#allocation3 + $0x748] sm:$0xff] }
 0x86f   : > { %4695 = vmatprep.subr.bf16.mxu0 %v5016_v52 }
 0x871   : > { %4052 = vmatmul.mubr.f32.vlgmr.msra.gmra.mrb[64].mxu0 %v1761_v50  ;;  %v2438_v50 = vld [vmem:[#allocation3 + $0x838] sm:$0xff] }
 0x872   : > { %4054 = vmatprep.mubr.f32.mxu0 %v1762_v16  ;;  %4697 = vmatpush3.bf16.msra.mxu0 %v5986_v46  ;;  %v2439_v16 = vld [vmem:[#allocation3 + $0x840] sm:$0xff] }
 0x873   : > { %4698 = vmatprep.subr.bf16.mxu0 %v5016_v52 }
 0x875   : > { %4055 = vmatmul.mubr.f32.gmra.mrb[66].mxu0 %v1763_v1  ;;  %v5779_v1 = vpack.c.bf16 %v2439_v16, %v2438_v50  ;;  %v2041_v16 = vld [vmem:[#allocation3 + $0x740] sm:$0xff] }
 0x876   : > { %4057 = vmatprep.mubr.f32.mxu0 %v1764_v20  ;;  %4700 = vmatpush3.bf16.msra.mxu0 %v5987_v29  ;;  %v2034_v20 = vld [vmem:[#allocation3 + $0x708] sm:$0xff] }
 0x877   : > { %4701 = vmatprep.subr.bf16.mxu0 %v5016_v52 }
 0x879   : > { %4058 = vmatmul.mubr.f32.gmra.mrb[68].mxu0 %v1765_v26  ;;  %v2033_v26 = vld [vmem:[#allocation3 + $0x700] sm:$0xff] }
 0x87a   : > { %4060 = vmatprep.mubr.f32.mxu0 %v1766_v6  ;;  %4703 = vmatpush3.bf16.msra.mxu0 %v5988_v53  ;;  %v2197_v53 = vmul.f32 2.0, %v5669_v19  ;;  %v2198_v19 = vmul.f32 2.0, %v5680_v56 }
 0x87b   : > { %4704 = vmatprep.subr.bf16.mxu0 %v5016_v52 }
 0x87d   : > { %4061 = vmatmul.mubr.f32.gmra.mrb[70].mxu0 %v1767_v30 }
 0x87e   : > { %4063 = vmatprep.mubr.f32.mxu0 %v1768_v61  ;;  %4706 = vmatpush3.bf16.msra.mxu0 %v5989_v44  ;;  %v2195_v61 = vmul.f32 2.0, %v5661_v36  ;;  %v2037_v36 = vld [vmem:[#allocation3 + $0x720] sm:$0xff] }
 0x87f   : > { %4707 = vmatprep.subr.bf16.mxu0 %v5016_v52 }
 0x881   : > { %4064 = vmatmul.mubr.f32.gmra.mrb[72].mxu0 %v1769_v59 }
 0x882   : > { %4066 = vmatprep.mubr.f32.mxu0 %v1770_v60  ;;  %4709 = vmatpush3.bf16.msra.mxu0 %v5990_v58 }
 0x883   : > { %4710 = vmatprep.subr.bf16.mxu0 %v5016_v52 }
 0x885   : > { %4067 = vmatmul.mubr.f32.gmra.mrb[74].mxu0 %v1771_v43  ;;  %v2194_v43 = vmul.f32 2.0, %v5664_v33 }
 0x886   : > { %4069 = vmatprep.mubr.f32.mxu0 %v1772_v10  ;;  %4712 = vmatpush3.bf16.msra.mxu0 %v5991_v40  ;;  %v2036_v10 = vld [vmem:[#allocation3 + $0x718] sm:$0xff] }
 0x887   : > { %4713 = vmatprep.subr.bf16.mxu0 %v5016_v52 }
 0x889   : > { %4070 = vmatmul.mubr.f32.gmra.mrb[76].mxu0 %v1773_v41 }
 0x88a   : > { %4072 = vmatprep.mubr.f32.mxu0 %v1774_v35  ;;  %4715 = vmatpush3.bf16.msra.mxu0 %v5992_v17  ;;  %v2035_v35 = vld [vmem:[#allocation3 + $0x710] sm:$0xff]  ;;  %v2196_v17 = vmul.f32 2.0, %v5672_v57 }
 0x88b   : > { %4716 = vmatprep.subr.bf16.mxu0 %v5016_v52 }
 0x88d   : > { %4073 = vmatmul.mubr.f32.gmra.mrb[78].mxu0 %v1775_v23 }
 0x88e   : > { %4718 = vmatpush3.bf16.msra.mxu0 %v5993_v32  ;;  %4154 = vmatprep.mubr.msk.f32.mxu0 %vm5017_vm0, %v5018_v25  ;;  %v2038_v32 = vld [vmem:[#allocation3 + $0x728] sm:$0xff] }
 0x88f   : > { %4743 = vmatprep.subr.bf16.mxu0 %v5016_v52 }
 0x891   : > { %4155 = vmatmul.mubr.f32.vlgmr.msra.gmra.mrb[80].mxu0 %v2226_v22 }
 0x892   : > { %4157 = vmatprep.mubr.msk.f32.mxu0 %vm5017_vm0, %v5018_v25  ;;  %4745 = vmatpush3.bf16.msra.mxu0 %v5753_v48 }
 0x893   : > { %4746 = vmatprep.subr.bf16.mxu0 %v5016_v52 }
 0x895   : > { %4158 = vmatmul.mubr.f32.gmra.mrb[82].mxu0 %v2227_v14 }
 0x896   : > { %4160 = vmatprep.mubr.msk.f32.mxu0 %vm5017_vm0, %v5018_v25  ;;  %4748 = vmatpush3.bf16.msra.mxu0 %v5759_v28 }
 0x897   : > { %4749 = vmatprep.subr.bf16.mxu0 %v5016_v52 }
 0x899   : > { %4161 = vmatmul.mubr.f32.gmra.mrb[84].mxu0 %v2228_v31 }
 0x89a   : > { %4163 = vmatprep.mubr.msk.f32.mxu0 %vm5017_vm0, %v5018_v25  ;;  %4751 = vmatpush3.bf16.msra.mxu0 %v5763_v18 }
 0x89b   : > { %4752 = vmatprep.subr.bf16.mxu0 %v5016_v52 }
 0x89d   : > { %4164 = vmatmul.mubr.f32.gmra.mrb[86].mxu0 %v2229_v42  ;;  %v2199_v42 = vmul.f32 2.0, %v5677_v24 }
 0x89e   : > { %4166 = vmatprep.mubr.msk.f32.mxu0 %vm5017_vm0, %v5018_v25  ;;  %4754 = vmatpush3.bf16.msra.mxu0 %v5767_v47 }
 0x89f   : > { %4755 = vmatprep.subr.bf16.mxu0 %v5016_v52 }
 0x8a1   : > { %4167 = vmatmul.mubr.f32.gmra.mrb[88].mxu0 %v2230_v39 }
 0x8a2   : > { %4248 = vmatprep.mubr.msk.f32.mxu0 %vm5017_vm0, %v5018_v25  ;;  %4757 = vmatpush3.bf16.msra.mxu0 %v5771_v2 }
 0x8a3   : > { %4758 = vmatprep.subr.bf16.mxu0 %v5016_v52 }
 0x8a6   : > { %4760 = vmatpush3.bf16.msra.mxu0 %v5775_v3 }
 0x8a7   : > { %4761 = vmatprep.subr.bf16.mxu0 %v5016_v52 }
 0x8aa   : > { %4763 = vmatpush3.bf16.msra.mxu0 %v5779_v1 }
 0x8ab   : > { %4764 = vmatprep.subr.bf16.mxu0 %v5016_v52 }
 0x944   : > { %v4053_v6 = vpop.f32.mrb[64].mxu0 }
 0x945   : > { %v2121_v30 = vadd.f32 %v4053_v6, %v2034_v20  ;;  %v2115_v59 = vpop.f32.mrb[65].mxu0  ;;  %v2203_v6 = vmul.f32 2.0, %v5693_v4 }
 0x946   : > { %v2116_v60 = vadd.f32 %v2115_v59, %v2033_v26  ;;  %v2202_v59 = vmul.f32 2.0, %v5696_v49 }
 0x947   : > { %v2211_v41 = vadd.f32 %v2195_v61, %v2121_v30 }
 0x948   : > { %v2210_v23 = vadd.f32 %v2194_v43, %v2116_v60  ;;  %v4056_v46 = vpop.f32.mrb[66].mxu0  ;;  %v2044_v60 = vld [vmem:[#allocation3 + $0x758] sm:$0xff] }
 0x949   : > { %v2131_v29 = vadd.f32 %v4056_v46, %v2036_v10  ;;  %v2125_v44 = vpop.f32.mrb[67].mxu0  ;;  %v2043_v10 = vld [vmem:[#allocation3 + $0x750] sm:$0xff] }
 0x94a   : > { %v4672_v58 = vpack.c.bf16 %v2211_v41, %v2210_v23  ;;  %v2126_v40 = vadd.f32 %v2125_v44, %v2035_v35  ;;  %v2205_v23 = vmul.f32 2.0, %v5701_v55  ;;  %v2046_v44 = vld [vmem:[#allocation3 + $0x768] sm:$0xff] }
 0x94b   : > { %v2213_v22 = vadd.f32 %v2197_v53, %v2131_v29  ;;  %v2204_v53 = vmul.f32 2.0, %v5704_v54 }
 0x94c   : > { %v2212_v14 = vadd.f32 %v2196_v17, %v2126_v40  ;;  %v4059_v31 = vpop.f32.mrb[68].mxu0  ;;  %4673 = vmatpush3.bf16.msra.mxu1 %v4672_v58  ;;  %v2045_v40 = vld [vmem:[#allocation3 + $0x760] sm:$0xff] }
 0x94d   : > { %v2141_v33 = vadd.f32 %v4059_v31, %v2038_v32  ;;  %v2135_v39 = vpop.f32.mrb[69].mxu0  ;;  %4674 = vmatprep.subr.bf16.mxu1 %v5016_v52  ;;  %v2206_v31 = vmul.f32 2.0, %v5712_v8 }
 0x94e   : > { %v4675_v34 = vpack.c.bf16 %v2213_v22, %v2212_v14  ;;  %v2136_v0 = vadd.f32 %v2135_v39, %v2037_v36  ;;  %v2207_v22 = vmul.f32 2.0, %v5709_v21  ;;  %v2047_v39 = vld [vmem:[#allocation3 + $0x770] sm:$0xff] }
 0x94f   : > { %v2215_v51 = vadd.f32 %v2199_v42, %v2141_v33  ;;  %v2048_v33 = vld [vmem:[#allocation3 + $0x778] sm:$0xff] }
 0x950   : > { %v2214_v57 = vadd.f32 %v2198_v19, %v2136_v0  ;;  %v4062_v37 = vpop.f32.mrb[70].mxu0  ;;  %4676 = vmatpush3.bf16.msra.mxu1 %v4675_v34  ;;  %v2209_v19 = vmul.f32 2.0, %v5717_v7  ;;  %v2232_v7 = vld [vmem:[#allocation3 + $0x7b0] sm:$0xff] }
 0x951   : > { %v2151_v9 = vadd.f32 %v4062_v37, %v2040_v27  ;;  %v2145_v63 = vpop.f32.mrb[71].mxu0  ;;  %4677 = vmatprep.subr.bf16.mxu1 %v5016_v52 }
 0x952   : > { %v4678_v24 = vpack.c.bf16 %v2215_v51, %v2214_v57  ;;  %v2146_v15 = vadd.f32 %v2145_v63, %v2039_v11  ;;  %v2208_v11 = vmul.f32 2.0, %v5719_v5  ;;  %v2233_v5 = vld [vmem:[#allocation3 + $0x7b8] sm:$0xff] }
 0x953   : > { %v2217_v50 = vadd.f32 %v2201_v38, %v2151_v9  ;;  %v2231_v9 = vld [vmem:[#allocation3 + $0x7a8] sm:$0xff]  ;;  %v2234_v38 = vld [vmem:[#allocation3 + $0x7c0] sm:$0xff] }
 0x954   : > { %v2216_v56 = vadd.f32 %v2200_v13, %v2146_v15  ;;  %v4065_v20 = vpop.f32.mrb[72].mxu0  ;;  %4679 = vmatpush3.bf16.msra.mxu1 %v4678_v24 }
 0x955   : > { %v2161_v26 = vadd.f32 %v4065_v20, %v2042_v62  ;;  %v2155_v30 = vpop.f32.mrb[73].mxu0  ;;  %4680 = vmatprep.subr.bf16.mxu1 %v5016_v52  ;;  %v3136_v20 = vld [vmem:[#allocation3 + $0x7d0] ss:$0 sm:$0xff] }
 0x956   : > { %v4681_v12 = vpack.c.bf16 %v2217_v50, %v2216_v56  ;;  %v2156_v61 = vadd.f32 %v2155_v30, %v2041_v16 }
 0x957   : > { %v2219_v43 = vadd.f32 %v2203_v6, %v2161_v26 }
 0x958   : > { %v2218_v45 = vadd.f32 %v2202_v59, %v2156_v61  ;;  %v4068_v41 = vpop.f32.mrb[74].mxu0  ;;  %4682 = vmatpush3.bf16.msra.mxu1 %v4681_v12 }
 0x959   : > { %v2171_v35 = vadd.f32 %v4068_v41, %v2044_v60  ;;  %v2165_v46 = vpop.f32.mrb[75].mxu0  ;;  %4683 = vmatprep.subr.bf16.mxu1 %v5016_v52 }
 0x95a   : > { %v4684_v4 = vpack.c.bf16 %v2219_v43, %v2218_v45  ;;  %v2166_v29 = vadd.f32 %v2165_v46, %v2043_v10 }
 0x95b   : > { %v2221_v58 = vadd.f32 %v2205_v23, %v2171_v35 }
 0x95c   : > { %v2220_v49 = vadd.f32 %v2204_v53, %v2166_v29  ;;  %v4071_v17 = vpop.f32.mrb[76].mxu0  ;;  %4685 = vmatpush3.bf16.msra.mxu1 %v4684_v4 }
 0x95d   : > { %v2181_v32 = vadd.f32 %v4071_v17, %v2046_v44  ;;  %v2175_v36 = vpop.f32.mrb[77].mxu0  ;;  %4686 = vmatprep.subr.bf16.mxu1 %v5016_v52  ;;  %v2664_v17 = vld [vmem:[#allocation3 + $0x878] sm:$0xff] }
 0x95e   : > { %v4687_v55 = vpack.c.bf16 %v2221_v58, %v2220_v49  ;;  %v2176_v14 = vadd.f32 %v2175_v36, %v2045_v40  ;;  %v2662_v40 = vld [vmem:[#allocation3 + $0x868] sm:$0xff]  ;;  %v2663_v49 = vld [vmem:[#allocation3 + $0x870] sm:$0xff] }
 0x95f   : > { %v2223_v42 = vadd.f32 %v2207_v22, %v2181_v32  ;;  %v4768_v32 = vpack.c.bf16 %v2663_v49, %v2662_v40  ;;  %v2665_v22 = vld [vmem:[#allocation3 + $0x880] sm:$0xff]  ;;  %v2807_v40 = vld [vmem:[#allocation3 + $0x938] sm:$0xff] }
 0x960   : > { %v2222_v54 = vadd.f32 %v2206_v31, %v2176_v14  ;;  %v4074_v34 = vpop.f32.mrb[78].mxu0  ;;  %4688 = vmatpush3.bf16.msra.mxu1 %v4687_v55  ;;  %v4771_v36 = vpack.c.bf16 %v2665_v22, %v2664_v17  ;;  %v2666_v55 = vld [vmem:[#allocation3 + $0x888] sm:$0xff]  ;;  %v2667_v14 = vld [vmem:[#allocation3 + $0x890] sm:$0xff] }
 0x961   : > { %v2191_v0 = vadd.f32 %v4074_v34, %v2048_v33  ;;  %v2185_v27 = vpop.f32.mrb[79].mxu0  ;;  %4689 = vmatprep.subr.bf16.mxu1 %v5016_v52  ;;  %v4774_v31 = vpack.c.bf16 %v2667_v14, %v2666_v55 }
 0x962   : > { %v4690_v21 = vpack.c.bf16 %v2223_v42, %v2222_v54  ;;  %v2186_v51 = vadd.f32 %v2185_v27, %v2047_v39 }
 0x963   : > { %v2225_v57 = vadd.f32 %v2209_v19, %v2191_v0 }
 0x964   : > { %v2224_v37 = vadd.f32 %v2208_v11, %v2186_v51  ;;  %4691 = vmatpush3.bf16.msra.mxu1 %v4690_v21 }
 0x965   : > { %4692 = vmatprep.subr.bf16.mxu1 %v5016_v52 }
 0x966   : > { %v4693_v8 = vpack.c.bf16 %v2225_v57, %v2224_v37 }
 0x968   : > { %4694 = vmatpush3.bf16.msra.mxu1 %v4693_v8 }
 0x969   : > { %4719 = vmatprep.subr.bf16.mxu1 %v5016_v52 }
 0x96b   : > { %4108 = vmatmul.mubr.f32.vlgmr.msra.gmra.mrb[64].mxu1 %v2231_v9 }
 0x96c   : > { %4110 = vmatprep.mubr.msk.f32.mxu1 %vm5017_vm0, %v5018_v25  ;;  %4721 = vmatpush3.bf16.msra.mxu1 %v5753_v48  ;;  %v2235_v48 = vld [vmem:[#allocation3 + $0x7c8] sm:$0xff] }
 0x96d   : > { %4722 = vmatprep.subr.bf16.mxu1 %v5016_v52 }
 0x96f   : > { %4111 = vmatmul.mubr.f32.gmra.mrb[66].mxu1 %v2232_v7 }
 0x970   : > { %4113 = vmatprep.mubr.msk.f32.mxu1 %vm5017_vm0, %v5018_v25  ;;  %4724 = vmatpush3.bf16.msra.mxu1 %v5759_v28  ;;  %v2392_v28 = vpop.f32.mrb[80].mxu0 }
 0x971   : > { %4725 = vmatprep.subr.bf16.mxu1 %v5016_v52  ;;  %v4156_v63 = vpop.f32.mrb[81].mxu0 }
 0x973   : > { %4114 = vmatmul.mubr.f32.gmra.mrb[68].mxu1 %v2233_v5 }
 0x974   : > { %4116 = vmatprep.mubr.msk.f32.mxu1 %vm5017_vm0, %v5018_v25  ;;  %4727 = vmatpush3.bf16.msra.mxu1 %v5763_v18  ;;  %v2440_v18 = vld [vmem:[#allocation3 + $0x848] sm:$0xff] }
 0x975   : > { %4728 = vmatprep.subr.bf16.mxu1 %v5016_v52 }
 0x977   : > { %4117 = vmatmul.mubr.f32.gmra.mrb[70].mxu1 %v2234_v38 }
 0x978   : > { %4119 = vmatprep.mubr.msk.f32.mxu1 %vm5017_vm0, %v5018_v25  ;;  %4730 = vmatpush3.bf16.msra.mxu1 %v5767_v47  ;;  %v2441_v47 = vld [vmem:[#allocation3 + $0x850] sm:$0xff] }
 0x979   : > { %4731 = vmatprep.subr.bf16.mxu1 %v5016_v52  ;;  %v4741_v24 = vpack.c.bf16 %v2441_v47, %v2440_v18  ;;  %v2668_v18 = vld [vmem:[#allocation3 + $0x898] sm:$0xff]  ;;  %v2669_v47 = vld [vmem:[#allocation3 + $0x8a0] sm:$0xff] }
 0x97a   : > { %v4777_v63 = vpack.c.bf16 %v2669_v47, %v2668_v18 }
 0x97b   : > { %4120 = vmatmul.mubr.f32.gmra.mrb[72].mxu1 %v2235_v48  ;;  %4766 = vmatpush3.bf16.msra.mxu0 %v4741_v24 }
 0x97c   : > { %4733 = vmatpush3.bf16.msra.mxu1 %v5771_v2  ;;  %4201 = vmatprep.mubr.msk.f32.mxu1 %vm5017_vm0, %v5018_v25  ;;  %v2397_v2 = vpop.f32.mrb[82].mxu0 }
 0x97d   : > { %4734 = vmatprep.subr.bf16.mxu1 %v5016_v52  ;;  %4791 = vmatprep.subr.bf16.mxu0 %v5016_v52  ;;  %v4159_v15 = vpop.f32.mrb[83].mxu0 }
 0x980   : > { %4736 = vmatpush3.bf16.msra.mxu1 %v5775_v3  ;;  %v2402_v3 = vpop.f32.mrb[84].mxu0 }
 0x981   : > { %4737 = vmatprep.subr.bf16.mxu1 %v5016_v52  ;;  %v4162_v13 = vpop.f32.mrb[85].mxu0 }
 0x982   : > { %v2407_v62 = vpop.f32.mrb[86].mxu0  ;;  %v2673_v13 = vld [vmem:[#allocation3 + $0x8c0] sm:$0xff] }
 0x983   : > { %v4165_v50 = vpop.f32.mrb[87].mxu0 }
 0x984   : > { %4739 = vmatpush3.bf16.msra.mxu1 %v5779_v1  ;;  %v2412_v1 = vpop.f32.mrb[88].mxu0  ;;  %v2674_v50 = vld [vmem:[#allocation3 + $0x8c8] sm:$0xff] }
 0x985   : > { %4740 = vmatprep.subr.bf16.mxu1 %v5016_v52  ;;  %v4168_v16 = vpop.f32.mrb[89].mxu0 }
 0x988   : > { %4742 = vmatpush3.bf16.msra.mxu1 %v4741_v24  ;;  %v2670_v24 = vld [vmem:[#allocation3 + $0x8a8] sm:$0xff] }
 0x989   : > { %4767 = vmatprep.subr.bf16.mxu1 %v5016_v52 }
 0xa3e   : > { %v2302_v56 = vpop.f32.mrb[64].mxu1 }
 0xa3f   : > { %v2393_v26 = vadd.f32 %v2392_v28, %v2302_v56  ;;  %v4109_v6 = vpop.f32.mrb[65].mxu1  ;;  %v2676_v56 = vld [vmem:[#allocation3 + $0x8d8] sm:$0xff] }
 0xa40   : > { %v2798_v6 = vld [vmem:[#allocation3 + $0x8f0] sm:$0xff] }
 0xa41   : > { %v5833_v30 = vadd.f32 %v3136_v20, %v2393_v26 }
 0xa42   : > { %v2307_v12 = vpop.f32.mrb[66].mxu1 }
 0xa43   : > { %v2398_v61 = vadd.f32 %v2397_v2, %v2307_v12  ;;  %v4112_v59 = vpop.f32.mrb[67].mxu1  ;;  %4202 = vmatmul.mubr.f32.vlgmr.msra.gmra.mrb[74].mxu1 %v5833_v30  ;;  %v2671_v2 = vld [vmem:[#allocation3 + $0x8b0] sm:$0xff]  ;;  %v2799_v12 = vld [vmem:[#allocation3 + $0x8f8] sm:$0xff] }
 0xa44   : > { %4204 = vmatprep.mubr.msk.f32.mxu1 %vm5017_vm0, %v5018_v25  ;;  %4769 = vmatpush3.bf16.msra.mxu1 %v4768_v32  ;;  %v4780_v15 = vpack.c.bf16 %v2671_v2, %v2670_v24  ;;  %v4792_v59 = vpack.c.bf16 %v2799_v12, %v2798_v6  ;;  %v2811_v6 = vld [vmem:[#allocation3 + $0x958] sm:$0xff] }
 0xa45   : > { %v5838_v60 = vadd.f32 %v3136_v20, %v2398_v61  ;;  %4770 = vmatprep.subr.bf16.mxu1 %v5016_v52  ;;  %v2800_v61 = vld [vmem:[#allocation3 + $0x900] sm:$0xff] }
 0xa46   : > { %v2312_v43 = vpop.f32.mrb[68].mxu1 }
 0xa47   : > { %v2403_v10 = vadd.f32 %v2402_v3, %v2312_v43  ;;  %v4115_v45 = vpop.f32.mrb[69].mxu1  ;;  %4205 = vmatmul.mubr.f32.gmra.mrb[76].mxu1 %v5838_v60  ;;  %v2672_v3 = vld [vmem:[#allocation3 + $0x8b8] sm:$0xff]  ;;  %v2801_v43 = vld [vmem:[#allocation3 + $0x908] sm:$0xff] }
 0xa48   : > { %4207 = vmatprep.mubr.msk.f32.mxu1 %vm5017_vm0, %v5018_v25  ;;  %4772 = vmatpush3.bf16.msra.mxu1 %v4771_v36  ;;  %v2802_v45 = vld [vmem:[#allocation3 + $0x910] sm:$0xff] }
 0xa49   : > { %v5843_v41 = vadd.f32 %v3136_v20, %v2403_v10  ;;  %4773 = vmatprep.subr.bf16.mxu1 %v5016_v52  ;;  %v4795_v10 = vpack.c.bf16 %v2801_v43, %v2800_v61  ;;  %v2813_v61 = vld [vmem:[#allocation3 + $0x968] sm:$0xff] }
 0xa4a   : > { %v2317_v35 = vpop.f32.mrb[70].mxu1  ;;  %v3139_v43 = vld [vmem:[#allocation3 + $0x8e8] ss:$0 sm:$0xff] }
 0xa4b   : > { %v2408_v23 = vadd.f32 %v2407_v62, %v2317_v35  ;;  %v4118_v46 = vpop.f32.mrb[71].mxu1  ;;  %4208 = vmatmul.mubr.f32.gmra.mrb[78].mxu1 %v5843_v41  ;;  %v4783_v62 = vpack.c.bf16 %v2673_v13, %v2672_v3  ;;  %v2803_v35 = vld [vmem:[#allocation3 + $0x918] sm:$0xff] }
 0xa4c   : > { %4210 = vmatprep.mubr.msk.f32.mxu1 %vm5017_vm0, %v5018_v25  ;;  %4775 = vmatpush3.bf16.msra.mxu1 %v4774_v31  ;;  %v2804_v46 = vld [vmem:[#allocation3 + $0x920] sm:$0xff] }
 0xa4d   : > { %v5848_v4 = vadd.f32 %v3136_v20, %v2408_v23  ;;  %4776 = vmatprep.subr.bf16.mxu1 %v5016_v52  ;;  %v4798_v23 = vpack.c.bf16 %v2803_v35, %v2802_v45 }
 0xa4e   : > { %v2322_v29 = vpop.f32.mrb[72].mxu1 }
 0xa4f   : > { %v2413_v53 = vadd.f32 %v2412_v1, %v2322_v29  ;;  %4211 = vmatmul.mubr.f32.gmra.mrb[80].mxu1 %v5848_v4  ;;  %v4121_v44 = vpop.f32.mrb[73].mxu1  ;;  %v2675_v1 = vld [vmem:[#allocation3 + $0x8d0] sm:$0xff]  ;;  %v2805_v29 = vld [vmem:[#allocation3 + $0x928] sm:$0xff] }
 0xa50   : > { %4213 = vmatprep.mubr.msk.f32.mxu1 %vm5017_vm0, %v5018_v25  ;;  %4778 = vmatpush3.bf16.msra.mxu1 %v4777_v63  ;;  %v4786_v16 = vpack.c.bf16 %v2675_v1, %v2674_v50  ;;  %v2806_v44 = vld [vmem:[#allocation3 + $0x930] sm:$0xff] }
 0xa51   : > { %v5853_v58 = vadd.f32 %v3136_v20, %v2413_v53  ;;  %4779 = vmatprep.subr.bf16.mxu1 %v5016_v52  ;;  %v2677_v20 = vld [vmem:[#allocation3 + $0x8e0] sm:$0xff]  ;;  %v4801_v53 = vpack.c.bf16 %v2805_v29, %v2804_v46  ;;  %v4804_v49 = vpack.c.bf16 %v2807_v40, %v2806_v44 }
 0xa52   : > { %v4789_v26 = vpack.c.bf16 %v2677_v20, %v2676_v56  ;;  %v2809_v56 = vld [vmem:[#allocation3 + $0x948] sm:$0xff] }
 0xa53   : > { %4214 = vmatmul.mubr.f32.gmra.mrb[82].mxu1 %v5853_v58 }
 0xa54   : > { %4295 = vmatprep.mubr.msk.f32.mxu1 %vm5017_vm0, %v5018_v25  ;;  %4781 = vmatpush3.bf16.msra.mxu1 %v4780_v15 }
 0xa55   : > { %4782 = vmatprep.subr.bf16.mxu1 %v5016_v52 }
 0xa58   : > { %4784 = vmatpush3.bf16.msra.mxu1 %v4783_v62 }
 0xa59   : > { %4785 = vmatprep.subr.bf16.mxu1 %v5016_v52 }
 0xa5c   : > { %4787 = vmatpush3.bf16.msra.mxu1 %v4786_v16 }
 0xa5d   : > { %4788 = vmatprep.subr.bf16.mxu1 %v5016_v52 }
 0xa60   : > { %4790 = vmatpush3.bf16.msra.mxu1 %v4789_v26  ;;  %v2810_v26 = vld [vmem:[#allocation3 + $0x950] sm:$0xff] }
 0xa61   : > { %4815 = vmatprep.subr.bf16.mxu1 %v5016_v52  ;;  %v4810_v12 = vpack.c.bf16 %v2811_v6, %v2810_v26 }
 0xb16   : > { %v2508_v33 = vpop.f32.mrb[74].mxu1 }
 0xb17   : > { %v5862_v42 = vsub.f32 %v5833_v30, %v2508_v33  ;;  %v4203_v39 = vpop.f32.mrb[75].mxu1 }
 0xb19   : > { %v2537_v54 = vmul.f32 %v5862_v42, %v5862_v42 }
 0xb1a   : > { %v2513_v34 = vpop.f32.mrb[76].mxu1 }
 0xb1b   : > { %v5867_v0 = vsub.f32 %v5838_v60, %v2513_v34  ;;  %v4206_v19 = vpop.f32.mrb[77].mxu1  ;;  %4249 = vmatmul.mubr.f32.vlgmr.msra.gmra.mrb[90].mxu0 %v2537_v54 }
 0xb1c   : > { %4251 = vmatprep.mubr.msk.f32.mxu0 %vm5017_vm0, %v5018_v25  ;;  %4793 = vmatpush3.bf16.msra.mxu0 %v4792_v59 }
 0xb1d   : > { %v2538_v27 = vmul.f32 %v5867_v0, %v5867_v0  ;;  %4794 = vmatprep.subr.bf16.mxu0 %v5016_v52 }
 0xb1e   : > { %v2518_v21 = vpop.f32.mrb[78].mxu1 }
 0xb1f   : > { %v5874_v51 = vsub.f32 %v5843_v41, %v2518_v21  ;;  %v4209_v11 = vpop.f32.mrb[79].mxu1  ;;  %4252 = vmatmul.mubr.f32.gmra.mrb[92].mxu0 %v2538_v27  ;;  %v3137_v21 = vld [vmem:[#allocation3 + $0x858] ss:$0 sm:$0xff] }
 0xb20   : > { %4254 = vmatprep.mubr.msk.f32.mxu0 %vm5017_vm0, %v5018_v25  ;;  %4796 = vmatpush3.bf16.msra.mxu0 %v4795_v10 }
 0xb21   : > { %v2539_v57 = vmul.f32 %v5874_v51, %v5874_v51  ;;  %4797 = vmatprep.subr.bf16.mxu0 %v5016_v52 }
 0xb22   : > { %v2523_v37 = vpop.f32.mrb[80].mxu1 }
 0xb23   : > { %v5881_v8 = vsub.f32 %v5848_v4, %v2523_v37  ;;  %v4212_v9 = vpop.f32.mrb[81].mxu1  ;;  %4255 = vmatmul.mubr.f32.gmra.mrb[94].mxu0 %v2539_v57  ;;  %v3138_v57 = vld [vmem:[#allocation3 + $0x860] ss:$0 sm:$0xff] }
 0xb24   : > { %4257 = vmatprep.mubr.msk.f32.mxu0 %vm5017_vm0, %v5018_v25  ;;  %4799 = vmatpush3.bf16.msra.mxu0 %v4798_v23 }
 0xb25   : > { %v2540_v7 = vmul.f32 %v5881_v8, %v5881_v8  ;;  %4800 = vmatprep.subr.bf16.mxu0 %v5016_v52 }
 0xb26   : > { %v2528_v5 = vpop.f32.mrb[82].mxu1 }
 0xb27   : > { %v5888_v38 = vsub.f32 %v5853_v58, %v2528_v5  ;;  %4258 = vmatmul.mubr.f32.gmra.mrb[96].mxu0 %v2540_v7  ;;  %v4215_v48 = vpop.f32.mrb[83].mxu1 }
 0xb28   : > { %4260 = vmatprep.mubr.msk.f32.mxu0 %vm5017_vm0, %v5018_v25  ;;  %4802 = vmatpush3.bf16.msra.mxu0 %v4801_v53 }
 0xb29   : > { %v2541_v28 = vmul.f32 %v5888_v38, %v5888_v38  ;;  %4803 = vmatprep.subr.bf16.mxu0 %v5016_v52 }
 0xb2b   : > { %4261 = vmatmul.mubr.f32.gmra.mrb[98].mxu0 %v2541_v28 }
 0xb2c   : > { %4342 = vmatprep.mubr.msk.f32.mxu0 %vm5017_vm0, %v5018_v25  ;;  %4805 = vmatpush3.bf16.msra.mxu0 %v4804_v49 }
 0xb2d   : > { %4806 = vmatprep.subr.bf16.mxu0 %v5016_v52 }
 0xbee   : > { %v2608_v17 = vpop.f32.mrb[90].mxu0 }
 0xbef   : > { %v2609_v32 = vadd.f32 1e-05, %v2608_v17  ;;  %v4250_v22 = vpop.f32.mrb[91].mxu0 }
 0xbf1   : > { %4931 = vrsqrt.f32 %v2609_v32 }
 0xbf2   : > { %v2613_v36 = vpop.f32.mrb[92].mxu0 }
 0xbf3   : > { %v2614_v55 = vadd.f32 1e-05, %v2613_v36  ;;  %v4253_v14 = vpop.f32.mrb[93].mxu0 }
 0xbf5   : > { %4933 = vrsqrt.f32 %v2614_v55 }
 0xbf6   : > { %v2618_v31 = vpop.f32.mrb[94].mxu0 }
 0xbf7   : > { %v2619_v33 = vadd.f32 1e-05, %v2618_v31  ;;  %v4256_v39 = vpop.f32.mrb[95].mxu0 }
 0xbf9   : > { %4935 = vrsqrt.f32 %v2619_v33 }
 0xbfa   : > { %v2623_v54 = vpop.f32.mrb[96].mxu0 }
 0xbfb   : > { %v4932_v34 = vpop.eup %4931  ;;  %v2624_v19 = vadd.f32 1e-05, %v2623_v54  ;;  %v4259_v27 = vpop.f32.mrb[97].mxu0 }
 0xbfc   : > { %v2637_v11 = vmul.f32 %v4932_v34, %v5862_v42 }
 0xbfd   : > { %4937 = vrsqrt.f32 %v2624_v19 }
 0xbfe   : > { %v2628_v37 = vpop.f32.mrb[98].mxu0  ;;  %v2647_v9 = vmul.f32 %v3137_v21, %v2637_v11 }
 0xbff   : > { %v4934_v7 = vpop.eup %4933  ;;  %v2629_v5 = vadd.f32 1e-05, %v2628_v37  ;;  %v4262_v48 = vpop.f32.mrb[99].mxu0 }
 0xc00   : > { %v2657_v28 = vadd.f32 %v3138_v57, %v2647_v9  ;;  %v2638_v18 = vmul.f32 %v4934_v7, %v5867_v0 }
 0xc01   : > { %4939 = vrsqrt.f32 %v2629_v5 }
 0xc02   : > { %4296 = vmatmul.mubr.f32.vlgmr.msra.gmra.mrb[84].mxu1 %v2657_v28  ;;  %v2648_v47 = vmul.f32 %v3137_v21, %v2638_v18 }
 0xc03   : > { %v4936_v63 = vpop.eup %4935  ;;  %4298 = vmatprep.mubr.msk.f32.mxu1 %vm5017_vm0, %v5018_v25 }
 0xc04   : > { %v2658_v24 = vadd.f32 %v3138_v57, %v2648_v47  ;;  %v2639_v42 = vmul.f32 %v4936_v63, %v5874_v51 }
 0xc06   : > { %4299 = vmatmul.mubr.f32.gmra.mrb[86].mxu1 %v2658_v24  ;;  %v2649_v2 = vmul.f32 %v3137_v21, %v2639_v42 }
 0xc07   : > { %v4938_v15 = vpop.eup %4937  ;;  %4301 = vmatprep.mubr.msk.f32.mxu1 %vm5017_vm0, %v5018_v25 }
 0xc08   : > { %v2659_v3 = vadd.f32 %v3138_v57, %v2649_v2  ;;  %v2640_v13 = vmul.f32 %v4938_v15, %v5881_v8  ;;  %v2808_v8 = vld [vmem:[#allocation3 + $0x940] sm:$0xff] }
 0xc09   : > { %v4807_v20 = vpack.c.bf16 %v2809_v56, %v2808_v8 }
 0xc0a   : > { %4302 = vmatmul.mubr.f32.gmra.mrb[88].mxu1 %v2659_v3  ;;  %v2650_v0 = vmul.f32 %v3137_v21, %v2640_v13 }
 0xc0b   : > { %v4940_v62 = vpop.eup %4939  ;;  %4304 = vmatprep.mubr.msk.f32.mxu1 %vm5017_vm0, %v5018_v25  ;;  %4808 = vmatpush3.bf16.msra.mxu0 %v4807_v20 }
 0xc0c   : > { %v2660_v50 = vadd.f32 %v3138_v57, %v2650_v0  ;;  %v2641_v1 = vmul.f32 %v4940_v62, %v5888_v38  ;;  %4809 = vmatprep.subr.bf16.mxu0 %v5016_v52  ;;  %v2812_v38 = vld [vmem:[#allocation3 + $0x960] sm:$0xff]  ;;  %v3140_v62 = vld [vmem:[#allocation3 + $0x970] ss:$0 sm:$0xff] }
 0xc0d   : > { %v4813_v59 = vpack.c.bf16 %v2813_v61, %v2812_v38 }
 0xc0e   : > { %4305 = vmatmul.mubr.f32.gmra.mrb[90].mxu1 %v2660_v50  ;;  %v2651_v51 = vmul.f32 %v3137_v21, %v2641_v1 }
 0xc0f   : > { %4307 = vmatprep.mubr.msk.f32.mxu1 %vm5017_vm0, %v5018_v25  ;;  %4811 = vmatpush3.bf16.msra.mxu0 %v4810_v12 }
 0xc10   : > { %v2661_v16 = vadd.f32 %v3138_v57, %v2651_v51  ;;  %4812 = vmatprep.subr.bf16.mxu0 %v5016_v52 }
 0xc12   : > { %4308 = vmatmul.mubr.f32.gmra.mrb[92].mxu1 %v2661_v16 }
 0xc13   : > { %4367 = vmatprep.mubr.msk.f32.mxu1 %vm5017_vm0, %v5018_v25  ;;  %4814 = vmatpush3.bf16.msra.mxu0 %v4813_v59 }
 0xcd5   : > { %v2749_v10 = vpop.f32.mrb[84].mxu1 }
 0xcd6   : > { %v2750_v45 = vadd.f32 %v3139_v43, %v2749_v10  ;;  %v4297_v35 = vpop.f32.mrb[85].mxu1 }
 0xcd7   : > { %v4822_v35 = vpack.c.bf16 %v5838_v60, %v5833_v30 }
 0xcd8   : > { %v2773_v23 = vadd.f32 3.0, %v2750_v45 }
 0xcd9   : > { %v2754_v46 = vpop.f32.mrb[86].mxu1 }
 0xcda   : > { %v2778_v29 = vmax.f32 %v2773_v23, 0.0  ;;  %v2755_v53 = vadd.f32 %v3139_v43, %v2754_v46  ;;  %v4300_v44 = vpop.f32.mrb[87].mxu1  ;;  %v4825_v23 = vpack.c.bf16 %v5848_v4, %v5843_v41  ;;  %v2909_v46 = vld [vmem:[#allocation3 + $0x978] sm:$0x1] }
 0xcdc   : > { %v2783_v40 = vmin.f32 %v2778_v29, 6.0  ;;  %v2774_v49 = vadd.f32 3.0, %v2755_v53 }
 0xcdd   : > { %v2759_v17 = vpop.f32.mrb[88].mxu1 }
 0xcde   : > { %v2788_v32 = vmul.f32 %v2783_v40, %v2750_v45  ;;  %v2779_v22 = vmax.f32 %v2774_v49, 0.0  ;;  %v2760_v36 = vadd.f32 %v3139_v43, %v2759_v17  ;;  %v4303_v55 = vpop.f32.mrb[89].mxu1  ;;  %v2910_v45 = vld [vmem:[#allocation3 + $0x980] sm:$0x1] }
 0xce0   : > { %v2793_v14 = vmul.f32 0.16666667, %v2788_v32  ;;  %v2784_v31 = vmin.f32 %v2779_v22, 6.0  ;;  %v2775_v33 = vadd.f32 3.0, %v2760_v36 }
 0xce1   : > { %v2764_v39 = vpop.f32.mrb[90].mxu1 }
 0xce2   : > { %v2789_v54 = vmul.f32 %v2784_v31, %v2755_v53  ;;  %v2780_v34 = vmax.f32 %v2775_v33, 0.0  ;;  %v2765_v19 = vadd.f32 %v3139_v43, %v2764_v39  ;;  %v4306_v27 = vpop.f32.mrb[91].mxu1  ;;  %4343 = vmatmul.mubr.f32.vlgmr.msra.gmra.mrb[100].mxu0 %v2793_v14  ;;  %v3058_v53 = vld [vmem:[#allocation3 + $0x988] sm:$0x1] }
 0xce3   : > { %4345 = vmatprep.mubr.msk.f32.mxu0 %vm5017_vm0, %v5018_v25 }
 0xce4   : > { %v2794_v21 = vmul.f32 0.16666667, %v2789_v54  ;;  %v2785_v11 = vmin.f32 %v2780_v34, 6.0  ;;  %v2776_v57 = vadd.f32 3.0, %v2765_v19 }
 0xce5   : > { %v2769_v37 = vpop.f32.mrb[92].mxu1 }
 0xce6   : > { %v2790_v9 = vmul.f32 %v2785_v11, %v2760_v36  ;;  %v2781_v7 = vmax.f32 %v2776_v57, 0.0  ;;  %v2770_v5 = vadd.f32 %v3139_v43, %v2769_v37  ;;  %v4309_v48 = vpop.f32.mrb[93].mxu1  ;;  %4346 = vmatmul.mubr.f32.gmra.mrb[102].mxu0 %v2794_v21 }
 0xce7   : > { %4348 = vmatprep.mubr.msk.f32.mxu0 %vm5017_vm0, %v5018_v25 }
 0xce8   : > { %v2795_v28 = vmul.f32 0.16666667, %v2790_v9  ;;  %v2786_v18 = vmin.f32 %v2781_v7, 6.0  ;;  %v2777_v47 = vadd.f32 3.0, %v2770_v5 }
 0xcea   : > { %v2791_v63 = vmul.f32 %v2786_v18, %v2765_v19  ;;  %v2782_v24 = vmax.f32 %v2777_v47, 0.0  ;;  %4349 = vmatmul.mubr.f32.gmra.mrb[104].mxu0 %v2795_v28 }
 0xceb   : > { %4351 = vmatprep.mubr.msk.f32.mxu0 %vm5017_vm0, %v5018_v25 }
 0xcec   : > { %v2796_v42 = vmul.f32 0.16666667, %v2791_v63  ;;  %v2787_v2 = vmin.f32 %v2782_v24, 6.0 }
 0xcee   : > { %v2792_v15 = vmul.f32 %v2787_v2, %v2770_v5  ;;  %4352 = vmatmul.mubr.f32.gmra.mrb[106].mxu0 %v2796_v42 }
 0xcef   : > { %4354 = vmatprep.mubr.msk.f32.mxu0 %vm5017_vm0, %v5018_v25 }
 0xcf0   : > { %v2797_v3 = vmul.f32 0.16666667, %v2792_v15 }
 0xcf2   : > { %4355 = vmatmul.mubr.f32.gmra.mrb[108].mxu0 %v2797_v3 }
 0xdb5   : > { %v2885_v13 = vpop.f32.mrb[100].mxu0 }
 0xdb6   : > { %v4344_v0 = vpop.f32.mrb[101].mxu0  ;;  %v2886_v1 = vadd.f32 %v3140_v62, %v2885_v13 }
 0xdb9   : > { %v2890_v50 = vpop.f32.mrb[102].mxu0 }
 0xdba   : > { %v2891_v51 = vadd.f32 %v3140_v62, %v2890_v50  ;;  %v4347_v16 = vpop.f32.mrb[103].mxu0 }
 0xdbc   : > { %v4816_v8 = vpack.c.bf16 %v2891_v51, %v2886_v1 }
 0xdbd   : > { %v2895_v56 = vpop.f32.mrb[104].mxu0 }
 0xdbe   : > { %v4350_v20 = vpop.f32.mrb[105].mxu0  ;;  %4817 = vmatpush3.bf16.msra.mxu1 %v4816_v8  ;;  %v2896_v6 = vadd.f32 %v3140_v62, %v2895_v56 }
 0xdbf   : > { %4818 = vmatprep.subr.bf16.mxu1 %v5016_v52 }
 0xdc1   : > { %v2900_v26 = vpop.f32.mrb[106].mxu0 }
 0xdc2   : > { %v2901_v12 = vadd.f32 %v3140_v62, %v2900_v26  ;;  %v4353_v38 = vpop.f32.mrb[107].mxu0 }
 0xdc4   : > { %v4819_v61 = vpack.c.bf16 %v2901_v12, %v2896_v6 }
 0xdc5   : > { %v2905_v59 = vpop.f32.mrb[108].mxu0 }
 0xdc6   : > { %v4356_v43 = vpop.f32.mrb[109].mxu0  ;;  %4820 = vmatpush3.bf16.msra.mxu1 %v4819_v61  ;;  %v2906_v10 = vadd.f32 %v3140_v62, %v2905_v59 }
 0xdc7   : > { %4365 = vmatprep.subr.mxu1 %v5018_v25 }
 0xdca   : > { %4366 = vmatpush3.msra.mxu1 %v2906_v10 }
 0xdcb   : > { %4821 = vmatprep.subr.bf16.mxu1 %v5016_v52  ;;  %4368 = vmatmul.mubr.msk.f32.vlgmr.msra.gmra.mrb[94].mxu1 %vm2911_vm1, %v2910_v45 }
 0xdcc   : > { %4823 = vmatpush3.bf16.msra.mxu1 %v4822_v35  ;;  %4380 = vmatprep.mubr.msk.f32.mxu1 %vm5017_vm0, %v5018_v25 }
 0xdcd   : > { %4824 = vmatprep.subr.bf16.mxu1 %v5016_v52 }
 0xdd0   : > { %4826 = vmatpush3.bf16.msra.mxu1 %v4825_v23 }
 0xdd1   : > { %4378 = vmatprep.subr.mxu1 %v5018_v25 }
 0xdd4   : > { %4379 = vmatpush3.msra.mxu1 %v5853_v58 }
 0xdd5   : > { %4381 = vmatmul.mubr.msk.f32.vlgmr.msra.gmra.mrb[96].mxu1 %vm2911_vm1, %v2909_v46 }
 0xe9e   : > { %v2981_v30 = vpop.f32.mrb[94].mxu1 }
 0xe9f   : > { %v4369_v60 = vpop.f32.mrb[95].mxu1 }
 0xea8   : > { %v3054_v29 = vpop.f32.mrb[96].mxu1 }
 0xea9   : > { %v3055_v44 = vadd.f32 %v3054_v29, %v2981_v30  ;;  %v4382_v40 = vpop.f32.mrb[97].mxu1 }
 0xeab   : > { %v3059_v52 = vadd.f32 %v3058_v53, %v3055_v44 }
 0xead   : > { %3060 = vst [vmem:[%s248_s22] sm:$0x1] %v3059_v52 }
 0xeae PF: > { %p10_p11 = scmp.ge.s32.totalorder %s5053_s13, 4   ;;  %s5994_s9 = smov %s5007_s10 }
 0xeaf   : > { %s5995_s10 = smov %s5063_s16  ;;  %s5996_s11 = smov %s5053_s13 }
 0xeb0   :  { %12 = sbr.rel (!%p10_p11) target bundleno = 2 (0x2), region = 106 }
 0xeb7   :  { %3078 = vsyncpa [#allocation4], 1 }
 0xeb8   :  { %3080 = vsyncpa [#allocation4 + $0x1], 1 }

</bundles_post_ra>
